<compile_context>
chip_gen: v7x
topology: tpu7x:2x2x1
jax: 0.10.0
libtpu: 0.0.40
codegen_flags: <defaults>
</compile_context>

<pallas_src>
import functools
import math

import numpy as np

import jax
import jax.numpy as jnp
from jax import lax
from jax.experimental import pallas as pl
from jax.experimental.pallas import tpu as pltpu

NEG_INF = -1e9
LN_EPS = 1e-6
LANE = 128


# ----------------------------------------------------------------------------
# Static parameter layout inside the two packed slabs
# ----------------------------------------------------------------------------

def _param_layout(cfg):
    d, F = cfg["d_model"], cfg["d_ff"]
    mats, vecs = {}, {}
    mrow, vrow = 0, 0

    def add_mat(name, r, c):
        nonlocal mrow
        mats[name] = (mrow, r, c)
        mrow += r

    def add_vec(name, c):
        nonlocal vrow
        vecs[name] = (vrow, c)
        vrow += 1

    def add_attn(prefix):
        add_mat(prefix + ".wqkv", d, 3 * d)
        add_mat(prefix + ".wo", d, d)
        add_vec(prefix + ".bqkv", 3 * d)
        add_vec(prefix + ".bo", d)

    def add_ffn(prefix):
        add_mat(prefix + ".w1", d, F)
        add_mat(prefix + ".w2", F, d)
        add_vec(prefix + ".ln_g", d)
        add_vec(prefix + ".ln_b", d)
        add_vec(prefix + ".b1", F)
        add_vec(prefix + ".b2", d)

    for l in range(cfg["num_encoder_layers"]):
        add_vec(f"enc{l}.ln1_g", d)
        add_vec(f"enc{l}.ln1_b", d)
        add_attn(f"enc{l}.attn")
        add_ffn(f"enc{l}.ffn")
    for l in range(cfg["num_decoder_layers"]):
        add_vec(f"dec{l}.ln1_g", d)
        add_vec(f"dec{l}.ln1_b", d)
        add_vec(f"dec{l}.ln2_g", d)
        add_vec(f"dec{l}.ln2_b", d)
        add_attn(f"dec{l}.self")
        add_attn(f"dec{l}.ctx")
        add_ffn(f"dec{l}.ffn")
    add_vec("enc_ln_g", d)
    add_vec("enc_ln_b", d)
    add_vec("dec_ln_g", d)
    add_vec("dec_ln_b", d)
    add_mat("gen.w", d, cfg["target_vocab_size"])

    m_rows = ((mrow + 7) // 8) * 8
    v_rows = ((vrow + 7) // 8) * 8
    return mats, vecs, m_rows, v_rows


# ----------------------------------------------------------------------------
# One-time parameter packing (host-side, outside jit): fold attention scale,
# concatenate Wq|Wk|Wv, pack everything into 2 lane-dense slabs.
# ----------------------------------------------------------------------------

def prepare_params(params, cfg):
    d, H = cfg["d_model"], cfg["n_heads"]
    dh = d // H
    scale = 1.0 / math.sqrt(dh)                        # OpenNMT: q = q / sqrt(dh)
    mats, vecs, MR, VR = _param_layout(cfg)

    w_slab = np.zeros((MR, LANE), np.float32)
    v_slab = np.zeros((VR, LANE), np.float32)

    def set_mat(name, val):
        off, r, c = mats[name]
        w_slab[off:off + r, :c] = np.asarray(val, np.float32)

    def set_vec(name, val):
        off, c = vecs[name]
        v_slab[off, :c] = np.asarray(val, np.float32)

    def set_attn(prefix, p):
        wqkv = np.concatenate([np.asarray(p["wq"], np.float32) * scale,
                               np.asarray(p["wk"], np.float32),
                               np.asarray(p["wv"], np.float32)], axis=1)
        bqkv = np.concatenate([np.asarray(p["bq"], np.float32) * scale,
                               np.asarray(p["bk"], np.float32),
                               np.asarray(p["bv"], np.float32)], axis=0)
        set_mat(prefix + ".wqkv", wqkv)
        set_vec(prefix + ".bqkv", bqkv)
        set_mat(prefix + ".wo", p["wo"])
        set_vec(prefix + ".bo", p["bo"])

    def set_ffn(prefix, p):
        set_vec(prefix + ".ln_g", p["ln_g"])
        set_vec(prefix + ".ln_b", p["ln_b"])
        set_mat(prefix + ".w1", p["w1"])
        set_vec(prefix + ".b1", p["b1"])
        set_mat(prefix + ".w2", p["w2"])
        set_vec(prefix + ".b2", p["b2"])

    for l, lp in enumerate(params["enc_layers"]):
        set_vec(f"enc{l}.ln1_g", lp["ln1_g"])
        set_vec(f"enc{l}.ln1_b", lp["ln1_b"])
        set_attn(f"enc{l}.attn", lp["self_attn"])
        set_ffn(f"enc{l}.ffn", lp["ffn"])
    for l, lp in enumerate(params["dec_layers"]):
        set_vec(f"dec{l}.ln1_g", lp["ln1_g"])
        set_vec(f"dec{l}.ln1_b", lp["ln1_b"])
        set_vec(f"dec{l}.ln2_g", lp["ln2_g"])
        set_vec(f"dec{l}.ln2_b", lp["ln2_b"])
        set_attn(f"dec{l}.self", lp["self_attn"])
        set_attn(f"dec{l}.ctx", lp["ctx_attn"])
        set_ffn(f"dec{l}.ffn", lp["ffn"])
    set_vec("enc_ln_g", params["enc_ln_g"])
    set_vec("enc_ln_b", params["enc_ln_b"])
    set_vec("dec_ln_g", params["dec_ln_g"])
    set_vec("dec_ln_b", params["dec_ln_b"])
    set_mat("gen.w", params["generator_w"])

    return dict(
        w_slab=jnp.asarray(w_slab).astype(jnp.bfloat16),   # MXU-friendly matrices
        v_slab=jnp.asarray(v_slab),                        # f32 LN params / biases
        src_word_lut=params["src_word_lut"],
        tgt_word_lut=params["tgt_word_lut"],
        pe=params["pe"],
    )


# ----------------------------------------------------------------------------
# The fused Pallas kernel: one grid step per batch element (whole forward)
# ----------------------------------------------------------------------------

def _build_kernel(cfg, S, L, mats, vecs):
    d = cfg["d_model"]
    H = cfg["n_heads"]
    dh = d // H
    n_enc = cfg["num_encoder_layers"]
    n_dec = cfg["num_decoder_layers"]

    def kernel(w_ref, v_ref, src_ref, tgt_ref, enc_bias_ref, self_bias_ref,
               logits_ref, misc_ref):

        def mat(name):
            off, r, c = mats[name]
            return w_ref[off:off + r, :c]          # bf16 weight block

        def mat_full(name):
            off, r, _ = mats[name]
            return w_ref[off:off + r, :]           # full 128 lanes (zero padded)

        def vec(name):
            off, c = vecs[name]
            return v_ref[off:off + 1, :c]          # [1, c] f32

        def bdot(a, w):
            return jnp.dot(a.astype(jnp.bfloat16), w,
                           preferred_element_type=jnp.float32)

        def layer_norm(x, gname, bname):
            g = vec(gname)
            b = vec(bname)
            mu = jnp.mean(x, axis=-1, keepdims=True)
            xc = x - mu
            var = jnp.mean(xc * xc, axis=-1, keepdims=True)
            return xc * lax.rsqrt(var + LN_EPS) * g + b

        def mha(prefix, x_q, x_kv, bias, is_self, want_attn):
            """x_q: [Lq, d], x_kv: [Lk, d], bias additive [Lq or 1, Lk]."""
            if is_self:
                qkv = bdot(x_q, mat(prefix + ".wqkv")) + vec(prefix + ".bqkv")
                q, k, v = qkv[:, :d], qkv[:, d:2 * d], qkv[:, 2 * d:3 * d]
            else:
                w = mat(prefix + ".wqkv")          # [d, 3d]
                b = vec(prefix + ".bqkv")          # [1, 3d]
                q = bdot(x_q, w[:, :d]) + b[:, :d]
                kv = bdot(x_kv, w[:, d:]) + b[:, d:]
                k, v = kv[:, :d], kv[:, d:]

            ctxs = []
            attn0 = None
            for h in range(H):
                q_h = q[:, h * dh:(h + 1) * dh]
                k_h = k[:, h * dh:(h + 1) * dh]
                v_h = v[:, h * dh:(h + 1) * dh]
                s = lax.dot_general(q_h.astype(jnp.bfloat16),
                                    k_h.astype(jnp.bfloat16),
                                    (((1,), (1,)), ((), ())),
                                    preferred_element_type=jnp.float32) + bias
                m = jnp.max(s, axis=-1, keepdims=True)
                e = jnp.exp(s - m)
                denom = jnp.sum(e, axis=-1, keepdims=True)
                if want_attn and h == 0:
                    p_h = e / denom                # exact: this tensor is returned
                    attn0 = p_h
                else:
                    p_h = e * pl.reciprocal(denom, approx=True)
                ctxs.append(jnp.dot(p_h.astype(jnp.bfloat16),
                                    v_h.astype(jnp.bfloat16),
                                    preferred_element_type=jnp.float32))
            ctx = jnp.concatenate(ctxs, axis=-1)   # [Lq, d], head order
            out = bdot(ctx, mat(prefix + ".wo")) + vec(prefix + ".bo")
            return out, attn0

        def ffn(prefix, x):
            xn = layer_norm(x, prefix + ".ln_g", prefix + ".ln_b")
            h1 = jnp.maximum(bdot(xn, mat(prefix + ".w1")) + vec(prefix + ".b1"),
                             0.0)
            return bdot(h1, mat(prefix + ".w2")) + vec(prefix + ".b2") + x

        src_bias = enc_bias_ref[...]               # [1, S] additive key mask

        # ------------------------- encoder -------------------------
        x = src_ref[...].astype(jnp.float32)       # [S, d]
        for l in range(n_enc):
            pre = f"enc{l}"
            xn = layer_norm(x, pre + ".ln1_g", pre + ".ln1_b")
            ctx, _ = mha(pre + ".attn", xn, xn, src_bias, True, False)
            x = ffn(pre + ".ffn", x + ctx)
        memory = layer_norm(x, "enc_ln_g", "enc_ln_b")          # [S, d]

        # ------------------------- decoder -------------------------
        tgt_bias = self_bias_ref[...]              # [L, L] additive (pad + causal)
        y = tgt_ref[...].astype(jnp.float32)       # [L, d]
        attn_std = None
        for l in range(n_dec):
            pre = f"dec{l}"
            yn = layer_norm(y, pre + ".ln1_g", pre + ".ln1_b")
            sa, _ = mha(pre + ".self", yn, yn, tgt_bias, True, False)
            qy = y + sa
            qn = layer_norm(qy, pre + ".ln2_g", pre + ".ln2_b")
            ca, a0 = mha(pre + ".ctx", qn, memory, src_bias, False,
                         l == n_dec - 1)
            if a0 is not None:
                attn_std = a0                      # head 0, last layer (OpenNMT "std")
            y = ffn(pre + ".ffn", qy + ca)
        y = layer_norm(y, "dec_ln_g", "dec_ln_b")  # [L, d]

        # ------------------- lane-dense outputs --------------------
        logits_ref[...] = bdot(y, mat_full("gen.w"))            # [L, 128]
        pad_w = LANE - d - S
        parts = [y, attn_std]
        if pad_w:
            parts.append(jnp.zeros((L, pad_w), jnp.float32))
        misc_ref[...] = jnp.concatenate(parts, axis=-1)         # [L, 128]

    return kernel


# ----------------------------------------------------------------------------
# Forward wrapper (embeddings / masks in XLA, one pallas_call for the rest)
# ----------------------------------------------------------------------------

def transformer_forward(prepared, source, source_lengths, target, cfg):
    """source: [S, B, 1] int32, source_lengths: [B] int32, target: [T, B, 1] int32.

    Returns (generated [T-1, B, tgt_vocab], decoder_outs [T-1, B, d],
             decoder_attn [T-1, B, S])  -- copy_attention=False branch.
    """
    d = cfg["d_model"]
    v = cfg["target_vocab_size"]
    pad = cfg["comment_pad_idx"]

    src_ids = source[:, :, 0]                      # [S, B]
    dec_in = target[:-1, :, 0]                     # [L, B]
    S, B = src_ids.shape
    L = dec_in.shape[0]
    assert d + S <= LANE  # TODO(synk): widen the packed misc output if d + S > 128

    # Embeddings (data-dependent gathers stay in XLA) + masks.
    # Source Embeddings: no PE / no sqrt(d) scale (position_encoding=False).
    src_x = jnp.transpose(prepared["src_word_lut"][src_ids], (1, 0, 2))        # [B,S,d]
    tgt_y = (prepared["tgt_word_lut"][dec_in] * jnp.sqrt(jnp.float32(d))
             + prepared["pe"][:L][:, None, :])
    tgt_y = jnp.transpose(tgt_y, (1, 0, 2))                                    # [B,L,d]

    src_valid = jnp.arange(S)[None, :] < source_lengths[:, None]               # [B,S]
    enc_bias = jnp.where(src_valid, 0.0, NEG_INF).astype(jnp.float32)[:, None, :]  # [B,1,S]

    tgt_pad = dec_in.T == pad                                                  # [B,L]
    future = jnp.triu(jnp.ones((L, L), bool), k=1)
    self_bias = jnp.where(tgt_pad[:, None, :] | future[None, :, :],
                          NEG_INF, 0.0).astype(jnp.float32)                    # [B,L,L]

    mats, vecs, MR, VR = _param_layout(cfg)
    kernel = _build_kernel(cfg, S, L, mats, vecs)

    logits_p, misc = pl.pallas_call(
        kernel,
        grid=(B,),
        out_shape=(
            jax.ShapeDtypeStruct((B, L, LANE), jnp.float32),   # padded logits
            jax.ShapeDtypeStruct((B, L, LANE), jnp.float32),   # dec_out | dec_attn
        ),
        in_specs=[
            pl.BlockSpec((MR, LANE), lambda b: (0, 0)),        # weight slab (resident)
            pl.BlockSpec((VR, LANE), lambda b: (0, 0)),        # vector slab (resident)
            pl.BlockSpec((None, S, d), lambda b: (b, 0, 0)),   # src embeddings
            pl.BlockSpec((None, L, d), lambda b: (b, 0, 0)),   # tgt embeddings
            pl.BlockSpec((None, 1, S), lambda b: (b, 0, 0)),   # source key bias
            pl.BlockSpec((None, L, L), lambda b: (b, 0, 0)),   # decoder self bias
        ],
        out_specs=(
            pl.BlockSpec((None, L, LANE), lambda b: (b, 0, 0)),
            pl.BlockSpec((None, L, LANE), lambda b: (b, 0, 0)),
        ),
        compiler_params=pltpu.CompilerParams(
            dimension_semantics=("parallel",)),
    )(prepared["w_slab"], prepared["v_slab"], src_x, tgt_y, enc_bias, self_bias)

    generated = jnp.transpose(logits_p[:, :, :v], (1, 0, 2))   # [L, B, V]
    dec_outs = jnp.transpose(misc[:, :, :d], (1, 0, 2))        # [L, B, d]
    dec_attn = jnp.transpose(misc[:, :, d:d + S], (1, 0, 2))   # [L, B, S]
    return generated, dec_outs, dec_attn


# ----------------------------------------------------------------------------
# Deterministic parameter init & positional encoding (same as reference model)
# ----------------------------------------------------------------------------

def positional_encoding(max_len, d):
    pos = jnp.arange(max_len, dtype=jnp.float32)[:, None]
    div = jnp.exp(jnp.arange(0, d, 2, dtype=jnp.float32) * (-jnp.log(10000.0) / d))
    pe = jnp.zeros((max_len, d), jnp.float32)
    pe = pe.at[:, 0::2].set(jnp.sin(pos * div))
    pe = pe.at[:, 1::2].set(jnp.cos(pos * div))
    return pe


def init_params(key, cfg):
    d, F = cfg["d_model"], cfg["d_ff"]
    keys = iter(jax.random.split(key, 256))

    def w(shape):
        return 0.02 * jax.random.normal(next(keys), shape, jnp.float32)

    def attn_params():
        return dict(
            wq=w((d, d)), bq=jnp.zeros((d,), jnp.float32),
            wk=w((d, d)), bk=jnp.zeros((d,), jnp.float32),
            wv=w((d, d)), bv=jnp.zeros((d,), jnp.float32),
            wo=w((d, d)), bo=jnp.zeros((d,), jnp.float32),
        )

    def ffn_params():
        return dict(
            ln_g=jnp.ones((d,), jnp.float32), ln_b=jnp.zeros((d,), jnp.float32),
            w1=w((d, F)), b1=jnp.zeros((F,), jnp.float32),
            w2=w((F, d)), b2=jnp.zeros((d,), jnp.float32),
        )

    enc_layers = [
        dict(ln1_g=jnp.ones((d,), jnp.float32), ln1_b=jnp.zeros((d,), jnp.float32),
             self_attn=attn_params(), ffn=ffn_params())
        for _ in range(cfg["num_encoder_layers"])
    ]
    dec_layers = [
        dict(ln1_g=jnp.ones((d,), jnp.float32), ln1_b=jnp.zeros((d,), jnp.float32),
             ln2_g=jnp.ones((d,), jnp.float32), ln2_b=jnp.zeros((d,), jnp.float32),
             self_attn=attn_params(), ctx_attn=attn_params(), ffn=ffn_params())
        for _ in range(cfg["num_decoder_layers"])
    ]

    src_lut = w((cfg["source_vocab_size"], d)).at[cfg["code_pad_idx"]].set(0.0)
    tgt_lut = w((cfg["target_vocab_size"], d)).at[cfg["comment_pad_idx"]].set(0.0)

    return dict(
        src_word_lut=src_lut,
        tgt_word_lut=tgt_lut,
        pe=positional_encoding(cfg["max_target_length"], d),
        enc_layers=enc_layers,
        dec_layers=dec_layers,
        enc_ln_g=jnp.ones((d,), jnp.float32), enc_ln_b=jnp.zeros((d,), jnp.float32),
        dec_ln_g=jnp.ones((d,), jnp.float32), dec_ln_b=jnp.zeros((d,), jnp.float32),
        generator_w=w((d, cfg["target_vocab_size"])),   # Linear(d, V, bias=False)
    )


# ----------------------------------------------------------------------------
# Main
# ----------------------------------------------------------------------------

if __name__ == "__main__":
    cfg = dict(
        d_model=32, n_heads=4, d_ff=64,
        num_encoder_layers=2, num_decoder_layers=2,
        source_vocab_size=50, target_vocab_size=40,
        code_pad_idx=0, comment_pad_idx=0,
        max_target_length=64,
    )
    # TODO(synk): copy_attention=True branch (CopyGenerator / GlobalAttention) not implemented.

    key = jax.random.PRNGKey(0)
    pkey, skey, tkey = jax.random.split(key, 3)
    params = init_params(pkey, cfg)
    prepared = prepare_params(params, cfg)   # one-time host-side packing, outside jit

    S, B, T = 8, 2, 8
    source_lengths = jnp.array([8, 6], jnp.int32)
    source = jax.random.randint(skey, (S, B, 1), 1, cfg["source_vocab_size"], jnp.int32)
    pos = jnp.arange(S)[:, None, None]
    source = jnp.where(pos < source_lengths[None, :, None], source, cfg["code_pad_idx"])
    target = jax.random.randint(tkey, (T, B, 1), 1, cfg["target_vocab_size"], jnp.int32)
    target = target.at[T - 2:, 1, 0].set(cfg["comment_pad_idx"])   # some target padding

    fwd = jax.jit(functools.partial(transformer_forward, cfg=cfg))
    generated, dec_outs, dec_attn = fwd(prepared, source, source_lengths, target)
    jax.block_until_ready((generated, dec_outs, dec_attn))

    assert generated.shape == (T - 1, B, cfg["target_vocab_size"])
    assert dec_outs.shape == (T - 1, B, cfg["d_model"])
    assert dec_attn.shape == (T - 1, B, S)
    assert bool(jnp.all(jnp.isfinite(generated)))
    assert bool(jnp.all(jnp.isfinite(dec_attn)))

    print("KERNEL_OK")
</pallas_src>

<mosaic_0001>
module attributes {stable_mosaic.version = 11 : i64} {
  func.func @kernel(%arg0: i32, %arg1: memref<800x128xbf16, #tpu.memory_space<vmem>>, %arg2: memref<48x128xf32, #tpu.memory_space<vmem>>, %arg3: memref<1x8x32xf32, #tpu.memory_space<vmem>>, %arg4: memref<1x7x32xf32, #tpu.memory_space<vmem>>, %arg5: memref<1x1x8xf32, #tpu.memory_space<vmem>>, %arg6: memref<1x7x7xf32, #tpu.memory_space<vmem>>, %arg7: memref<1x7x128xf32, #tpu.memory_space<vmem>>, %arg8: memref<1x7x128xf32, #tpu.memory_space<vmem>>) attributes {dimension_semantics = [#tpu.dimension_semantics<parallel>], iteration_bounds = array<i64: 2>, scalar_prefetch = 0 : i64, scratch_operands = 0 : i64, tpu.core_type = #tpu.core_type<tc>, window_params = [{pipeline_mode = #tpu.pipeline_mode<synchronous>, transform_indices = @transform_0, window_bounds = array<i64: 800, 128>}, {pipeline_mode = #tpu.pipeline_mode<synchronous>, transform_indices = @transform_1, window_bounds = array<i64: 48, 128>}, {transform_indices = @transform_2, window_bounds = array<i64: 1, 8, 32>}, {transform_indices = @transform_3, window_bounds = array<i64: 1, 7, 32>}, {transform_indices = @transform_4, window_bounds = array<i64: 1, 1, 8>}, {transform_indices = @transform_5, window_bounds = array<i64: 1, 7, 7>}, {transform_indices = @transform_6, window_bounds = array<i64: 1, 7, 128>}, {transform_indices = @transform_7, window_bounds = array<i64: 1, 7, 128>}]} {
    %c0 = arith.constant 0 : index
    %c0_0 = arith.constant 0 : index
    %c0_1 = arith.constant 0 : index
    %0 = vector.load %arg5[%c0, %c0_0, %c0_1] : memref<1x1x8xf32, #tpu.memory_space<vmem>>, vector<1x1x8xf32>
    %1 = vector.shape_cast %0 : vector<1x1x8xf32> to vector<1x8xf32>
    %c0_2 = arith.constant 0 : index
    %c0_3 = arith.constant 0 : index
    %c0_4 = arith.constant 0 : index
    %2 = vector.load %arg3[%c0_2, %c0_3, %c0_4] : memref<1x8x32xf32, #tpu.memory_space<vmem>>, vector<1x8x32xf32>
    %3 = vector.shape_cast %2 : vector<1x8x32xf32> to vector<8x32xf32>
    %c0_5 = arith.constant 0 : index
    %c0_6 = arith.constant 0 : index
    %4 = vector.load %arg2[%c0_5, %c0_6] : memref<48x128xf32, #tpu.memory_space<vmem>>, vector<1x32xf32>
    %c1 = arith.constant 1 : index
    %c0_7 = arith.constant 0 : index
    %5 = vector.load %arg2[%c1, %c0_7] : memref<48x128xf32, #tpu.memory_space<vmem>>, vector<1x32xf32>
    %cst = arith.constant dense<0.000000e+00> : vector<8xf32>
    %6 = vector.multi_reduction <add>, %3, %cst [1] : vector<8x32xf32> to vector<8xf32>
    %7 = vector.shape_cast %6 : vector<8xf32> to vector<8x1xf32>
    %cst_8 = arith.constant 3.200000e+01 : f32
    %8 = vector.broadcast %cst_8 : f32 to vector<8x1xf32>
    %9 = arith.divf %7, %8 : vector<8x1xf32>
    %10 = vector.broadcast %9 : vector<8x1xf32> to vector<8x32xf32>
    %11 = arith.subf %3, %10 : vector<8x32xf32>
    %12 = arith.mulf %11, %11 : vector<8x32xf32>
    %cst_9 = arith.constant dense<0.000000e+00> : vector<8xf32>
    %13 = vector.multi_reduction <add>, %12, %cst_9 [1] : vector<8x32xf32> to vector<8xf32>
    %14 = vector.shape_cast %13 : vector<8xf32> to vector<8x1xf32>
    %cst_10 = arith.constant 3.200000e+01 : f32
    %15 = vector.broadcast %cst_10 : f32 to vector<8x1xf32>
    %16 = arith.divf %14, %15 : vector<8x1xf32>
    %cst_11 = arith.constant 9.99999997E-7 : f32
    %17 = vector.broadcast %cst_11 : f32 to vector<8x1xf32>
    %18 = arith.addf %16, %17 : vector<8x1xf32>
    %19 = math.rsqrt %18 : vector<8x1xf32>
    %20 = vector.broadcast %19 : vector<8x1xf32> to vector<8x32xf32>
    %21 = arith.mulf %11, %20 : vector<8x32xf32>
    %22 = vector.broadcast %4 : vector<1x32xf32> to vector<8x32xf32>
    %23 = arith.mulf %21, %22 : vector<8x32xf32>
    %24 = vector.broadcast %5 : vector<1x32xf32> to vector<8x32xf32>
    %25 = arith.addf %23, %24 : vector<8x32xf32>
    %c0_12 = arith.constant 0 : index
    %c0_13 = arith.constant 0 : index
    %26 = vector.load %arg1[%c0_12, %c0_13] : memref<800x128xbf16, #tpu.memory_space<vmem>>, vector<32x96xbf16>
    %27 = arith.truncf %25 : vector<8x32xf32> to vector<8x32xbf16>
    %cst_14 = arith.constant dense<0.000000e+00> : vector<8x96xf32>
    %28 = tpu.matmul %27, %26, %cst_14 {dimension_numbers = #tpu.dot_dimension_numbers<[1], [0], [0], [1], [0, 0, 1, 1], [], []>} : vector<8x32xbf16>, vector<32x96xbf16>, vector<8x96xf32> -> vector<8x96xf32>
    %c2 = arith.constant 2 : index
    %c0_15 = arith.constant 0 : index
    %29 = vector.load %arg2[%c2, %c0_15] : memref<48x128xf32, #tpu.memory_space<vmem>>, vector<1x96xf32>
    %30 = vector.broadcast %29 : vector<1x96xf32> to vector<8x96xf32>
    %31 = arith.addf %28, %30 : vector<8x96xf32>
    %32 = vector.extract_strided_slice %31 {offsets = [0, 0], sizes = [8, 32], strides = [1, 1]} : vector<8x96xf32> to vector<8x32xf32>
    %33 = vector.extract_strided_slice %31 {offsets = [0, 32], sizes = [8, 32], strides = [1, 1]} : vector<8x96xf32> to vector<8x32xf32>
    %34 = vector.extract_strided_slice %31 {offsets = [0, 64], sizes = [8, 32], strides = [1, 1]} : vector<8x96xf32> to vector<8x32xf32>
    %35 = vector.extract_strided_slice %32 {offsets = [0, 0], sizes = [8, 8], strides = [1, 1]} : vector<8x32xf32> to vector<8x8xf32>
    %36 = vector.extract_strided_slice %33 {offsets = [0, 0], sizes = [8, 8], strides = [1, 1]} : vector<8x32xf32> to vector<8x8xf32>
    %37 = vector.extract_strided_slice %34 {offsets = [0, 0], sizes = [8, 8], strides = [1, 1]} : vector<8x32xf32> to vector<8x8xf32>
    %38 = arith.truncf %35 : vector<8x8xf32> to vector<8x8xbf16>
    %39 = arith.truncf %36 : vector<8x8xf32> to vector<8x8xbf16>
    %cst_16 = arith.constant dense<0.000000e+00> : vector<8x8xf32>
    %40 = tpu.matmul %38, %39, %cst_16 {dimension_numbers = #tpu.dot_dimension_numbers<[1], [1], [0], [0], [0, 0, 1, 0], [], []>} : vector<8x8xbf16>, vector<8x8xbf16>, vector<8x8xf32> -> vector<8x8xf32>
    %41 = vector.broadcast %1 : vector<1x8xf32> to vector<8x8xf32>
    %42 = arith.addf %40, %41 : vector<8x8xf32>
    %cst_17 = arith.constant dense<0xFF800000> : vector<8xf32>
    %43 = vector.multi_reduction <maximumf>, %42, %cst_17 [1] : vector<8x8xf32> to vector<8xf32>
    %44 = vector.shape_cast %43 : vector<8xf32> to vector<8x1xf32>
    %45 = vector.broadcast %44 : vector<8x1xf32> to vector<8x8xf32>
    %46 = arith.subf %42, %45 : vector<8x8xf32>
    %47 = math.exp %46 : vector<8x8xf32>
    %cst_18 = arith.constant dense<0.000000e+00> : vector<8xf32>
    %48 = vector.multi_reduction <add>, %47, %cst_18 [1] : vector<8x8xf32> to vector<8xf32>
    %49 = vector.shape_cast %48 : vector<8xf32> to vector<8x1xf32>
    %50 = tpu.reciprocal %49 {approx = true} : vector<8x1xf32> -> vector<8x1xf32>
    %51 = vector.broadcast %50 : vector<8x1xf32> to vector<8x8xf32>
    %52 = arith.mulf %47, %51 : vector<8x8xf32>
    %53 = arith.truncf %52 : vector<8x8xf32> to vector<8x8xbf16>
    %54 = arith.truncf %37 : vector<8x8xf32> to vector<8x8xbf16>
    %cst_19 = arith.constant dense<0.000000e+00> : vector<8x8xf32>
    %55 = tpu.matmul %53, %54, %cst_19 {dimension_numbers = #tpu.dot_dimension_numbers<[1], [0], [0], [1], [0, 0, 1, 1], [], []>} : vector<8x8xbf16>, vector<8x8xbf16>, vector<8x8xf32> -> vector<8x8xf32>
    %56 = vector.extract_strided_slice %32 {offsets = [0, 8], sizes = [8, 8], strides = [1, 1]} : vector<8x32xf32> to vector<8x8xf32>
    %57 = vector.extract_strided_slice %33 {offsets = [0, 8], sizes = [8, 8], strides = [1, 1]} : vector<8x32xf32> to vector<8x8xf32>
    %58 = vector.extract_strided_slice %34 {offsets = [0, 8], sizes = [8, 8], strides = [1, 1]} : vector<8x32xf32> to vector<8x8xf32>
    %59 = arith.truncf %56 : vector<8x8xf32> to vector<8x8xbf16>
    %60 = arith.truncf %57 : vector<8x8xf32> to vector<8x8xbf16>
    %cst_20 = arith.constant dense<0.000000e+00> : vector<8x8xf32>
    %61 = tpu.matmul %59, %60, %cst_20 {dimension_numbers = #tpu.dot_dimension_numbers<[1], [1], [0], [0], [0, 0, 1, 0], [], []>} : vector<8x8xbf16>, vector<8x8xbf16>, vector<8x8xf32> -> vector<8x8xf32>
    %62 = vector.broadcast %1 : vector<1x8xf32> to vector<8x8xf32>
    %63 = arith.addf %61, %62 : vector<8x8xf32>
    %cst_21 = arith.constant dense<0xFF800000> : vector<8xf32>
    %64 = vector.multi_reduction <maximumf>, %63, %cst_21 [1] : vector<8x8xf32> to vector<8xf32>
    %65 = vector.shape_cast %64 : vector<8xf32> to vector<8x1xf32>
    %66 = vector.broadcast %65 : vector<8x1xf32> to vector<8x8xf32>
    %67 = arith.subf %63, %66 : vector<8x8xf32>
    %68 = math.exp %67 : vector<8x8xf32>
    %cst_22 = arith.constant dense<0.000000e+00> : vector<8xf32>
    %69 = vector.multi_reduction <add>, %68, %cst_22 [1] : vector<8x8xf32> to vector<8xf32>
    %70 = vector.shape_cast %69 : vector<8xf32> to vector<8x1xf32>
    %71 = tpu.reciprocal %70 {approx = true} : vector<8x1xf32> -> vector<8x1xf32>
    %72 = vector.broadcast %71 : vector<8x1xf32> to vector<8x8xf32>
    %73 = arith.mulf %68, %72 : vector<8x8xf32>
    %74 = arith.truncf %73 : vector<8x8xf32> to vector<8x8xbf16>
    %75 = arith.truncf %58 : vector<8x8xf32> to vector<8x8xbf16>
    %cst_23 = arith.constant dense<0.000000e+00> : vector<8x8xf32>
    %76 = tpu.matmul %74, %75, %cst_23 {dimension_numbers = #tpu.dot_dimension_numbers<[1], [0], [0], [1], [0, 0, 1, 1], [], []>} : vector<8x8xbf16>, vector<8x8xbf16>, vector<8x8xf32> -> vector<8x8xf32>
    %77 = vector.extract_strided_slice %32 {offsets = [0, 16], sizes = [8, 8], strides = [1, 1]} : vector<8x32xf32> to vector<8x8xf32>
    %78 = vector.extract_strided_slice %33 {offsets = [0, 16], sizes = [8, 8], strides = [1, 1]} : vector<8x32xf32> to vector<8x8xf32>
    %79 = vector.extract_strided_slice %34 {offsets = [0, 16], sizes = [8, 8], strides = [1, 1]} : vector<8x32xf32> to vector<8x8xf32>
    %80 = arith.truncf %77 : vector<8x8xf32> to vector<8x8xbf16>
    %81 = arith.truncf %78 : vector<8x8xf32> to vector<8x8xbf16>
    %cst_24 = arith.constant dense<0.000000e+00> : vector<8x8xf32>
    %82 = tpu.matmul %80, %81, %cst_24 {dimension_numbers = #tpu.dot_dimension_numbers<[1], [1], [0], [0], [0, 0, 1, 0], [], []>} : vector<8x8xbf16>, vector<8x8xbf16>, vector<8x8xf32> -> vector<8x8xf32>
    %83 = vector.broadcast %1 : vector<1x8xf32> to vector<8x8xf32>
    %84 = arith.addf %82, %83 : vector<8x8xf32>
    %cst_25 = arith.constant dense<0xFF800000> : vector<8xf32>
    %85 = vector.multi_reduction <maximumf>, %84, %cst_25 [1] : vector<8x8xf32> to vector<8xf32>
    %86 = vector.shape_cast %85 : vector<8xf32> to vector<8x1xf32>
    %87 = vector.broadcast %86 : vector<8x1xf32> to vector<8x8xf32>
    %88 = arith.subf %84, %87 : vector<8x8xf32>
    %89 = math.exp %88 : vector<8x8xf32>
    %cst_26 = arith.constant dense<0.000000e+00> : vector<8xf32>
    %90 = vector.multi_reduction <add>, %89, %cst_26 [1] : vector<8x8xf32> to vector<8xf32>
    %91 = vector.shape_cast %90 : vector<8xf32> to vector<8x1xf32>
    %92 = tpu.reciprocal %91 {approx = true} : vector<8x1xf32> -> vector<8x1xf32>
    %93 = vector.broadcast %92 : vector<8x1xf32> to vector<8x8xf32>
    %94 = arith.mulf %89, %93 : vector<8x8xf32>
    %95 = arith.truncf %94 : vector<8x8xf32> to vector<8x8xbf16>
    %96 = arith.truncf %79 : vector<8x8xf32> to vector<8x8xbf16>
    %cst_27 = arith.constant dense<0.000000e+00> : vector<8x8xf32>
    %97 = tpu.matmul %95, %96, %cst_27 {dimension_numbers = #tpu.dot_dimension_numbers<[1], [0], [0], [1], [0, 0, 1, 1], [], []>} : vector<8x8xbf16>, vector<8x8xbf16>, vector<8x8xf32> -> vector<8x8xf32>
    %98 = vector.extract_strided_slice %32 {offsets = [0, 24], sizes = [8, 8], strides = [1, 1]} : vector<8x32xf32> to vector<8x8xf32>
    %99 = vector.extract_strided_slice %33 {offsets = [0, 24], sizes = [8, 8], strides = [1, 1]} : vector<8x32xf32> to vector<8x8xf32>
    %100 = vector.extract_strided_slice %34 {offsets = [0, 24], sizes = [8, 8], strides = [1, 1]} : vector<8x32xf32> to vector<8x8xf32>
    %101 = arith.truncf %98 : vector<8x8xf32> to vector<8x8xbf16>
    %102 = arith.truncf %99 : vector<8x8xf32> to vector<8x8xbf16>
    %cst_28 = arith.constant dense<0.000000e+00> : vector<8x8xf32>
    %103 = tpu.matmul %101, %102, %cst_28 {dimension_numbers = #tpu.dot_dimension_numbers<[1], [1], [0], [0], [0, 0, 1, 0], [], []>} : vector<8x8xbf16>, vector<8x8xbf16>, vector<8x8xf32> -> vector<8x8xf32>
    %104 = vector.broadcast %1 : vector<1x8xf32> to vector<8x8xf32>
    %105 = arith.addf %103, %104 : vector<8x8xf32>
    %cst_29 = arith.constant dense<0xFF800000> : vector<8xf32>
    %106 = vector.multi_reduction <maximumf>, %105, %cst_29 [1] : vector<8x8xf32> to vector<8xf32>
    %107 = vector.shape_cast %106 : vector<8xf32> to vector<8x1xf32>
    %108 = vector.broadcast %107 : vector<8x1xf32> to vector<8x8xf32>
    %109 = arith.subf %105, %108 : vector<8x8xf32>
    %110 = math.exp %109 : vector<8x8xf32>
    %cst_30 = arith.constant dense<0.000000e+00> : vector<8xf32>
    %111 = vector.multi_reduction <add>, %110, %cst_30 [1] : vector<8x8xf32> to vector<8xf32>
    %112 = vector.shape_cast %111 : vector<8xf32> to vector<8x1xf32>
    %113 = tpu.reciprocal %112 {approx = true} : vector<8x1xf32> -> vector<8x1xf32>
    %114 = vector.broadcast %113 : vector<8x1xf32> to vector<8x8xf32>
    %115 = arith.mulf %110, %114 : vector<8x8xf32>
    %116 = arith.truncf %115 : vector<8x8xf32> to vector<8x8xbf16>
    %117 = arith.truncf %100 : vector<8x8xf32> to vector<8x8xbf16>
    %cst_31 = arith.constant dense<0.000000e+00> : vector<8x8xf32>
    %118 = tpu.matmul %116, %117, %cst_31 {dimension_numbers = #tpu.dot_dimension_numbers<[1], [0], [0], [1], [0, 0, 1, 1], [], []>} : vector<8x8xbf16>, vector<8x8xbf16>, vector<8x8xf32> -> vector<8x8xf32>
    %119 = tpu.concatenate %55, %76, %97, %118 in 1 : vector<8x8xf32>, vector<8x8xf32>, vector<8x8xf32>, vector<8x8xf32> -> vector<8x32xf32>
    %c32 = arith.constant 32 : index
    %c0_32 = arith.constant 0 : index
    %120 = vector.load %arg1[%c32, %c0_32] : memref<800x128xbf16, #tpu.memory_space<vmem>>, vector<32x32xbf16>
    %121 = arith.truncf %119 : vector<8x32xf32> to vector<8x32xbf16>
    %cst_33 = arith.constant dense<0.000000e+00> : vector<8x32xf32>
    %122 = tpu.matmul %121, %120, %cst_33 {dimension_numbers = #tpu.dot_dimension_numbers<[1], [0], [0], [1], [0, 0, 1, 1], [], []>} : vector<8x32xbf16>, vector<32x32xbf16>, vector<8x32xf32> -> vector<8x32xf32>
    %c3 = arith.constant 3 : index
    %c0_34 = arith.constant 0 : index
    %123 = vector.load %arg2[%c3, %c0_34] : memref<48x128xf32, #tpu.memory_space<vmem>>, vector<1x32xf32>
    %124 = vector.broadcast %123 : vector<1x32xf32> to vector<8x32xf32>
    %125 = arith.addf %122, %124 : vector<8x32xf32>
    %126 = arith.addf %3, %125 : vector<8x32xf32>
    %c4 = arith.constant 4 : index
    %c0_35 = arith.constant 0 : index
    %127 = vector.load %arg2[%c4, %c0_35] : memref<48x128xf32, #tpu.memory_space<vmem>>, vector<1x32xf32>
    %c5 = arith.constant 5 : index
    %c0_36 = arith.constant 0 : index
    %128 = vector.load %arg2[%c5, %c0_36] : memref<48x128xf32, #tpu.memory_space<vmem>>, vector<1x32xf32>
    %cst_37 = arith.constant dense<0.000000e+00> : vector<8xf32>
    %129 = vector.multi_reduction <add>, %126, %cst_37 [1] : vector<8x32xf32> to vector<8xf32>
    %130 = vector.shape_cast %129 : vector<8xf32> to vector<8x1xf32>
    %cst_38 = arith.constant 3.200000e+01 : f32
    %131 = vector.broadcast %cst_38 : f32 to vector<8x1xf32>
    %132 = arith.divf %130, %131 : vector<8x1xf32>
    %133 = vector.broadcast %132 : vector<8x1xf32> to vector<8x32xf32>
    %134 = arith.subf %126, %133 : vector<8x32xf32>
    %135 = arith.mulf %134, %134 : vector<8x32xf32>
    %cst_39 = arith.constant dense<0.000000e+00> : vector<8xf32>
    %136 = vector.multi_reduction <add>, %135, %cst_39 [1] : vector<8x32xf32> to vector<8xf32>
    %137 = vector.shape_cast %136 : vector<8xf32> to vector<8x1xf32>
    %cst_40 = arith.constant 3.200000e+01 : f32
    %138 = vector.broadcast %cst_40 : f32 to vector<8x1xf32>
    %139 = arith.divf %137, %138 : vector<8x1xf32>
    %cst_41 = arith.constant 9.99999997E-7 : f32
    %140 = vector.broadcast %cst_41 : f32 to vector<8x1xf32>
    %141 = arith.addf %139, %140 : vector<8x1xf32>
    %142 = math.rsqrt %141 : vector<8x1xf32>
    %143 = vector.broadcast %142 : vector<8x1xf32> to vector<8x32xf32>
    %144 = arith.mulf %134, %143 : vector<8x32xf32>
    %145 = vector.broadcast %127 : vector<1x32xf32> to vector<8x32xf32>
    %146 = arith.mulf %144, %145 : vector<8x32xf32>
    %147 = vector.broadcast %128 : vector<1x32xf32> to vector<8x32xf32>
    %148 = arith.addf %146, %147 : vector<8x32xf32>
    %c64 = arith.constant 64 : index
    %c0_42 = arith.constant 0 : index
    %149 = vector.load %arg1[%c64, %c0_42] : memref<800x128xbf16, #tpu.memory_space<vmem>>, vector<32x64xbf16>
    %150 = arith.truncf %148 : vector<8x32xf32> to vector<8x32xbf16>
    %cst_43 = arith.constant dense<0.000000e+00> : vector<8x64xf32>
    %151 = tpu.matmul %150, %149, %cst_43 {dimension_numbers = #tpu.dot_dimension_numbers<[1], [0], [0], [1], [0, 0, 1, 1], [], []>} : vector<8x32xbf16>, vector<32x64xbf16>, vector<8x64xf32> -> vector<8x64xf32>
    %c6 = arith.constant 6 : index
    %c0_44 = arith.constant 0 : index
    %152 = vector.load %arg2[%c6, %c0_44] : memref<48x128xf32, #tpu.memory_space<vmem>>, vector<1x64xf32>
    %153 = vector.broadcast %152 : vector<1x64xf32> to vector<8x64xf32>
    %154 = arith.addf %151, %153 : vector<8x64xf32>
    %cst_45 = arith.constant 0.000000e+00 : f32
    %155 = vector.broadcast %cst_45 : f32 to vector<8x64xf32>
    %156 = arith.maximumf %154, %155 : vector<8x64xf32>
    %c96 = arith.constant 96 : index
    %c0_46 = arith.constant 0 : index
    %157 = vector.load %arg1[%c96, %c0_46] : memref<800x128xbf16, #tpu.memory_space<vmem>>, vector<64x32xbf16>
    %158 = arith.truncf %156 : vector<8x64xf32> to vector<8x64xbf16>
    %cst_47 = arith.constant dense<0.000000e+00> : vector<8x32xf32>
    %159 = tpu.matmul %158, %157, %cst_47 {dimension_numbers = #tpu.dot_dimension_numbers<[1], [0], [0], [1], [0, 0, 1, 1], [], []>} : vector<8x64xbf16>, vector<64x32xbf16>, vector<8x32xf32> -> vector<8x32xf32>
    %c7 = arith.constant 7 : index
    %c0_48 = arith.constant 0 : index
    %160 = vector.load %arg2[%c7, %c0_48] : memref<48x128xf32, #tpu.memory_space<vmem>>, vector<1x32xf32>
    %161 = vector.broadcast %160 : vector<1x32xf32> to vector<8x32xf32>
    %162 = arith.addf %159, %161 : vector<8x32xf32>
    %163 = arith.addf %162, %126 : vector<8x32xf32>
    %c8 = arith.constant 8 : index
    %c0_49 = arith.constant 0 : index
    %164 = vector.load %arg2[%c8, %c0_49] : memref<48x128xf32, #tpu.memory_space<vmem>>, vector<1x32xf32>
    %c9 = arith.constant 9 : index
    %c0_50 = arith.constant 0 : index
    %165 = vector.load %arg2[%c9, %c0_50] : memref<48x128xf32, #tpu.memory_space<vmem>>, vector<1x32xf32>
    %cst_51 = arith.constant dense<0.000000e+00> : vector<8xf32>
    %166 = vector.multi_reduction <add>, %163, %cst_51 [1] : vector<8x32xf32> to vector<8xf32>
    %167 = vector.shape_cast %166 : vector<8xf32> to vector<8x1xf32>
    %cst_52 = arith.constant 3.200000e+01 : f32
    %168 = vector.broadcast %cst_52 : f32 to vector<8x1xf32>
    %169 = arith.divf %167, %168 : vector<8x1xf32>
    %170 = vector.broadcast %169 : vector<8x1xf32> to vector<8x32xf32>
    %171 = arith.subf %163, %170 : vector<8x32xf32>
    %172 = arith.mulf %171, %171 : vector<8x32xf32>
    %cst_53 = arith.constant dense<0.000000e+00> : vector<8xf32>
    %173 = vector.multi_reduction <add>, %172, %cst_53 [1] : vector<8x32xf32> to vector<8xf32>
    %174 = vector.shape_cast %173 : vector<8xf32> to vector<8x1xf32>
    %cst_54 = arith.constant 3.200000e+01 : f32
    %175 = vector.broadcast %cst_54 : f32 to vector<8x1xf32>
    %176 = arith.divf %174, %175 : vector<8x1xf32>
    %cst_55 = arith.constant 9.99999997E-7 : f32
    %177 = vector.broadcast %cst_55 : f32 to vector<8x1xf32>
    %178 = arith.addf %176, %177 : vector<8x1xf32>
    %179 = math.rsqrt %178 : vector<8x1xf32>
    %180 = vector.broadcast %179 : vector<8x1xf32> to vector<8x32xf32>
    %181 = arith.mulf %171, %180 : vector<8x32xf32>
    %182 = vector.broadcast %164 : vector<1x32xf32> to vector<8x32xf32>
    %183 = arith.mulf %181, %182 : vector<8x32xf32>
    %184 = vector.broadcast %165 : vector<1x32xf32> to vector<8x32xf32>
    %185 = arith.addf %183, %184 : vector<8x32xf32>
    %c160 = arith.constant 160 : index
    %c0_56 = arith.constant 0 : index
    %186 = vector.load %arg1[%c160, %c0_56] : memref<800x128xbf16, #tpu.memory_space<vmem>>, vector<32x96xbf16>
    %187 = arith.truncf %185 : vector<8x32xf32> to vector<8x32xbf16>
    %cst_57 = arith.constant dense<0.000000e+00> : vector<8x96xf32>
    %188 = tpu.matmul %187, %186, %cst_57 {dimension_numbers = #tpu.dot_dimension_numbers<[1], [0], [0], [1], [0, 0, 1, 1], [], []>} : vector<8x32xbf16>, vector<32x96xbf16>, vector<8x96xf32> -> vector<8x96xf32>
    %c10 = arith.constant 10 : index
    %c0_58 = arith.constant 0 : index
    %189 = vector.load %arg2[%c10, %c0_58] : memref<48x128xf32, #tpu.memory_space<vmem>>, vector<1x96xf32>
    %190 = vector.broadcast %189 : vector<1x96xf32> to vector<8x96xf32>
    %191 = arith.addf %188, %190 : vector<8x96xf32>
    %192 = vector.extract_strided_slice %191 {offsets = [0, 0], sizes = [8, 32], strides = [1, 1]} : vector<8x96xf32> to vector<8x32xf32>
    %193 = vector.extract_strided_slice %191 {offsets = [0, 32], sizes = [8, 32], strides = [1, 1]} : vector<8x96xf32> to vector<8x32xf32>
    %194 = vector.extract_strided_slice %191 {offsets = [0, 64], sizes = [8, 32], strides = [1, 1]} : vector<8x96xf32> to vector<8x32xf32>
    %195 = vector.extract_strided_slice %192 {offsets = [0, 0], sizes = [8, 8], strides = [1, 1]} : vector<8x32xf32> to vector<8x8xf32>
    %196 = vector.extract_strided_slice %193 {offsets = [0, 0], sizes = [8, 8], strides = [1, 1]} : vector<8x32xf32> to vector<8x8xf32>
    %197 = vector.extract_strided_slice %194 {offsets = [0, 0], sizes = [8, 8], strides = [1, 1]} : vector<8x32xf32> to vector<8x8xf32>
    %198 = arith.truncf %195 : vector<8x8xf32> to vector<8x8xbf16>
    %199 = arith.truncf %196 : vector<8x8xf32> to vector<8x8xbf16>
    %cst_59 = arith.constant dense<0.000000e+00> : vector<8x8xf32>
    %200 = tpu.matmul %198, %199, %cst_59 {dimension_numbers = #tpu.dot_dimension_numbers<[1], [1], [0], [0], [0, 0, 1, 0], [], []>} : vector<8x8xbf16>, vector<8x8xbf16>, vector<8x8xf32> -> vector<8x8xf32>
    %201 = vector.broadcast %1 : vector<1x8xf32> to vector<8x8xf32>
    %202 = arith.addf %200, %201 : vector<8x8xf32>
    %cst_60 = arith.constant dense<0xFF800000> : vector<8xf32>
    %203 = vector.multi_reduction <maximumf>, %202, %cst_60 [1] : vector<8x8xf32> to vector<8xf32>
    %204 = vector.shape_cast %203 : vector<8xf32> to vector<8x1xf32>
    %205 = vector.broadcast %204 : vector<8x1xf32> to vector<8x8xf32>
    %206 = arith.subf %202, %205 : vector<8x8xf32>
    %207 = math.exp %206 : vector<8x8xf32>
    %cst_61 = arith.constant dense<0.000000e+00> : vector<8xf32>
    %208 = vector.multi_reduction <add>, %207, %cst_61 [1] : vector<8x8xf32> to vector<8xf32>
    %209 = vector.shape_cast %208 : vector<8xf32> to vector<8x1xf32>
    %210 = tpu.reciprocal %209 {approx = true} : vector<8x1xf32> -> vector<8x1xf32>
    %211 = vector.broadcast %210 : vector<8x1xf32> to vector<8x8xf32>
    %212 = arith.mulf %207, %211 : vector<8x8xf32>
    %213 = arith.truncf %212 : vector<8x8xf32> to vector<8x8xbf16>
    %214 = arith.truncf %197 : vector<8x8xf32> to vector<8x8xbf16>
    %cst_62 = arith.constant dense<0.000000e+00> : vector<8x8xf32>
    %215 = tpu.matmul %213, %214, %cst_62 {dimension_numbers = #tpu.dot_dimension_numbers<[1], [0], [0], [1], [0, 0, 1, 1], [], []>} : vector<8x8xbf16>, vector<8x8xbf16>, vector<8x8xf32> -> vector<8x8xf32>
    %216 = vector.extract_strided_slice %192 {offsets = [0, 8], sizes = [8, 8], strides = [1, 1]} : vector<8x32xf32> to vector<8x8xf32>
    %217 = vector.extract_strided_slice %193 {offsets = [0, 8], sizes = [8, 8], strides = [1, 1]} : vector<8x32xf32> to vector<8x8xf32>
    %218 = vector.extract_strided_slice %194 {offsets = [0, 8], sizes = [8, 8], strides = [1, 1]} : vector<8x32xf32> to vector<8x8xf32>
    %219 = arith.truncf %216 : vector<8x8xf32> to vector<8x8xbf16>
    %220 = arith.truncf %217 : vector<8x8xf32> to vector<8x8xbf16>
    %cst_63 = arith.constant dense<0.000000e+00> : vector<8x8xf32>
    %221 = tpu.matmul %219, %220, %cst_63 {dimension_numbers = #tpu.dot_dimension_numbers<[1], [1], [0], [0], [0, 0, 1, 0], [], []>} : vector<8x8xbf16>, vector<8x8xbf16>, vector<8x8xf32> -> vector<8x8xf32>
    %222 = vector.broadcast %1 : vector<1x8xf32> to vector<8x8xf32>
    %223 = arith.addf %221, %222 : vector<8x8xf32>
    %cst_64 = arith.constant dense<0xFF800000> : vector<8xf32>
    %224 = vector.multi_reduction <maximumf>, %223, %cst_64 [1] : vector<8x8xf32> to vector<8xf32>
    %225 = vector.shape_cast %224 : vector<8xf32> to vector<8x1xf32>
    %226 = vector.broadcast %225 : vector<8x1xf32> to vector<8x8xf32>
    %227 = arith.subf %223, %226 : vector<8x8xf32>
    %228 = math.exp %227 : vector<8x8xf32>
    %cst_65 = arith.constant dense<0.000000e+00> : vector<8xf32>
    %229 = vector.multi_reduction <add>, %228, %cst_65 [1] : vector<8x8xf32> to vector<8xf32>
    %230 = vector.shape_cast %229 : vector<8xf32> to vector<8x1xf32>
    %231 = tpu.reciprocal %230 {approx = true} : vector<8x1xf32> -> vector<8x1xf32>
    %232 = vector.broadcast %231 : vector<8x1xf32> to vector<8x8xf32>
    %233 = arith.mulf %228, %232 : vector<8x8xf32>
    %234 = arith.truncf %233 : vector<8x8xf32> to vector<8x8xbf16>
    %235 = arith.truncf %218 : vector<8x8xf32> to vector<8x8xbf16>
    %cst_66 = arith.constant dense<0.000000e+00> : vector<8x8xf32>
    %236 = tpu.matmul %234, %235, %cst_66 {dimension_numbers = #tpu.dot_dimension_numbers<[1], [0], [0], [1], [0, 0, 1, 1], [], []>} : vector<8x8xbf16>, vector<8x8xbf16>, vector<8x8xf32> -> vector<8x8xf32>
    %237 = vector.extract_strided_slice %192 {offsets = [0, 16], sizes = [8, 8], strides = [1, 1]} : vector<8x32xf32> to vector<8x8xf32>
    %238 = vector.extract_strided_slice %193 {offsets = [0, 16], sizes = [8, 8], strides = [1, 1]} : vector<8x32xf32> to vector<8x8xf32>
    %239 = vector.extract_strided_slice %194 {offsets = [0, 16], sizes = [8, 8], strides = [1, 1]} : vector<8x32xf32> to vector<8x8xf32>
    %240 = arith.truncf %237 : vector<8x8xf32> to vector<8x8xbf16>
    %241 = arith.truncf %238 : vector<8x8xf32> to vector<8x8xbf16>
    %cst_67 = arith.constant dense<0.000000e+00> : vector<8x8xf32>
    %242 = tpu.matmul %240, %241, %cst_67 {dimension_numbers = #tpu.dot_dimension_numbers<[1], [1], [0], [0], [0, 0, 1, 0], [], []>} : vector<8x8xbf16>, vector<8x8xbf16>, vector<8x8xf32> -> vector<8x8xf32>
    %243 = vector.broadcast %1 : vector<1x8xf32> to vector<8x8xf32>
    %244 = arith.addf %242, %243 : vector<8x8xf32>
    %cst_68 = arith.constant dense<0xFF800000> : vector<8xf32>
    %245 = vector.multi_reduction <maximumf>, %244, %cst_68 [1] : vector<8x8xf32> to vector<8xf32>
    %246 = vector.shape_cast %245 : vector<8xf32> to vector<8x1xf32>
    %247 = vector.broadcast %246 : vector<8x1xf32> to vector<8x8xf32>
    %248 = arith.subf %244, %247 : vector<8x8xf32>
    %249 = math.exp %248 : vector<8x8xf32>
    %cst_69 = arith.constant dense<0.000000e+00> : vector<8xf32>
    %250 = vector.multi_reduction <add>, %249, %cst_69 [1] : vector<8x8xf32> to vector<8xf32>
    %251 = vector.shape_cast %250 : vector<8xf32> to vector<8x1xf32>
    %252 = tpu.reciprocal %251 {approx = true} : vector<8x1xf32> -> vector<8x1xf32>
    %253 = vector.broadcast %252 : vector<8x1xf32> to vector<8x8xf32>
    %254 = arith.mulf %249, %253 : vector<8x8xf32>
    %255 = arith.truncf %254 : vector<8x8xf32> to vector<8x8xbf16>
    %256 = arith.truncf %239 : vector<8x8xf32> to vector<8x8xbf16>
    %cst_70 = arith.constant dense<0.000000e+00> : vector<8x8xf32>
    %257 = tpu.matmul %255, %256, %cst_70 {dimension_numbers = #tpu.dot_dimension_numbers<[1], [0], [0], [1], [0, 0, 1, 1], [], []>} : vector<8x8xbf16>, vector<8x8xbf16>, vector<8x8xf32> -> vector<8x8xf32>
    %258 = vector.extract_strided_slice %192 {offsets = [0, 24], sizes = [8, 8], strides = [1, 1]} : vector<8x32xf32> to vector<8x8xf32>
    %259 = vector.extract_strided_slice %193 {offsets = [0, 24], sizes = [8, 8], strides = [1, 1]} : vector<8x32xf32> to vector<8x8xf32>
    %260 = vector.extract_strided_slice %194 {offsets = [0, 24], sizes = [8, 8], strides = [1, 1]} : vector<8x32xf32> to vector<8x8xf32>
    %261 = arith.truncf %258 : vector<8x8xf32> to vector<8x8xbf16>
    %262 = arith.truncf %259 : vector<8x8xf32> to vector<8x8xbf16>
    %cst_71 = arith.constant dense<0.000000e+00> : vector<8x8xf32>
    %263 = tpu.matmul %261, %262, %cst_71 {dimension_numbers = #tpu.dot_dimension_numbers<[1], [1], [0], [0], [0, 0, 1, 0], [], []>} : vector<8x8xbf16>, vector<8x8xbf16>, vector<8x8xf32> -> vector<8x8xf32>
    %264 = vector.broadcast %1 : vector<1x8xf32> to vector<8x8xf32>
    %265 = arith.addf %263, %264 : vector<8x8xf32>
    %cst_72 = arith.constant dense<0xFF800000> : vector<8xf32>
    %266 = vector.multi_reduction <maximumf>, %265, %cst_72 [1] : vector<8x8xf32> to vector<8xf32>
    %267 = vector.shape_cast %266 : vector<8xf32> to vector<8x1xf32>
    %268 = vector.broadcast %267 : vector<8x1xf32> to vector<8x8xf32>
    %269 = arith.subf %265, %268 : vector<8x8xf32>
    %270 = math.exp %269 : vector<8x8xf32>
    %cst_73 = arith.constant dense<0.000000e+00> : vector<8xf32>
    %271 = vector.multi_reduction <add>, %270, %cst_73 [1] : vector<8x8xf32> to vector<8xf32>
    %272 = vector.shape_cast %271 : vector<8xf32> to vector<8x1xf32>
    %273 = tpu.reciprocal %272 {approx = true} : vector<8x1xf32> -> vector<8x1xf32>
    %274 = vector.broadcast %273 : vector<8x1xf32> to vector<8x8xf32>
    %275 = arith.mulf %270, %274 : vector<8x8xf32>
    %276 = arith.truncf %275 : vector<8x8xf32> to vector<8x8xbf16>
    %277 = arith.truncf %260 : vector<8x8xf32> to vector<8x8xbf16>
    %cst_74 = arith.constant dense<0.000000e+00> : vector<8x8xf32>
    %278 = tpu.matmul %276, %277, %cst_74 {dimension_numbers = #tpu.dot_dimension_numbers<[1], [0], [0], [1], [0, 0, 1, 1], [], []>} : vector<8x8xbf16>, vector<8x8xbf16>, vector<8x8xf32> -> vector<8x8xf32>
    %279 = tpu.concatenate %215, %236, %257, %278 in 1 : vector<8x8xf32>, vector<8x8xf32>, vector<8x8xf32>, vector<8x8xf32> -> vector<8x32xf32>
    %c192 = arith.constant 192 : index
    %c0_75 = arith.constant 0 : index
    %280 = vector.load %arg1[%c192, %c0_75] : memref<800x128xbf16, #tpu.memory_space<vmem>>, vector<32x32xbf16>
    %281 = arith.truncf %279 : vector<8x32xf32> to vector<8x32xbf16>
    %cst_76 = arith.constant dense<0.000000e+00> : vector<8x32xf32>
    %282 = tpu.matmul %281, %280, %cst_76 {dimension_numbers = #tpu.dot_dimension_numbers<[1], [0], [0], [1], [0, 0, 1, 1], [], []>} : vector<8x32xbf16>, vector<32x32xbf16>, vector<8x32xf32> -> vector<8x32xf32>
    %c11 = arith.constant 11 : index
    %c0_77 = arith.constant 0 : index
    %283 = vector.load %arg2[%c11, %c0_77] : memref<48x128xf32, #tpu.memory_space<vmem>>, vector<1x32xf32>
    %284 = vector.broadcast %283 : vector<1x32xf32> to vector<8x32xf32>
    %285 = arith.addf %282, %284 : vector<8x32xf32>
    %286 = arith.addf %163, %285 : vector<8x32xf32>
    %c12 = arith.constant 12 : index
    %c0_78 = arith.constant 0 : index
    %287 = vector.load %arg2[%c12, %c0_78] : memref<48x128xf32, #tpu.memory_space<vmem>>, vector<1x32xf32>
    %c13 = arith.constant 13 : index
    %c0_79 = arith.constant 0 : index
    %288 = vector.load %arg2[%c13, %c0_79] : memref<48x128xf32, #tpu.memory_space<vmem>>, vector<1x32xf32>
    %cst_80 = arith.constant dense<0.000000e+00> : vector<8xf32>
    %289 = vector.multi_reduction <add>, %286, %cst_80 [1] : vector<8x32xf32> to vector<8xf32>
    %290 = vector.shape_cast %289 : vector<8xf32> to vector<8x1xf32>
    %cst_81 = arith.constant 3.200000e+01 : f32
    %291 = vector.broadcast %cst_81 : f32 to vector<8x1xf32>
    %292 = arith.divf %290, %291 : vector<8x1xf32>
    %293 = vector.broadcast %292 : vector<8x1xf32> to vector<8x32xf32>
    %294 = arith.subf %286, %293 : vector<8x32xf32>
    %295 = arith.mulf %294, %294 : vector<8x32xf32>
    %cst_82 = arith.constant dense<0.000000e+00> : vector<8xf32>
    %296 = vector.multi_reduction <add>, %295, %cst_82 [1] : vector<8x32xf32> to vector<8xf32>
    %297 = vector.shape_cast %296 : vector<8xf32> to vector<8x1xf32>
    %cst_83 = arith.constant 3.200000e+01 : f32
    %298 = vector.broadcast %cst_83 : f32 to vector<8x1xf32>
    %299 = arith.divf %297, %298 : vector<8x1xf32>
    %cst_84 = arith.constant 9.99999997E-7 : f32
    %300 = vector.broadcast %cst_84 : f32 to vector<8x1xf32>
    %301 = arith.addf %299, %300 : vector<8x1xf32>
    %302 = math.rsqrt %301 : vector<8x1xf32>
    %303 = vector.broadcast %302 : vector<8x1xf32> to vector<8x32xf32>
    %304 = arith.mulf %294, %303 : vector<8x32xf32>
    %305 = vector.broadcast %287 : vector<1x32xf32> to vector<8x32xf32>
    %306 = arith.mulf %304, %305 : vector<8x32xf32>
    %307 = vector.broadcast %288 : vector<1x32xf32> to vector<8x32xf32>
    %308 = arith.addf %306, %307 : vector<8x32xf32>
    %c224 = arith.constant 224 : index
    %c0_85 = arith.constant 0 : index
    %309 = vector.load %arg1[%c224, %c0_85] : memref<800x128xbf16, #tpu.memory_space<vmem>>, vector<32x64xbf16>
    %310 = arith.truncf %308 : vector<8x32xf32> to vector<8x32xbf16>
    %cst_86 = arith.constant dense<0.000000e+00> : vector<8x64xf32>
    %311 = tpu.matmul %310, %309, %cst_86 {dimension_numbers = #tpu.dot_dimension_numbers<[1], [0], [0], [1], [0, 0, 1, 1], [], []>} : vector<8x32xbf16>, vector<32x64xbf16>, vector<8x64xf32> -> vector<8x64xf32>
    %c14 = arith.constant 14 : index
    %c0_87 = arith.constant 0 : index
    %312 = vector.load %arg2[%c14, %c0_87] : memref<48x128xf32, #tpu.memory_space<vmem>>, vector<1x64xf32>
    %313 = vector.broadcast %312 : vector<1x64xf32> to vector<8x64xf32>
    %314 = arith.addf %311, %313 : vector<8x64xf32>
    %cst_88 = arith.constant 0.000000e+00 : f32
    %315 = vector.broadcast %cst_88 : f32 to vector<8x64xf32>
    %316 = arith.maximumf %314, %315 : vector<8x64xf32>
    %c256 = arith.constant 256 : index
    %c0_89 = arith.constant 0 : index
    %317 = vector.load %arg1[%c256, %c0_89] : memref<800x128xbf16, #tpu.memory_space<vmem>>, vector<64x32xbf16>
    %318 = arith.truncf %316 : vector<8x64xf32> to vector<8x64xbf16>
    %cst_90 = arith.constant dense<0.000000e+00> : vector<8x32xf32>
    %319 = tpu.matmul %318, %317, %cst_90 {dimension_numbers = #tpu.dot_dimension_numbers<[1], [0], [0], [1], [0, 0, 1, 1], [], []>} : vector<8x64xbf16>, vector<64x32xbf16>, vector<8x32xf32> -> vector<8x32xf32>
    %c15 = arith.constant 15 : index
    %c0_91 = arith.constant 0 : index
    %320 = vector.load %arg2[%c15, %c0_91] : memref<48x128xf32, #tpu.memory_space<vmem>>, vector<1x32xf32>
    %321 = vector.broadcast %320 : vector<1x32xf32> to vector<8x32xf32>
    %322 = arith.addf %319, %321 : vector<8x32xf32>
    %323 = arith.addf %322, %286 : vector<8x32xf32>
    %c40 = arith.constant 40 : index
    %c0_92 = arith.constant 0 : index
    %324 = vector.load %arg2[%c40, %c0_92] : memref<48x128xf32, #tpu.memory_space<vmem>>, vector<1x32xf32>
    %c41 = arith.constant 41 : index
    %c0_93 = arith.constant 0 : index
    %325 = vector.load %arg2[%c41, %c0_93] : memref<48x128xf32, #tpu.memory_space<vmem>>, vector<1x32xf32>
    %cst_94 = arith.constant dense<0.000000e+00> : vector<8xf32>
    %326 = vector.multi_reduction <add>, %323, %cst_94 [1] : vector<8x32xf32> to vector<8xf32>
    %327 = vector.shape_cast %326 : vector<8xf32> to vector<8x1xf32>
    %cst_95 = arith.constant 3.200000e+01 : f32
    %328 = vector.broadcast %cst_95 : f32 to vector<8x1xf32>
    %329 = arith.divf %327, %328 : vector<8x1xf32>
    %330 = vector.broadcast %329 : vector<8x1xf32> to vector<8x32xf32>
    %331 = arith.subf %323, %330 : vector<8x32xf32>
    %332 = arith.mulf %331, %331 : vector<8x32xf32>
    %cst_96 = arith.constant dense<0.000000e+00> : vector<8xf32>
    %333 = vector.multi_reduction <add>, %332, %cst_96 [1] : vector<8x32xf32> to vector<8xf32>
    %334 = vector.shape_cast %333 : vector<8xf32> to vector<8x1xf32>
    %cst_97 = arith.constant 3.200000e+01 : f32
    %335 = vector.broadcast %cst_97 : f32 to vector<8x1xf32>
    %336 = arith.divf %334, %335 : vector<8x1xf32>
    %cst_98 = arith.constant 9.99999997E-7 : f32
    %337 = vector.broadcast %cst_98 : f32 to vector<8x1xf32>
    %338 = arith.addf %336, %337 : vector<8x1xf32>
    %339 = math.rsqrt %338 : vector<8x1xf32>
    %340 = vector.broadcast %339 : vector<8x1xf32> to vector<8x32xf32>
    %341 = arith.mulf %331, %340 : vector<8x32xf32>
    %342 = vector.broadcast %324 : vector<1x32xf32> to vector<8x32xf32>
    %343 = arith.mulf %341, %342 : vector<8x32xf32>
    %344 = vector.broadcast %325 : vector<1x32xf32> to vector<8x32xf32>
    %345 = arith.addf %343, %344 : vector<8x32xf32>
    %c0_99 = arith.constant 0 : index
    %c0_100 = arith.constant 0 : index
    %c0_101 = arith.constant 0 : index
    %346 = vector.load %arg6[%c0_99, %c0_100, %c0_101] : memref<1x7x7xf32, #tpu.memory_space<vmem>>, vector<1x7x7xf32>
    %347 = vector.shape_cast %346 : vector<1x7x7xf32> to vector<7x7xf32>
    %c0_102 = arith.constant 0 : index
    %c0_103 = arith.constant 0 : index
    %c0_104 = arith.constant 0 : index
    %348 = vector.load %arg4[%c0_102, %c0_103, %c0_104] : memref<1x7x32xf32, #tpu.memory_space<vmem>>, vector<1x7x32xf32>
    %349 = vector.shape_cast %348 : vector<1x7x32xf32> to vector<7x32xf32>
    %c16 = arith.constant 16 : index
    %c0_105 = arith.constant 0 : index
    %350 = vector.load %arg2[%c16, %c0_105] : memref<48x128xf32, #tpu.memory_space<vmem>>, vector<1x32xf32>
    %c17 = arith.constant 17 : index
    %c0_106 = arith.constant 0 : index
    %351 = vector.load %arg2[%c17, %c0_106] : memref<48x128xf32, #tpu.memory_space<vmem>>, vector<1x32xf32>
    %cst_107 = arith.constant dense<0.000000e+00> : vector<7xf32>
    %352 = vector.multi_reduction <add>, %349, %cst_107 [1] : vector<7x32xf32> to vector<7xf32>
    %353 = vector.shape_cast %352 : vector<7xf32> to vector<7x1xf32>
    %cst_108 = arith.constant 3.200000e+01 : f32
    %354 = vector.broadcast %cst_108 : f32 to vector<7x1xf32>
    %355 = arith.divf %353, %354 : vector<7x1xf32>
    %356 = vector.broadcast %355 : vector<7x1xf32> to vector<7x32xf32>
    %357 = arith.subf %349, %356 : vector<7x32xf32>
    %358 = arith.mulf %357, %357 : vector<7x32xf32>
    %cst_109 = arith.constant dense<0.000000e+00> : vector<7xf32>
    %359 = vector.multi_reduction <add>, %358, %cst_109 [1] : vector<7x32xf32> to vector<7xf32>
    %360 = vector.shape_cast %359 : vector<7xf32> to vector<7x1xf32>
    %cst_110 = arith.constant 3.200000e+01 : f32
    %361 = vector.broadcast %cst_110 : f32 to vector<7x1xf32>
    %362 = arith.divf %360, %361 : vector<7x1xf32>
    %cst_111 = arith.constant 9.99999997E-7 : f32
    %363 = vector.broadcast %cst_111 : f32 to vector<7x1xf32>
    %364 = arith.addf %362, %363 : vector<7x1xf32>
    %365 = math.rsqrt %364 : vector<7x1xf32>
    %366 = vector.broadcast %365 : vector<7x1xf32> to vector<7x32xf32>
    %367 = arith.mulf %357, %366 : vector<7x32xf32>
    %368 = vector.broadcast %350 : vector<1x32xf32> to vector<7x32xf32>
    %369 = arith.mulf %367, %368 : vector<7x32xf32>
    %370 = vector.broadcast %351 : vector<1x32xf32> to vector<7x32xf32>
    %371 = arith.addf %369, %370 : vector<7x32xf32>
    %c320 = arith.constant 320 : index
    %c0_112 = arith.constant 0 : index
    %372 = vector.load %arg1[%c320, %c0_112] : memref<800x128xbf16, #tpu.memory_space<vmem>>, vector<32x96xbf16>
    %373 = arith.truncf %371 : vector<7x32xf32> to vector<7x32xbf16>
    %cst_113 = arith.constant dense<0.000000e+00> : vector<7x96xf32>
    %374 = tpu.matmul %373, %372, %cst_113 {dimension_numbers = #tpu.dot_dimension_numbers<[1], [0], [0], [1], [0, 0, 1, 1], [], []>} : vector<7x32xbf16>, vector<32x96xbf16>, vector<7x96xf32> -> vector<7x96xf32>
    %c20 = arith.constant 20 : index
    %c0_114 = arith.constant 0 : index
    %375 = vector.load %arg2[%c20, %c0_114] : memref<48x128xf32, #tpu.memory_space<vmem>>, vector<1x96xf32>
    %376 = vector.broadcast %375 : vector<1x96xf32> to vector<7x96xf32>
    %377 = arith.addf %374, %376 : vector<7x96xf32>
    %378 = vector.extract_strided_slice %377 {offsets = [0, 0], sizes = [7, 32], strides = [1, 1]} : vector<7x96xf32> to vector<7x32xf32>
    %379 = vector.extract_strided_slice %377 {offsets = [0, 32], sizes = [7, 32], strides = [1, 1]} : vector<7x96xf32> to vector<7x32xf32>
    %380 = vector.extract_strided_slice %377 {offsets = [0, 64], sizes = [7, 32], strides = [1, 1]} : vector<7x96xf32> to vector<7x32xf32>
    %381 = vector.extract_strided_slice %378 {offsets = [0, 0], sizes = [7, 8], strides = [1, 1]} : vector<7x32xf32> to vector<7x8xf32>
    %382 = vector.extract_strided_slice %379 {offsets = [0, 0], sizes = [7, 8], strides = [1, 1]} : vector<7x32xf32> to vector<7x8xf32>
    %383 = vector.extract_strided_slice %380 {offsets = [0, 0], sizes = [7, 8], strides = [1, 1]} : vector<7x32xf32> to vector<7x8xf32>
    %384 = arith.truncf %381 : vector<7x8xf32> to vector<7x8xbf16>
    %385 = arith.truncf %382 : vector<7x8xf32> to vector<7x8xbf16>
    %cst_115 = arith.constant dense<0.000000e+00> : vector<7x7xf32>
    %386 = tpu.matmul %384, %385, %cst_115 {dimension_numbers = #tpu.dot_dimension_numbers<[1], [1], [0], [0], [0, 0, 1, 0], [], []>} : vector<7x8xbf16>, vector<7x8xbf16>, vector<7x7xf32> -> vector<7x7xf32>
    %387 = arith.addf %386, %347 : vector<7x7xf32>
    %cst_116 = arith.constant dense<0xFF800000> : vector<7xf32>
    %388 = vector.multi_reduction <maximumf>, %387, %cst_116 [1] : vector<7x7xf32> to vector<7xf32>
    %389 = vector.shape_cast %388 : vector<7xf32> to vector<7x1xf32>
    %390 = vector.broadcast %389 : vector<7x1xf32> to vector<7x7xf32>
    %391 = arith.subf %387, %390 : vector<7x7xf32>
    %392 = math.exp %391 : vector<7x7xf32>
    %cst_117 = arith.constant dense<0.000000e+00> : vector<7xf32>
    %393 = vector.multi_reduction <add>, %392, %cst_117 [1] : vector<7x7xf32> to vector<7xf32>
    %394 = vector.shape_cast %393 : vector<7xf32> to vector<7x1xf32>
    %395 = tpu.reciprocal %394 {approx = true} : vector<7x1xf32> -> vector<7x1xf32>
    %396 = vector.broadcast %395 : vector<7x1xf32> to vector<7x7xf32>
    %397 = arith.mulf %392, %396 : vector<7x7xf32>
    %398 = arith.truncf %397 : vector<7x7xf32> to vector<7x7xbf16>
    %399 = arith.truncf %383 : vector<7x8xf32> to vector<7x8xbf16>
    %cst_118 = arith.constant dense<0.000000e+00> : vector<7x8xf32>
    %400 = tpu.matmul %398, %399, %cst_118 {dimension_numbers = #tpu.dot_dimension_numbers<[1], [0], [0], [1], [0, 0, 1, 1], [], []>} : vector<7x7xbf16>, vector<7x8xbf16>, vector<7x8xf32> -> vector<7x8xf32>
    %401 = vector.extract_strided_slice %378 {offsets = [0, 8], sizes = [7, 8], strides = [1, 1]} : vector<7x32xf32> to vector<7x8xf32>
    %402 = vector.extract_strided_slice %379 {offsets = [0, 8], sizes = [7, 8], strides = [1, 1]} : vector<7x32xf32> to vector<7x8xf32>
    %403 = vector.extract_strided_slice %380 {offsets = [0, 8], sizes = [7, 8], strides = [1, 1]} : vector<7x32xf32> to vector<7x8xf32>
    %404 = arith.truncf %401 : vector<7x8xf32> to vector<7x8xbf16>
    %405 = arith.truncf %402 : vector<7x8xf32> to vector<7x8xbf16>
    %cst_119 = arith.constant dense<0.000000e+00> : vector<7x7xf32>
    %406 = tpu.matmul %404, %405, %cst_119 {dimension_numbers = #tpu.dot_dimension_numbers<[1], [1], [0], [0], [0, 0, 1, 0], [], []>} : vector<7x8xbf16>, vector<7x8xbf16>, vector<7x7xf32> -> vector<7x7xf32>
    %407 = arith.addf %406, %347 : vector<7x7xf32>
    %cst_120 = arith.constant dense<0xFF800000> : vector<7xf32>
    %408 = vector.multi_reduction <maximumf>, %407, %cst_120 [1] : vector<7x7xf32> to vector<7xf32>
    %409 = vector.shape_cast %408 : vector<7xf32> to vector<7x1xf32>
    %410 = vector.broadcast %409 : vector<7x1xf32> to vector<7x7xf32>
    %411 = arith.subf %407, %410 : vector<7x7xf32>
    %412 = math.exp %411 : vector<7x7xf32>
    %cst_121 = arith.constant dense<0.000000e+00> : vector<7xf32>
    %413 = vector.multi_reduction <add>, %412, %cst_121 [1] : vector<7x7xf32> to vector<7xf32>
    %414 = vector.shape_cast %413 : vector<7xf32> to vector<7x1xf32>
    %415 = tpu.reciprocal %414 {approx = true} : vector<7x1xf32> -> vector<7x1xf32>
    %416 = vector.broadcast %415 : vector<7x1xf32> to vector<7x7xf32>
    %417 = arith.mulf %412, %416 : vector<7x7xf32>
    %418 = arith.truncf %417 : vector<7x7xf32> to vector<7x7xbf16>
    %419 = arith.truncf %403 : vector<7x8xf32> to vector<7x8xbf16>
    %cst_122 = arith.constant dense<0.000000e+00> : vector<7x8xf32>
    %420 = tpu.matmul %418, %419, %cst_122 {dimension_numbers = #tpu.dot_dimension_numbers<[1], [0], [0], [1], [0, 0, 1, 1], [], []>} : vector<7x7xbf16>, vector<7x8xbf16>, vector<7x8xf32> -> vector<7x8xf32>
    %421 = vector.extract_strided_slice %378 {offsets = [0, 16], sizes = [7, 8], strides = [1, 1]} : vector<7x32xf32> to vector<7x8xf32>
    %422 = vector.extract_strided_slice %379 {offsets = [0, 16], sizes = [7, 8], strides = [1, 1]} : vector<7x32xf32> to vector<7x8xf32>
    %423 = vector.extract_strided_slice %380 {offsets = [0, 16], sizes = [7, 8], strides = [1, 1]} : vector<7x32xf32> to vector<7x8xf32>
    %424 = arith.truncf %421 : vector<7x8xf32> to vector<7x8xbf16>
    %425 = arith.truncf %422 : vector<7x8xf32> to vector<7x8xbf16>
    %cst_123 = arith.constant dense<0.000000e+00> : vector<7x7xf32>
    %426 = tpu.matmul %424, %425, %cst_123 {dimension_numbers = #tpu.dot_dimension_numbers<[1], [1], [0], [0], [0, 0, 1, 0], [], []>} : vector<7x8xbf16>, vector<7x8xbf16>, vector<7x7xf32> -> vector<7x7xf32>
    %427 = arith.addf %426, %347 : vector<7x7xf32>
    %cst_124 = arith.constant dense<0xFF800000> : vector<7xf32>
    %428 = vector.multi_reduction <maximumf>, %427, %cst_124 [1] : vector<7x7xf32> to vector<7xf32>
    %429 = vector.shape_cast %428 : vector<7xf32> to vector<7x1xf32>
    %430 = vector.broadcast %429 : vector<7x1xf32> to vector<7x7xf32>
    %431 = arith.subf %427, %430 : vector<7x7xf32>
    %432 = math.exp %431 : vector<7x7xf32>
    %cst_125 = arith.constant dense<0.000000e+00> : vector<7xf32>
    %433 = vector.multi_reduction <add>, %432, %cst_125 [1] : vector<7x7xf32> to vector<7xf32>
    %434 = vector.shape_cast %433 : vector<7xf32> to vector<7x1xf32>
    %435 = tpu.reciprocal %434 {approx = true} : vector<7x1xf32> -> vector<7x1xf32>
    %436 = vector.broadcast %435 : vector<7x1xf32> to vector<7x7xf32>
    %437 = arith.mulf %432, %436 : vector<7x7xf32>
    %438 = arith.truncf %437 : vector<7x7xf32> to vector<7x7xbf16>
    %439 = arith.truncf %423 : vector<7x8xf32> to vector<7x8xbf16>
    %cst_126 = arith.constant dense<0.000000e+00> : vector<7x8xf32>
    %440 = tpu.matmul %438, %439, %cst_126 {dimension_numbers = #tpu.dot_dimension_numbers<[1], [0], [0], [1], [0, 0, 1, 1], [], []>} : vector<7x7xbf16>, vector<7x8xbf16>, vector<7x8xf32> -> vector<7x8xf32>
    %441 = vector.extract_strided_slice %378 {offsets = [0, 24], sizes = [7, 8], strides = [1, 1]} : vector<7x32xf32> to vector<7x8xf32>
    %442 = vector.extract_strided_slice %379 {offsets = [0, 24], sizes = [7, 8], strides = [1, 1]} : vector<7x32xf32> to vector<7x8xf32>
    %443 = vector.extract_strided_slice %380 {offsets = [0, 24], sizes = [7, 8], strides = [1, 1]} : vector<7x32xf32> to vector<7x8xf32>
    %444 = arith.truncf %441 : vector<7x8xf32> to vector<7x8xbf16>
    %445 = arith.truncf %442 : vector<7x8xf32> to vector<7x8xbf16>
    %cst_127 = arith.constant dense<0.000000e+00> : vector<7x7xf32>
    %446 = tpu.matmul %444, %445, %cst_127 {dimension_numbers = #tpu.dot_dimension_numbers<[1], [1], [0], [0], [0, 0, 1, 0], [], []>} : vector<7x8xbf16>, vector<7x8xbf16>, vector<7x7xf32> -> vector<7x7xf32>
    %447 = arith.addf %446, %347 : vector<7x7xf32>
    %cst_128 = arith.constant dense<0xFF800000> : vector<7xf32>
    %448 = vector.multi_reduction <maximumf>, %447, %cst_128 [1] : vector<7x7xf32> to vector<7xf32>
    %449 = vector.shape_cast %448 : vector<7xf32> to vector<7x1xf32>
    %450 = vector.broadcast %449 : vector<7x1xf32> to vector<7x7xf32>
    %451 = arith.subf %447, %450 : vector<7x7xf32>
    %452 = math.exp %451 : vector<7x7xf32>
    %cst_129 = arith.constant dense<0.000000e+00> : vector<7xf32>
    %453 = vector.multi_reduction <add>, %452, %cst_129 [1] : vector<7x7xf32> to vector<7xf32>
    %454 = vector.shape_cast %453 : vector<7xf32> to vector<7x1xf32>
    %455 = tpu.reciprocal %454 {approx = true} : vector<7x1xf32> -> vector<7x1xf32>
    %456 = vector.broadcast %455 : vector<7x1xf32> to vector<7x7xf32>
    %457 = arith.mulf %452, %456 : vector<7x7xf32>
    %458 = arith.truncf %457 : vector<7x7xf32> to vector<7x7xbf16>
    %459 = arith.truncf %443 : vector<7x8xf32> to vector<7x8xbf16>
    %cst_130 = arith.constant dense<0.000000e+00> : vector<7x8xf32>
    %460 = tpu.matmul %458, %459, %cst_130 {dimension_numbers = #tpu.dot_dimension_numbers<[1], [0], [0], [1], [0, 0, 1, 1], [], []>} : vector<7x7xbf16>, vector<7x8xbf16>, vector<7x8xf32> -> vector<7x8xf32>
    %461 = tpu.concatenate %400, %420, %440, %460 in 1 : vector<7x8xf32>, vector<7x8xf32>, vector<7x8xf32>, vector<7x8xf32> -> vector<7x32xf32>
    %c352 = arith.constant 352 : index
    %c0_131 = arith.constant 0 : index
    %462 = vector.load %arg1[%c352, %c0_131] : memref<800x128xbf16, #tpu.memory_space<vmem>>, vector<32x32xbf16>
    %463 = arith.truncf %461 : vector<7x32xf32> to vector<7x32xbf16>
    %cst_132 = arith.constant dense<0.000000e+00> : vector<7x32xf32>
    %464 = tpu.matmul %463, %462, %cst_132 {dimension_numbers = #tpu.dot_dimension_numbers<[1], [0], [0], [1], [0, 0, 1, 1], [], []>} : vector<7x32xbf16>, vector<32x32xbf16>, vector<7x32xf32> -> vector<7x32xf32>
    %c21 = arith.constant 21 : index
    %c0_133 = arith.constant 0 : index
    %465 = vector.load %arg2[%c21, %c0_133] : memref<48x128xf32, #tpu.memory_space<vmem>>, vector<1x32xf32>
    %466 = vector.broadcast %465 : vector<1x32xf32> to vector<7x32xf32>
    %467 = arith.addf %464, %466 : vector<7x32xf32>
    %468 = arith.addf %349, %467 : vector<7x32xf32>
    %c18 = arith.constant 18 : index
    %c0_134 = arith.constant 0 : index
    %469 = vector.load %arg2[%c18, %c0_134] : memref<48x128xf32, #tpu.memory_space<vmem>>, vector<1x32xf32>
    %c19 = arith.constant 19 : index
    %c0_135 = arith.constant 0 : index
    %470 = vector.load %arg2[%c19, %c0_135] : memref<48x128xf32, #tpu.memory_space<vmem>>, vector<1x32xf32>
    %cst_136 = arith.constant dense<0.000000e+00> : vector<7xf32>
    %471 = vector.multi_reduction <add>, %468, %cst_136 [1] : vector<7x32xf32> to vector<7xf32>
    %472 = vector.shape_cast %471 : vector<7xf32> to vector<7x1xf32>
    %cst_137 = arith.constant 3.200000e+01 : f32
    %473 = vector.broadcast %cst_137 : f32 to vector<7x1xf32>
    %474 = arith.divf %472, %473 : vector<7x1xf32>
    %475 = vector.broadcast %474 : vector<7x1xf32> to vector<7x32xf32>
    %476 = arith.subf %468, %475 : vector<7x32xf32>
    %477 = arith.mulf %476, %476 : vector<7x32xf32>
    %cst_138 = arith.constant dense<0.000000e+00> : vector<7xf32>
    %478 = vector.multi_reduction <add>, %477, %cst_138 [1] : vector<7x32xf32> to vector<7xf32>
    %479 = vector.shape_cast %478 : vector<7xf32> to vector<7x1xf32>
    %cst_139 = arith.constant 3.200000e+01 : f32
    %480 = vector.broadcast %cst_139 : f32 to vector<7x1xf32>
    %481 = arith.divf %479, %480 : vector<7x1xf32>
    %cst_140 = arith.constant 9.99999997E-7 : f32
    %482 = vector.broadcast %cst_140 : f32 to vector<7x1xf32>
    %483 = arith.addf %481, %482 : vector<7x1xf32>
    %484 = math.rsqrt %483 : vector<7x1xf32>
    %485 = vector.broadcast %484 : vector<7x1xf32> to vector<7x32xf32>
    %486 = arith.mulf %476, %485 : vector<7x32xf32>
    %487 = vector.broadcast %469 : vector<1x32xf32> to vector<7x32xf32>
    %488 = arith.mulf %486, %487 : vector<7x32xf32>
    %489 = vector.broadcast %470 : vector<1x32xf32> to vector<7x32xf32>
    %490 = arith.addf %488, %489 : vector<7x32xf32>
    %c384 = arith.constant 384 : index
    %c0_141 = arith.constant 0 : index
    %491 = vector.load %arg1[%c384, %c0_141] : memref<800x128xbf16, #tpu.memory_space<vmem>>, vector<32x96xbf16>
    %c22 = arith.constant 22 : index
    %c0_142 = arith.constant 0 : index
    %492 = vector.load %arg2[%c22, %c0_142] : memref<48x128xf32, #tpu.memory_space<vmem>>, vector<1x96xf32>
    %493 = vector.extract_strided_slice %491 {offsets = [0, 0], sizes = [32, 32], strides = [1, 1]} : vector<32x96xbf16> to vector<32x32xbf16>
    %494 = arith.truncf %490 : vector<7x32xf32> to vector<7x32xbf16>
    %cst_143 = arith.constant dense<0.000000e+00> : vector<7x32xf32>
    %495 = tpu.matmul %494, %493, %cst_143 {dimension_numbers = #tpu.dot_dimension_numbers<[1], [0], [0], [1], [0, 0, 1, 1], [], []>} : vector<7x32xbf16>, vector<32x32xbf16>, vector<7x32xf32> -> vector<7x32xf32>
    %496 = vector.extract_strided_slice %492 {offsets = [0, 0], sizes = [1, 32], strides = [1, 1]} : vector<1x96xf32> to vector<1x32xf32>
    %497 = vector.broadcast %496 : vector<1x32xf32> to vector<7x32xf32>
    %498 = arith.addf %495, %497 : vector<7x32xf32>
    %499 = vector.extract_strided_slice %491 {offsets = [0, 32], sizes = [32, 64], strides = [1, 1]} : vector<32x96xbf16> to vector<32x64xbf16>
    %500 = arith.truncf %345 : vector<8x32xf32> to vector<8x32xbf16>
    %cst_144 = arith.constant dense<0.000000e+00> : vector<8x64xf32>
    %501 = tpu.matmul %500, %499, %cst_144 {dimension_numbers = #tpu.dot_dimension_numbers<[1], [0], [0], [1], [0, 0, 1, 1], [], []>} : vector<8x32xbf16>, vector<32x64xbf16>, vector<8x64xf32> -> vector<8x64xf32>
    %502 = vector.extract_strided_slice %492 {offsets = [0, 32], sizes = [1, 64], strides = [1, 1]} : vector<1x96xf32> to vector<1x64xf32>
    %503 = vector.broadcast %502 : vector<1x64xf32> to vector<8x64xf32>
    %504 = arith.addf %501, %503 : vector<8x64xf32>
    %505 = vector.extract_strided_slice %504 {offsets = [0, 0], sizes = [8, 32], strides = [1, 1]} : vector<8x64xf32> to vector<8x32xf32>
    %506 = vector.extract_strided_slice %504 {offsets = [0, 32], sizes = [8, 32], strides = [1, 1]} : vector<8x64xf32> to vector<8x32xf32>
    %507 = vector.extract_strided_slice %498 {offsets = [0, 0], sizes = [7, 8], strides = [1, 1]} : vector<7x32xf32> to vector<7x8xf32>
    %508 = vector.extract_strided_slice %505 {offsets = [0, 0], sizes = [8, 8], strides = [1, 1]} : vector<8x32xf32> to vector<8x8xf32>
    %509 = vector.extract_strided_slice %506 {offsets = [0, 0], sizes = [8, 8], strides = [1, 1]} : vector<8x32xf32> to vector<8x8xf32>
    %510 = arith.truncf %507 : vector<7x8xf32> to vector<7x8xbf16>
    %511 = arith.truncf %508 : vector<8x8xf32> to vector<8x8xbf16>
    %cst_145 = arith.constant dense<0.000000e+00> : vector<7x8xf32>
    %512 = tpu.matmul %510, %511, %cst_145 {dimension_numbers = #tpu.dot_dimension_numbers<[1], [1], [0], [0], [0, 0, 1, 0], [], []>} : vector<7x8xbf16>, vector<8x8xbf16>, vector<7x8xf32> -> vector<7x8xf32>
    %513 = vector.broadcast %1 : vector<1x8xf32> to vector<7x8xf32>
    %514 = arith.addf %512, %513 : vector<7x8xf32>
    %cst_146 = arith.constant dense<0xFF800000> : vector<7xf32>
    %515 = vector.multi_reduction <maximumf>, %514, %cst_146 [1] : vector<7x8xf32> to vector<7xf32>
    %516 = vector.shape_cast %515 : vector<7xf32> to vector<7x1xf32>
    %517 = vector.broadcast %516 : vector<7x1xf32> to vector<7x8xf32>
    %518 = arith.subf %514, %517 : vector<7x8xf32>
    %519 = math.exp %518 : vector<7x8xf32>
    %cst_147 = arith.constant dense<0.000000e+00> : vector<7xf32>
    %520 = vector.multi_reduction <add>, %519, %cst_147 [1] : vector<7x8xf32> to vector<7xf32>
    %521 = vector.shape_cast %520 : vector<7xf32> to vector<7x1xf32>
    %522 = tpu.reciprocal %521 {approx = true} : vector<7x1xf32> -> vector<7x1xf32>
    %523 = vector.broadcast %522 : vector<7x1xf32> to vector<7x8xf32>
    %524 = arith.mulf %519, %523 : vector<7x8xf32>
    %525 = arith.truncf %524 : vector<7x8xf32> to vector<7x8xbf16>
    %526 = arith.truncf %509 : vector<8x8xf32> to vector<8x8xbf16>
    %cst_148 = arith.constant dense<0.000000e+00> : vector<7x8xf32>
    %527 = tpu.matmul %525, %526, %cst_148 {dimension_numbers = #tpu.dot_dimension_numbers<[1], [0], [0], [1], [0, 0, 1, 1], [], []>} : vector<7x8xbf16>, vector<8x8xbf16>, vector<7x8xf32> -> vector<7x8xf32>
    %528 = vector.extract_strided_slice %498 {offsets = [0, 8], sizes = [7, 8], strides = [1, 1]} : vector<7x32xf32> to vector<7x8xf32>
    %529 = vector.extract_strided_slice %505 {offsets = [0, 8], sizes = [8, 8], strides = [1, 1]} : vector<8x32xf32> to vector<8x8xf32>
    %530 = vector.extract_strided_slice %506 {offsets = [0, 8], sizes = [8, 8], strides = [1, 1]} : vector<8x32xf32> to vector<8x8xf32>
    %531 = arith.truncf %528 : vector<7x8xf32> to vector<7x8xbf16>
    %532 = arith.truncf %529 : vector<8x8xf32> to vector<8x8xbf16>
    %cst_149 = arith.constant dense<0.000000e+00> : vector<7x8xf32>
    %533 = tpu.matmul %531, %532, %cst_149 {dimension_numbers = #tpu.dot_dimension_numbers<[1], [1], [0], [0], [0, 0, 1, 0], [], []>} : vector<7x8xbf16>, vector<8x8xbf16>, vector<7x8xf32> -> vector<7x8xf32>
    %534 = vector.broadcast %1 : vector<1x8xf32> to vector<7x8xf32>
    %535 = arith.addf %533, %534 : vector<7x8xf32>
    %cst_150 = arith.constant dense<0xFF800000> : vector<7xf32>
    %536 = vector.multi_reduction <maximumf>, %535, %cst_150 [1] : vector<7x8xf32> to vector<7xf32>
    %537 = vector.shape_cast %536 : vector<7xf32> to vector<7x1xf32>
    %538 = vector.broadcast %537 : vector<7x1xf32> to vector<7x8xf32>
    %539 = arith.subf %535, %538 : vector<7x8xf32>
    %540 = math.exp %539 : vector<7x8xf32>
    %cst_151 = arith.constant dense<0.000000e+00> : vector<7xf32>
    %541 = vector.multi_reduction <add>, %540, %cst_151 [1] : vector<7x8xf32> to vector<7xf32>
    %542 = vector.shape_cast %541 : vector<7xf32> to vector<7x1xf32>
    %543 = tpu.reciprocal %542 {approx = true} : vector<7x1xf32> -> vector<7x1xf32>
    %544 = vector.broadcast %543 : vector<7x1xf32> to vector<7x8xf32>
    %545 = arith.mulf %540, %544 : vector<7x8xf32>
    %546 = arith.truncf %545 : vector<7x8xf32> to vector<7x8xbf16>
    %547 = arith.truncf %530 : vector<8x8xf32> to vector<8x8xbf16>
    %cst_152 = arith.constant dense<0.000000e+00> : vector<7x8xf32>
    %548 = tpu.matmul %546, %547, %cst_152 {dimension_numbers = #tpu.dot_dimension_numbers<[1], [0], [0], [1], [0, 0, 1, 1], [], []>} : vector<7x8xbf16>, vector<8x8xbf16>, vector<7x8xf32> -> vector<7x8xf32>
    %549 = vector.extract_strided_slice %498 {offsets = [0, 16], sizes = [7, 8], strides = [1, 1]} : vector<7x32xf32> to vector<7x8xf32>
    %550 = vector.extract_strided_slice %505 {offsets = [0, 16], sizes = [8, 8], strides = [1, 1]} : vector<8x32xf32> to vector<8x8xf32>
    %551 = vector.extract_strided_slice %506 {offsets = [0, 16], sizes = [8, 8], strides = [1, 1]} : vector<8x32xf32> to vector<8x8xf32>
    %552 = arith.truncf %549 : vector<7x8xf32> to vector<7x8xbf16>
    %553 = arith.truncf %550 : vector<8x8xf32> to vector<8x8xbf16>
    %cst_153 = arith.constant dense<0.000000e+00> : vector<7x8xf32>
    %554 = tpu.matmul %552, %553, %cst_153 {dimension_numbers = #tpu.dot_dimension_numbers<[1], [1], [0], [0], [0, 0, 1, 0], [], []>} : vector<7x8xbf16>, vector<8x8xbf16>, vector<7x8xf32> -> vector<7x8xf32>
    %555 = vector.broadcast %1 : vector<1x8xf32> to vector<7x8xf32>
    %556 = arith.addf %554, %555 : vector<7x8xf32>
    %cst_154 = arith.constant dense<0xFF800000> : vector<7xf32>
    %557 = vector.multi_reduction <maximumf>, %556, %cst_154 [1] : vector<7x8xf32> to vector<7xf32>
    %558 = vector.shape_cast %557 : vector<7xf32> to vector<7x1xf32>
    %559 = vector.broadcast %558 : vector<7x1xf32> to vector<7x8xf32>
    %560 = arith.subf %556, %559 : vector<7x8xf32>
    %561 = math.exp %560 : vector<7x8xf32>
    %cst_155 = arith.constant dense<0.000000e+00> : vector<7xf32>
    %562 = vector.multi_reduction <add>, %561, %cst_155 [1] : vector<7x8xf32> to vector<7xf32>
    %563 = vector.shape_cast %562 : vector<7xf32> to vector<7x1xf32>
    %564 = tpu.reciprocal %563 {approx = true} : vector<7x1xf32> -> vector<7x1xf32>
    %565 = vector.broadcast %564 : vector<7x1xf32> to vector<7x8xf32>
    %566 = arith.mulf %561, %565 : vector<7x8xf32>
    %567 = arith.truncf %566 : vector<7x8xf32> to vector<7x8xbf16>
    %568 = arith.truncf %551 : vector<8x8xf32> to vector<8x8xbf16>
    %cst_156 = arith.constant dense<0.000000e+00> : vector<7x8xf32>
    %569 = tpu.matmul %567, %568, %cst_156 {dimension_numbers = #tpu.dot_dimension_numbers<[1], [0], [0], [1], [0, 0, 1, 1], [], []>} : vector<7x8xbf16>, vector<8x8xbf16>, vector<7x8xf32> -> vector<7x8xf32>
    %570 = vector.extract_strided_slice %498 {offsets = [0, 24], sizes = [7, 8], strides = [1, 1]} : vector<7x32xf32> to vector<7x8xf32>
    %571 = vector.extract_strided_slice %505 {offsets = [0, 24], sizes = [8, 8], strides = [1, 1]} : vector<8x32xf32> to vector<8x8xf32>
    %572 = vector.extract_strided_slice %506 {offsets = [0, 24], sizes = [8, 8], strides = [1, 1]} : vector<8x32xf32> to vector<8x8xf32>
    %573 = arith.truncf %570 : vector<7x8xf32> to vector<7x8xbf16>
    %574 = arith.truncf %571 : vector<8x8xf32> to vector<8x8xbf16>
    %cst_157 = arith.constant dense<0.000000e+00> : vector<7x8xf32>
    %575 = tpu.matmul %573, %574, %cst_157 {dimension_numbers = #tpu.dot_dimension_numbers<[1], [1], [0], [0], [0, 0, 1, 0], [], []>} : vector<7x8xbf16>, vector<8x8xbf16>, vector<7x8xf32> -> vector<7x8xf32>
    %576 = vector.broadcast %1 : vector<1x8xf32> to vector<7x8xf32>
    %577 = arith.addf %575, %576 : vector<7x8xf32>
    %cst_158 = arith.constant dense<0xFF800000> : vector<7xf32>
    %578 = vector.multi_reduction <maximumf>, %577, %cst_158 [1] : vector<7x8xf32> to vector<7xf32>
    %579 = vector.shape_cast %578 : vector<7xf32> to vector<7x1xf32>
    %580 = vector.broadcast %579 : vector<7x1xf32> to vector<7x8xf32>
    %581 = arith.subf %577, %580 : vector<7x8xf32>
    %582 = math.exp %581 : vector<7x8xf32>
    %cst_159 = arith.constant dense<0.000000e+00> : vector<7xf32>
    %583 = vector.multi_reduction <add>, %582, %cst_159 [1] : vector<7x8xf32> to vector<7xf32>
    %584 = vector.shape_cast %583 : vector<7xf32> to vector<7x1xf32>
    %585 = tpu.reciprocal %584 {approx = true} : vector<7x1xf32> -> vector<7x1xf32>
    %586 = vector.broadcast %585 : vector<7x1xf32> to vector<7x8xf32>
    %587 = arith.mulf %582, %586 : vector<7x8xf32>
    %588 = arith.truncf %587 : vector<7x8xf32> to vector<7x8xbf16>
    %589 = arith.truncf %572 : vector<8x8xf32> to vector<8x8xbf16>
    %cst_160 = arith.constant dense<0.000000e+00> : vector<7x8xf32>
    %590 = tpu.matmul %588, %589, %cst_160 {dimension_numbers = #tpu.dot_dimension_numbers<[1], [0], [0], [1], [0, 0, 1, 1], [], []>} : vector<7x8xbf16>, vector<8x8xbf16>, vector<7x8xf32> -> vector<7x8xf32>
    %591 = tpu.concatenate %527, %548, %569, %590 in 1 : vector<7x8xf32>, vector<7x8xf32>, vector<7x8xf32>, vector<7x8xf32> -> vector<7x32xf32>
    %c416 = arith.constant 416 : index
    %c0_161 = arith.constant 0 : index
    %592 = vector.load %arg1[%c416, %c0_161] : memref<800x128xbf16, #tpu.memory_space<vmem>>, vector<32x32xbf16>
    %593 = arith.truncf %591 : vector<7x32xf32> to vector<7x32xbf16>
    %cst_162 = arith.constant dense<0.000000e+00> : vector<7x32xf32>
    %594 = tpu.matmul %593, %592, %cst_162 {dimension_numbers = #tpu.dot_dimension_numbers<[1], [0], [0], [1], [0, 0, 1, 1], [], []>} : vector<7x32xbf16>, vector<32x32xbf16>, vector<7x32xf32> -> vector<7x32xf32>
    %c23 = arith.constant 23 : index
    %c0_163 = arith.constant 0 : index
    %595 = vector.load %arg2[%c23, %c0_163] : memref<48x128xf32, #tpu.memory_space<vmem>>, vector<1x32xf32>
    %596 = vector.broadcast %595 : vector<1x32xf32> to vector<7x32xf32>
    %597 = arith.addf %594, %596 : vector<7x32xf32>
    %598 = arith.addf %468, %597 : vector<7x32xf32>
    %c24 = arith.constant 24 : index
    %c0_164 = arith.constant 0 : index
    %599 = vector.load %arg2[%c24, %c0_164] : memref<48x128xf32, #tpu.memory_space<vmem>>, vector<1x32xf32>
    %c25 = arith.constant 25 : index
    %c0_165 = arith.constant 0 : index
    %600 = vector.load %arg2[%c25, %c0_165] : memref<48x128xf32, #tpu.memory_space<vmem>>, vector<1x32xf32>
    %cst_166 = arith.constant dense<0.000000e+00> : vector<7xf32>
    %601 = vector.multi_reduction <add>, %598, %cst_166 [1] : vector<7x32xf32> to vector<7xf32>
    %602 = vector.shape_cast %601 : vector<7xf32> to vector<7x1xf32>
    %cst_167 = arith.constant 3.200000e+01 : f32
    %603 = vector.broadcast %cst_167 : f32 to vector<7x1xf32>
    %604 = arith.divf %602, %603 : vector<7x1xf32>
    %605 = vector.broadcast %604 : vector<7x1xf32> to vector<7x32xf32>
    %606 = arith.subf %598, %605 : vector<7x32xf32>
    %607 = arith.mulf %606, %606 : vector<7x32xf32>
    %cst_168 = arith.constant dense<0.000000e+00> : vector<7xf32>
    %608 = vector.multi_reduction <add>, %607, %cst_168 [1] : vector<7x32xf32> to vector<7xf32>
    %609 = vector.shape_cast %608 : vector<7xf32> to vector<7x1xf32>
    %cst_169 = arith.constant 3.200000e+01 : f32
    %610 = vector.broadcast %cst_169 : f32 to vector<7x1xf32>
    %611 = arith.divf %609, %610 : vector<7x1xf32>
    %cst_170 = arith.constant 9.99999997E-7 : f32
    %612 = vector.broadcast %cst_170 : f32 to vector<7x1xf32>
    %613 = arith.addf %611, %612 : vector<7x1xf32>
    %614 = math.rsqrt %613 : vector<7x1xf32>
    %615 = vector.broadcast %614 : vector<7x1xf32> to vector<7x32xf32>
    %616 = arith.mulf %606, %615 : vector<7x32xf32>
    %617 = vector.broadcast %599 : vector<1x32xf32> to vector<7x32xf32>
    %618 = arith.mulf %616, %617 : vector<7x32xf32>
    %619 = vector.broadcast %600 : vector<1x32xf32> to vector<7x32xf32>
    %620 = arith.addf %618, %619 : vector<7x32xf32>
    %c448 = arith.constant 448 : index
    %c0_171 = arith.constant 0 : index
    %621 = vector.load %arg1[%c448, %c0_171] : memref<800x128xbf16, #tpu.memory_space<vmem>>, vector<32x64xbf16>
    %622 = arith.truncf %620 : vector<7x32xf32> to vector<7x32xbf16>
    %cst_172 = arith.constant dense<0.000000e+00> : vector<7x64xf32>
    %623 = tpu.matmul %622, %621, %cst_172 {dimension_numbers = #tpu.dot_dimension_numbers<[1], [0], [0], [1], [0, 0, 1, 1], [], []>} : vector<7x32xbf16>, vector<32x64xbf16>, vector<7x64xf32> -> vector<7x64xf32>
    %c26 = arith.constant 26 : index
    %c0_173 = arith.constant 0 : index
    %624 = vector.load %arg2[%c26, %c0_173] : memref<48x128xf32, #tpu.memory_space<vmem>>, vector<1x64xf32>
    %625 = vector.broadcast %624 : vector<1x64xf32> to vector<7x64xf32>
    %626 = arith.addf %623, %625 : vector<7x64xf32>
    %cst_174 = arith.constant 0.000000e+00 : f32
    %627 = vector.broadcast %cst_174 : f32 to vector<7x64xf32>
    %628 = arith.maximumf %626, %627 : vector<7x64xf32>
    %c480 = arith.constant 480 : index
    %c0_175 = arith.constant 0 : index
    %629 = vector.load %arg1[%c480, %c0_175] : memref<800x128xbf16, #tpu.memory_space<vmem>>, vector<64x32xbf16>
    %630 = arith.truncf %628 : vector<7x64xf32> to vector<7x64xbf16>
    %cst_176 = arith.constant dense<0.000000e+00> : vector<7x32xf32>
    %631 = tpu.matmul %630, %629, %cst_176 {dimension_numbers = #tpu.dot_dimension_numbers<[1], [0], [0], [1], [0, 0, 1, 1], [], []>} : vector<7x64xbf16>, vector<64x32xbf16>, vector<7x32xf32> -> vector<7x32xf32>
    %c27 = arith.constant 27 : index
    %c0_177 = arith.constant 0 : index
    %632 = vector.load %arg2[%c27, %c0_177] : memref<48x128xf32, #tpu.memory_space<vmem>>, vector<1x32xf32>
    %633 = vector.broadcast %632 : vector<1x32xf32> to vector<7x32xf32>
    %634 = arith.addf %631, %633 : vector<7x32xf32>
    %635 = arith.addf %634, %598 : vector<7x32xf32>
    %c28 = arith.constant 28 : index
    %c0_178 = arith.constant 0 : index
    %636 = vector.load %arg2[%c28, %c0_178] : memref<48x128xf32, #tpu.memory_space<vmem>>, vector<1x32xf32>
    %c29 = arith.constant 29 : index
    %c0_179 = arith.constant 0 : index
    %637 = vector.load %arg2[%c29, %c0_179] : memref<48x128xf32, #tpu.memory_space<vmem>>, vector<1x32xf32>
    %cst_180 = arith.constant dense<0.000000e+00> : vector<7xf32>
    %638 = vector.multi_reduction <add>, %635, %cst_180 [1] : vector<7x32xf32> to vector<7xf32>
    %639 = vector.shape_cast %638 : vector<7xf32> to vector<7x1xf32>
    %cst_181 = arith.constant 3.200000e+01 : f32
    %640 = vector.broadcast %cst_181 : f32 to vector<7x1xf32>
    %641 = arith.divf %639, %640 : vector<7x1xf32>
    %642 = vector.broadcast %641 : vector<7x1xf32> to vector<7x32xf32>
    %643 = arith.subf %635, %642 : vector<7x32xf32>
    %644 = arith.mulf %643, %643 : vector<7x32xf32>
    %cst_182 = arith.constant dense<0.000000e+00> : vector<7xf32>
    %645 = vector.multi_reduction <add>, %644, %cst_182 [1] : vector<7x32xf32> to vector<7xf32>
    %646 = vector.shape_cast %645 : vector<7xf32> to vector<7x1xf32>
    %cst_183 = arith.constant 3.200000e+01 : f32
    %647 = vector.broadcast %cst_183 : f32 to vector<7x1xf32>
    %648 = arith.divf %646, %647 : vector<7x1xf32>
    %cst_184 = arith.constant 9.99999997E-7 : f32
    %649 = vector.broadcast %cst_184 : f32 to vector<7x1xf32>
    %650 = arith.addf %648, %649 : vector<7x1xf32>
    %651 = math.rsqrt %650 : vector<7x1xf32>
    %652 = vector.broadcast %651 : vector<7x1xf32> to vector<7x32xf32>
    %653 = arith.mulf %643, %652 : vector<7x32xf32>
    %654 = vector.broadcast %636 : vector<1x32xf32> to vector<7x32xf32>
    %655 = arith.mulf %653, %654 : vector<7x32xf32>
    %656 = vector.broadcast %637 : vector<1x32xf32> to vector<7x32xf32>
    %657 = arith.addf %655, %656 : vector<7x32xf32>
    %c544 = arith.constant 544 : index
    %c0_185 = arith.constant 0 : index
    %658 = vector.load %arg1[%c544, %c0_185] : memref<800x128xbf16, #tpu.memory_space<vmem>>, vector<32x96xbf16>
    %659 = arith.truncf %657 : vector<7x32xf32> to vector<7x32xbf16>
    %cst_186 = arith.constant dense<0.000000e+00> : vector<7x96xf32>
    %660 = tpu.matmul %659, %658, %cst_186 {dimension_numbers = #tpu.dot_dimension_numbers<[1], [0], [0], [1], [0, 0, 1, 1], [], []>} : vector<7x32xbf16>, vector<32x96xbf16>, vector<7x96xf32> -> vector<7x96xf32>
    %c32_187 = arith.constant 32 : index
    %c0_188 = arith.constant 0 : index
    %661 = vector.load %arg2[%c32_187, %c0_188] : memref<48x128xf32, #tpu.memory_space<vmem>>, vector<1x96xf32>
    %662 = vector.broadcast %661 : vector<1x96xf32> to vector<7x96xf32>
    %663 = arith.addf %660, %662 : vector<7x96xf32>
    %664 = vector.extract_strided_slice %663 {offsets = [0, 0], sizes = [7, 32], strides = [1, 1]} : vector<7x96xf32> to vector<7x32xf32>
    %665 = vector.extract_strided_slice %663 {offsets = [0, 32], sizes = [7, 32], strides = [1, 1]} : vector<7x96xf32> to vector<7x32xf32>
    %666 = vector.extract_strided_slice %663 {offsets = [0, 64], sizes = [7, 32], strides = [1, 1]} : vector<7x96xf32> to vector<7x32xf32>
    %667 = vector.extract_strided_slice %664 {offsets = [0, 0], sizes = [7, 8], strides = [1, 1]} : vector<7x32xf32> to vector<7x8xf32>
    %668 = vector.extract_strided_slice %665 {offsets = [0, 0], sizes = [7, 8], strides = [1, 1]} : vector<7x32xf32> to vector<7x8xf32>
    %669 = vector.extract_strided_slice %666 {offsets = [0, 0], sizes = [7, 8], strides = [1, 1]} : vector<7x32xf32> to vector<7x8xf32>
    %670 = arith.truncf %667 : vector<7x8xf32> to vector<7x8xbf16>
    %671 = arith.truncf %668 : vector<7x8xf32> to vector<7x8xbf16>
    %cst_189 = arith.constant dense<0.000000e+00> : vector<7x7xf32>
    %672 = tpu.matmul %670, %671, %cst_189 {dimension_numbers = #tpu.dot_dimension_numbers<[1], [1], [0], [0], [0, 0, 1, 0], [], []>} : vector<7x8xbf16>, vector<7x8xbf16>, vector<7x7xf32> -> vector<7x7xf32>
    %673 = arith.addf %672, %347 : vector<7x7xf32>
    %cst_190 = arith.constant dense<0xFF800000> : vector<7xf32>
    %674 = vector.multi_reduction <maximumf>, %673, %cst_190 [1] : vector<7x7xf32> to vector<7xf32>
    %675 = vector.shape_cast %674 : vector<7xf32> to vector<7x1xf32>
    %676 = vector.broadcast %675 : vector<7x1xf32> to vector<7x7xf32>
    %677 = arith.subf %673, %676 : vector<7x7xf32>
    %678 = math.exp %677 : vector<7x7xf32>
    %cst_191 = arith.constant dense<0.000000e+00> : vector<7xf32>
    %679 = vector.multi_reduction <add>, %678, %cst_191 [1] : vector<7x7xf32> to vector<7xf32>
    %680 = vector.shape_cast %679 : vector<7xf32> to vector<7x1xf32>
    %681 = tpu.reciprocal %680 {approx = true} : vector<7x1xf32> -> vector<7x1xf32>
    %682 = vector.broadcast %681 : vector<7x1xf32> to vector<7x7xf32>
    %683 = arith.mulf %678, %682 : vector<7x7xf32>
    %684 = arith.truncf %683 : vector<7x7xf32> to vector<7x7xbf16>
    %685 = arith.truncf %669 : vector<7x8xf32> to vector<7x8xbf16>
    %cst_192 = arith.constant dense<0.000000e+00> : vector<7x8xf32>
    %686 = tpu.matmul %684, %685, %cst_192 {dimension_numbers = #tpu.dot_dimension_numbers<[1], [0], [0], [1], [0, 0, 1, 1], [], []>} : vector<7x7xbf16>, vector<7x8xbf16>, vector<7x8xf32> -> vector<7x8xf32>
    %687 = vector.extract_strided_slice %664 {offsets = [0, 8], sizes = [7, 8], strides = [1, 1]} : vector<7x32xf32> to vector<7x8xf32>
    %688 = vector.extract_strided_slice %665 {offsets = [0, 8], sizes = [7, 8], strides = [1, 1]} : vector<7x32xf32> to vector<7x8xf32>
    %689 = vector.extract_strided_slice %666 {offsets = [0, 8], sizes = [7, 8], strides = [1, 1]} : vector<7x32xf32> to vector<7x8xf32>
    %690 = arith.truncf %687 : vector<7x8xf32> to vector<7x8xbf16>
    %691 = arith.truncf %688 : vector<7x8xf32> to vector<7x8xbf16>
    %cst_193 = arith.constant dense<0.000000e+00> : vector<7x7xf32>
    %692 = tpu.matmul %690, %691, %cst_193 {dimension_numbers = #tpu.dot_dimension_numbers<[1], [1], [0], [0], [0, 0, 1, 0], [], []>} : vector<7x8xbf16>, vector<7x8xbf16>, vector<7x7xf32> -> vector<7x7xf32>
    %693 = arith.addf %692, %347 : vector<7x7xf32>
    %cst_194 = arith.constant dense<0xFF800000> : vector<7xf32>
    %694 = vector.multi_reduction <maximumf>, %693, %cst_194 [1] : vector<7x7xf32> to vector<7xf32>
    %695 = vector.shape_cast %694 : vector<7xf32> to vector<7x1xf32>
    %696 = vector.broadcast %695 : vector<7x1xf32> to vector<7x7xf32>
    %697 = arith.subf %693, %696 : vector<7x7xf32>
    %698 = math.exp %697 : vector<7x7xf32>
    %cst_195 = arith.constant dense<0.000000e+00> : vector<7xf32>
    %699 = vector.multi_reduction <add>, %698, %cst_195 [1] : vector<7x7xf32> to vector<7xf32>
    %700 = vector.shape_cast %699 : vector<7xf32> to vector<7x1xf32>
    %701 = tpu.reciprocal %700 {approx = true} : vector<7x1xf32> -> vector<7x1xf32>
    %702 = vector.broadcast %701 : vector<7x1xf32> to vector<7x7xf32>
    %703 = arith.mulf %698, %702 : vector<7x7xf32>
    %704 = arith.truncf %703 : vector<7x7xf32> to vector<7x7xbf16>
    %705 = arith.truncf %689 : vector<7x8xf32> to vector<7x8xbf16>
    %cst_196 = arith.constant dense<0.000000e+00> : vector<7x8xf32>
    %706 = tpu.matmul %704, %705, %cst_196 {dimension_numbers = #tpu.dot_dimension_numbers<[1], [0], [0], [1], [0, 0, 1, 1], [], []>} : vector<7x7xbf16>, vector<7x8xbf16>, vector<7x8xf32> -> vector<7x8xf32>
    %707 = vector.extract_strided_slice %664 {offsets = [0, 16], sizes = [7, 8], strides = [1, 1]} : vector<7x32xf32> to vector<7x8xf32>
    %708 = vector.extract_strided_slice %665 {offsets = [0, 16], sizes = [7, 8], strides = [1, 1]} : vector<7x32xf32> to vector<7x8xf32>
    %709 = vector.extract_strided_slice %666 {offsets = [0, 16], sizes = [7, 8], strides = [1, 1]} : vector<7x32xf32> to vector<7x8xf32>
    %710 = arith.truncf %707 : vector<7x8xf32> to vector<7x8xbf16>
    %711 = arith.truncf %708 : vector<7x8xf32> to vector<7x8xbf16>
    %cst_197 = arith.constant dense<0.000000e+00> : vector<7x7xf32>
    %712 = tpu.matmul %710, %711, %cst_197 {dimension_numbers = #tpu.dot_dimension_numbers<[1], [1], [0], [0], [0, 0, 1, 0], [], []>} : vector<7x8xbf16>, vector<7x8xbf16>, vector<7x7xf32> -> vector<7x7xf32>
    %713 = arith.addf %712, %347 : vector<7x7xf32>
    %cst_198 = arith.constant dense<0xFF800000> : vector<7xf32>
    %714 = vector.multi_reduction <maximumf>, %713, %cst_198 [1] : vector<7x7xf32> to vector<7xf32>
    %715 = vector.shape_cast %714 : vector<7xf32> to vector<7x1xf32>
    %716 = vector.broadcast %715 : vector<7x1xf32> to vector<7x7xf32>
    %717 = arith.subf %713, %716 : vector<7x7xf32>
    %718 = math.exp %717 : vector<7x7xf32>
    %cst_199 = arith.constant dense<0.000000e+00> : vector<7xf32>
    %719 = vector.multi_reduction <add>, %718, %cst_199 [1] : vector<7x7xf32> to vector<7xf32>
    %720 = vector.shape_cast %719 : vector<7xf32> to vector<7x1xf32>
    %721 = tpu.reciprocal %720 {approx = true} : vector<7x1xf32> -> vector<7x1xf32>
    %722 = vector.broadcast %721 : vector<7x1xf32> to vector<7x7xf32>
    %723 = arith.mulf %718, %722 : vector<7x7xf32>
    %724 = arith.truncf %723 : vector<7x7xf32> to vector<7x7xbf16>
    %725 = arith.truncf %709 : vector<7x8xf32> to vector<7x8xbf16>
    %cst_200 = arith.constant dense<0.000000e+00> : vector<7x8xf32>
    %726 = tpu.matmul %724, %725, %cst_200 {dimension_numbers = #tpu.dot_dimension_numbers<[1], [0], [0], [1], [0, 0, 1, 1], [], []>} : vector<7x7xbf16>, vector<7x8xbf16>, vector<7x8xf32> -> vector<7x8xf32>
    %727 = vector.extract_strided_slice %664 {offsets = [0, 24], sizes = [7, 8], strides = [1, 1]} : vector<7x32xf32> to vector<7x8xf32>
    %728 = vector.extract_strided_slice %665 {offsets = [0, 24], sizes = [7, 8], strides = [1, 1]} : vector<7x32xf32> to vector<7x8xf32>
    %729 = vector.extract_strided_slice %666 {offsets = [0, 24], sizes = [7, 8], strides = [1, 1]} : vector<7x32xf32> to vector<7x8xf32>
    %730 = arith.truncf %727 : vector<7x8xf32> to vector<7x8xbf16>
    %731 = arith.truncf %728 : vector<7x8xf32> to vector<7x8xbf16>
    %cst_201 = arith.constant dense<0.000000e+00> : vector<7x7xf32>
    %732 = tpu.matmul %730, %731, %cst_201 {dimension_numbers = #tpu.dot_dimension_numbers<[1], [1], [0], [0], [0, 0, 1, 0], [], []>} : vector<7x8xbf16>, vector<7x8xbf16>, vector<7x7xf32> -> vector<7x7xf32>
    %733 = arith.addf %732, %347 : vector<7x7xf32>
    %cst_202 = arith.constant dense<0xFF800000> : vector<7xf32>
    %734 = vector.multi_reduction <maximumf>, %733, %cst_202 [1] : vector<7x7xf32> to vector<7xf32>
    %735 = vector.shape_cast %734 : vector<7xf32> to vector<7x1xf32>
    %736 = vector.broadcast %735 : vector<7x1xf32> to vector<7x7xf32>
    %737 = arith.subf %733, %736 : vector<7x7xf32>
    %738 = math.exp %737 : vector<7x7xf32>
    %cst_203 = arith.constant dense<0.000000e+00> : vector<7xf32>
    %739 = vector.multi_reduction <add>, %738, %cst_203 [1] : vector<7x7xf32> to vector<7xf32>
    %740 = vector.shape_cast %739 : vector<7xf32> to vector<7x1xf32>
    %741 = tpu.reciprocal %740 {approx = true} : vector<7x1xf32> -> vector<7x1xf32>
    %742 = vector.broadcast %741 : vector<7x1xf32> to vector<7x7xf32>
    %743 = arith.mulf %738, %742 : vector<7x7xf32>
    %744 = arith.truncf %743 : vector<7x7xf32> to vector<7x7xbf16>
    %745 = arith.truncf %729 : vector<7x8xf32> to vector<7x8xbf16>
    %cst_204 = arith.constant dense<0.000000e+00> : vector<7x8xf32>
    %746 = tpu.matmul %744, %745, %cst_204 {dimension_numbers = #tpu.dot_dimension_numbers<[1], [0], [0], [1], [0, 0, 1, 1], [], []>} : vector<7x7xbf16>, vector<7x8xbf16>, vector<7x8xf32> -> vector<7x8xf32>
    %747 = tpu.concatenate %686, %706, %726, %746 in 1 : vector<7x8xf32>, vector<7x8xf32>, vector<7x8xf32>, vector<7x8xf32> -> vector<7x32xf32>
    %c576 = arith.constant 576 : index
    %c0_205 = arith.constant 0 : index
    %748 = vector.load %arg1[%c576, %c0_205] : memref<800x128xbf16, #tpu.memory_space<vmem>>, vector<32x32xbf16>
    %749 = arith.truncf %747 : vector<7x32xf32> to vector<7x32xbf16>
    %cst_206 = arith.constant dense<0.000000e+00> : vector<7x32xf32>
    %750 = tpu.matmul %749, %748, %cst_206 {dimension_numbers = #tpu.dot_dimension_numbers<[1], [0], [0], [1], [0, 0, 1, 1], [], []>} : vector<7x32xbf16>, vector<32x32xbf16>, vector<7x32xf32> -> vector<7x32xf32>
    %c33 = arith.constant 33 : index
    %c0_207 = arith.constant 0 : index
    %751 = vector.load %arg2[%c33, %c0_207] : memref<48x128xf32, #tpu.memory_space<vmem>>, vector<1x32xf32>
    %752 = vector.broadcast %751 : vector<1x32xf32> to vector<7x32xf32>
    %753 = arith.addf %750, %752 : vector<7x32xf32>
    %754 = arith.addf %635, %753 : vector<7x32xf32>
    %c30 = arith.constant 30 : index
    %c0_208 = arith.constant 0 : index
    %755 = vector.load %arg2[%c30, %c0_208] : memref<48x128xf32, #tpu.memory_space<vmem>>, vector<1x32xf32>
    %c31 = arith.constant 31 : index
    %c0_209 = arith.constant 0 : index
    %756 = vector.load %arg2[%c31, %c0_209] : memref<48x128xf32, #tpu.memory_space<vmem>>, vector<1x32xf32>
    %cst_210 = arith.constant dense<0.000000e+00> : vector<7xf32>
    %757 = vector.multi_reduction <add>, %754, %cst_210 [1] : vector<7x32xf32> to vector<7xf32>
    %758 = vector.shape_cast %757 : vector<7xf32> to vector<7x1xf32>
    %cst_211 = arith.constant 3.200000e+01 : f32
    %759 = vector.broadcast %cst_211 : f32 to vector<7x1xf32>
    %760 = arith.divf %758, %759 : vector<7x1xf32>
    %761 = vector.broadcast %760 : vector<7x1xf32> to vector<7x32xf32>
    %762 = arith.subf %754, %761 : vector<7x32xf32>
    %763 = arith.mulf %762, %762 : vector<7x32xf32>
    %cst_212 = arith.constant dense<0.000000e+00> : vector<7xf32>
    %764 = vector.multi_reduction <add>, %763, %cst_212 [1] : vector<7x32xf32> to vector<7xf32>
    %765 = vector.shape_cast %764 : vector<7xf32> to vector<7x1xf32>
    %cst_213 = arith.constant 3.200000e+01 : f32
    %766 = vector.broadcast %cst_213 : f32 to vector<7x1xf32>
    %767 = arith.divf %765, %766 : vector<7x1xf32>
    %cst_214 = arith.constant 9.99999997E-7 : f32
    %768 = vector.broadcast %cst_214 : f32 to vector<7x1xf32>
    %769 = arith.addf %767, %768 : vector<7x1xf32>
    %770 = math.rsqrt %769 : vector<7x1xf32>
    %771 = vector.broadcast %770 : vector<7x1xf32> to vector<7x32xf32>
    %772 = arith.mulf %762, %771 : vector<7x32xf32>
    %773 = vector.broadcast %755 : vector<1x32xf32> to vector<7x32xf32>
    %774 = arith.mulf %772, %773 : vector<7x32xf32>
    %775 = vector.broadcast %756 : vector<1x32xf32> to vector<7x32xf32>
    %776 = arith.addf %774, %775 : vector<7x32xf32>
    %c608 = arith.constant 608 : index
    %c0_215 = arith.constant 0 : index
    %777 = vector.load %arg1[%c608, %c0_215] : memref<800x128xbf16, #tpu.memory_space<vmem>>, vector<32x96xbf16>
    %c34 = arith.constant 34 : index
    %c0_216 = arith.constant 0 : index
    %778 = vector.load %arg2[%c34, %c0_216] : memref<48x128xf32, #tpu.memory_space<vmem>>, vector<1x96xf32>
    %779 = vector.extract_strided_slice %777 {offsets = [0, 0], sizes = [32, 32], strides = [1, 1]} : vector<32x96xbf16> to vector<32x32xbf16>
    %780 = arith.truncf %776 : vector<7x32xf32> to vector<7x32xbf16>
    %cst_217 = arith.constant dense<0.000000e+00> : vector<7x32xf32>
    %781 = tpu.matmul %780, %779, %cst_217 {dimension_numbers = #tpu.dot_dimension_numbers<[1], [0], [0], [1], [0, 0, 1, 1], [], []>} : vector<7x32xbf16>, vector<32x32xbf16>, vector<7x32xf32> -> vector<7x32xf32>
    %782 = vector.extract_strided_slice %778 {offsets = [0, 0], sizes = [1, 32], strides = [1, 1]} : vector<1x96xf32> to vector<1x32xf32>
    %783 = vector.broadcast %782 : vector<1x32xf32> to vector<7x32xf32>
    %784 = arith.addf %781, %783 : vector<7x32xf32>
    %785 = vector.extract_strided_slice %777 {offsets = [0, 32], sizes = [32, 64], strides = [1, 1]} : vector<32x96xbf16> to vector<32x64xbf16>
    %786 = arith.truncf %345 : vector<8x32xf32> to vector<8x32xbf16>
    %cst_218 = arith.constant dense<0.000000e+00> : vector<8x64xf32>
    %787 = tpu.matmul %786, %785, %cst_218 {dimension_numbers = #tpu.dot_dimension_numbers<[1], [0], [0], [1], [0, 0, 1, 1], [], []>} : vector<8x32xbf16>, vector<32x64xbf16>, vector<8x64xf32> -> vector<8x64xf32>
    %788 = vector.extract_strided_slice %778 {offsets = [0, 32], sizes = [1, 64], strides = [1, 1]} : vector<1x96xf32> to vector<1x64xf32>
    %789 = vector.broadcast %788 : vector<1x64xf32> to vector<8x64xf32>
    %790 = arith.addf %787, %789 : vector<8x64xf32>
    %791 = vector.extract_strided_slice %790 {offsets = [0, 0], sizes = [8, 32], strides = [1, 1]} : vector<8x64xf32> to vector<8x32xf32>
    %792 = vector.extract_strided_slice %790 {offsets = [0, 32], sizes = [8, 32], strides = [1, 1]} : vector<8x64xf32> to vector<8x32xf32>
    %793 = vector.extract_strided_slice %784 {offsets = [0, 0], sizes = [7, 8], strides = [1, 1]} : vector<7x32xf32> to vector<7x8xf32>
    %794 = vector.extract_strided_slice %791 {offsets = [0, 0], sizes = [8, 8], strides = [1, 1]} : vector<8x32xf32> to vector<8x8xf32>
    %795 = vector.extract_strided_slice %792 {offsets = [0, 0], sizes = [8, 8], strides = [1, 1]} : vector<8x32xf32> to vector<8x8xf32>
    %796 = arith.truncf %793 : vector<7x8xf32> to vector<7x8xbf16>
    %797 = arith.truncf %794 : vector<8x8xf32> to vector<8x8xbf16>
    %cst_219 = arith.constant dense<0.000000e+00> : vector<7x8xf32>
    %798 = tpu.matmul %796, %797, %cst_219 {dimension_numbers = #tpu.dot_dimension_numbers<[1], [1], [0], [0], [0, 0, 1, 0], [], []>} : vector<7x8xbf16>, vector<8x8xbf16>, vector<7x8xf32> -> vector<7x8xf32>
    %799 = vector.broadcast %1 : vector<1x8xf32> to vector<7x8xf32>
    %800 = arith.addf %798, %799 : vector<7x8xf32>
    %cst_220 = arith.constant dense<0xFF800000> : vector<7xf32>
    %801 = vector.multi_reduction <maximumf>, %800, %cst_220 [1] : vector<7x8xf32> to vector<7xf32>
    %802 = vector.shape_cast %801 : vector<7xf32> to vector<7x1xf32>
    %803 = vector.broadcast %802 : vector<7x1xf32> to vector<7x8xf32>
    %804 = arith.subf %800, %803 : vector<7x8xf32>
    %805 = math.exp %804 : vector<7x8xf32>
    %cst_221 = arith.constant dense<0.000000e+00> : vector<7xf32>
    %806 = vector.multi_reduction <add>, %805, %cst_221 [1] : vector<7x8xf32> to vector<7xf32>
    %807 = vector.shape_cast %806 : vector<7xf32> to vector<7x1xf32>
    %808 = vector.broadcast %807 : vector<7x1xf32> to vector<7x8xf32>
    %809 = arith.divf %805, %808 : vector<7x8xf32>
    %810 = arith.truncf %809 : vector<7x8xf32> to vector<7x8xbf16>
    %811 = arith.truncf %795 : vector<8x8xf32> to vector<8x8xbf16>
    %cst_222 = arith.constant dense<0.000000e+00> : vector<7x8xf32>
    %812 = tpu.matmul %810, %811, %cst_222 {dimension_numbers = #tpu.dot_dimension_numbers<[1], [0], [0], [1], [0, 0, 1, 1], [], []>} : vector<7x8xbf16>, vector<8x8xbf16>, vector<7x8xf32> -> vector<7x8xf32>
    %813 = vector.extract_strided_slice %784 {offsets = [0, 8], sizes = [7, 8], strides = [1, 1]} : vector<7x32xf32> to vector<7x8xf32>
    %814 = vector.extract_strided_slice %791 {offsets = [0, 8], sizes = [8, 8], strides = [1, 1]} : vector<8x32xf32> to vector<8x8xf32>
    %815 = vector.extract_strided_slice %792 {offsets = [0, 8], sizes = [8, 8], strides = [1, 1]} : vector<8x32xf32> to vector<8x8xf32>
    %816 = arith.truncf %813 : vector<7x8xf32> to vector<7x8xbf16>
    %817 = arith.truncf %814 : vector<8x8xf32> to vector<8x8xbf16>
    %cst_223 = arith.constant dense<0.000000e+00> : vector<7x8xf32>
    %818 = tpu.matmul %816, %817, %cst_223 {dimension_numbers = #tpu.dot_dimension_numbers<[1], [1], [0], [0], [0, 0, 1, 0], [], []>} : vector<7x8xbf16>, vector<8x8xbf16>, vector<7x8xf32> -> vector<7x8xf32>
    %819 = vector.broadcast %1 : vector<1x8xf32> to vector<7x8xf32>
    %820 = arith.addf %818, %819 : vector<7x8xf32>
    %cst_224 = arith.constant dense<0xFF800000> : vector<7xf32>
    %821 = vector.multi_reduction <maximumf>, %820, %cst_224 [1] : vector<7x8xf32> to vector<7xf32>
    %822 = vector.shape_cast %821 : vector<7xf32> to vector<7x1xf32>
    %823 = vector.broadcast %822 : vector<7x1xf32> to vector<7x8xf32>
    %824 = arith.subf %820, %823 : vector<7x8xf32>
    %825 = math.exp %824 : vector<7x8xf32>
    %cst_225 = arith.constant dense<0.000000e+00> : vector<7xf32>
    %826 = vector.multi_reduction <add>, %825, %cst_225 [1] : vector<7x8xf32> to vector<7xf32>
    %827 = vector.shape_cast %826 : vector<7xf32> to vector<7x1xf32>
    %828 = tpu.reciprocal %827 {approx = true} : vector<7x1xf32> -> vector<7x1xf32>
    %829 = vector.broadcast %828 : vector<7x1xf32> to vector<7x8xf32>
    %830 = arith.mulf %825, %829 : vector<7x8xf32>
    %831 = arith.truncf %830 : vector<7x8xf32> to vector<7x8xbf16>
    %832 = arith.truncf %815 : vector<8x8xf32> to vector<8x8xbf16>
    %cst_226 = arith.constant dense<0.000000e+00> : vector<7x8xf32>
    %833 = tpu.matmul %831, %832, %cst_226 {dimension_numbers = #tpu.dot_dimension_numbers<[1], [0], [0], [1], [0, 0, 1, 1], [], []>} : vector<7x8xbf16>, vector<8x8xbf16>, vector<7x8xf32> -> vector<7x8xf32>
    %834 = vector.extract_strided_slice %784 {offsets = [0, 16], sizes = [7, 8], strides = [1, 1]} : vector<7x32xf32> to vector<7x8xf32>
    %835 = vector.extract_strided_slice %791 {offsets = [0, 16], sizes = [8, 8], strides = [1, 1]} : vector<8x32xf32> to vector<8x8xf32>
    %836 = vector.extract_strided_slice %792 {offsets = [0, 16], sizes = [8, 8], strides = [1, 1]} : vector<8x32xf32> to vector<8x8xf32>
    %837 = arith.truncf %834 : vector<7x8xf32> to vector<7x8xbf16>
    %838 = arith.truncf %835 : vector<8x8xf32> to vector<8x8xbf16>
    %cst_227 = arith.constant dense<0.000000e+00> : vector<7x8xf32>
    %839 = tpu.matmul %837, %838, %cst_227 {dimension_numbers = #tpu.dot_dimension_numbers<[1], [1], [0], [0], [0, 0, 1, 0], [], []>} : vector<7x8xbf16>, vector<8x8xbf16>, vector<7x8xf32> -> vector<7x8xf32>
    %840 = vector.broadcast %1 : vector<1x8xf32> to vector<7x8xf32>
    %841 = arith.addf %839, %840 : vector<7x8xf32>
    %cst_228 = arith.constant dense<0xFF800000> : vector<7xf32>
    %842 = vector.multi_reduction <maximumf>, %841, %cst_228 [1] : vector<7x8xf32> to vector<7xf32>
    %843 = vector.shape_cast %842 : vector<7xf32> to vector<7x1xf32>
    %844 = vector.broadcast %843 : vector<7x1xf32> to vector<7x8xf32>
    %845 = arith.subf %841, %844 : vector<7x8xf32>
    %846 = math.exp %845 : vector<7x8xf32>
    %cst_229 = arith.constant dense<0.000000e+00> : vector<7xf32>
    %847 = vector.multi_reduction <add>, %846, %cst_229 [1] : vector<7x8xf32> to vector<7xf32>
    %848 = vector.shape_cast %847 : vector<7xf32> to vector<7x1xf32>
    %849 = tpu.reciprocal %848 {approx = true} : vector<7x1xf32> -> vector<7x1xf32>
    %850 = vector.broadcast %849 : vector<7x1xf32> to vector<7x8xf32>
    %851 = arith.mulf %846, %850 : vector<7x8xf32>
    %852 = arith.truncf %851 : vector<7x8xf32> to vector<7x8xbf16>
    %853 = arith.truncf %836 : vector<8x8xf32> to vector<8x8xbf16>
    %cst_230 = arith.constant dense<0.000000e+00> : vector<7x8xf32>
    %854 = tpu.matmul %852, %853, %cst_230 {dimension_numbers = #tpu.dot_dimension_numbers<[1], [0], [0], [1], [0, 0, 1, 1], [], []>} : vector<7x8xbf16>, vector<8x8xbf16>, vector<7x8xf32> -> vector<7x8xf32>
    %855 = vector.extract_strided_slice %784 {offsets = [0, 24], sizes = [7, 8], strides = [1, 1]} : vector<7x32xf32> to vector<7x8xf32>
    %856 = vector.extract_strided_slice %791 {offsets = [0, 24], sizes = [8, 8], strides = [1, 1]} : vector<8x32xf32> to vector<8x8xf32>
    %857 = vector.extract_strided_slice %792 {offsets = [0, 24], sizes = [8, 8], strides = [1, 1]} : vector<8x32xf32> to vector<8x8xf32>
    %858 = arith.truncf %855 : vector<7x8xf32> to vector<7x8xbf16>
    %859 = arith.truncf %856 : vector<8x8xf32> to vector<8x8xbf16>
    %cst_231 = arith.constant dense<0.000000e+00> : vector<7x8xf32>
    %860 = tpu.matmul %858, %859, %cst_231 {dimension_numbers = #tpu.dot_dimension_numbers<[1], [1], [0], [0], [0, 0, 1, 0], [], []>} : vector<7x8xbf16>, vector<8x8xbf16>, vector<7x8xf32> -> vector<7x8xf32>
    %861 = vector.broadcast %1 : vector<1x8xf32> to vector<7x8xf32>
    %862 = arith.addf %860, %861 : vector<7x8xf32>
    %cst_232 = arith.constant dense<0xFF800000> : vector<7xf32>
    %863 = vector.multi_reduction <maximumf>, %862, %cst_232 [1] : vector<7x8xf32> to vector<7xf32>
    %864 = vector.shape_cast %863 : vector<7xf32> to vector<7x1xf32>
    %865 = vector.broadcast %864 : vector<7x1xf32> to vector<7x8xf32>
    %866 = arith.subf %862, %865 : vector<7x8xf32>
    %867 = math.exp %866 : vector<7x8xf32>
    %cst_233 = arith.constant dense<0.000000e+00> : vector<7xf32>
    %868 = vector.multi_reduction <add>, %867, %cst_233 [1] : vector<7x8xf32> to vector<7xf32>
    %869 = vector.shape_cast %868 : vector<7xf32> to vector<7x1xf32>
    %870 = tpu.reciprocal %869 {approx = true} : vector<7x1xf32> -> vector<7x1xf32>
    %871 = vector.broadcast %870 : vector<7x1xf32> to vector<7x8xf32>
    %872 = arith.mulf %867, %871 : vector<7x8xf32>
    %873 = arith.truncf %872 : vector<7x8xf32> to vector<7x8xbf16>
    %874 = arith.truncf %857 : vector<8x8xf32> to vector<8x8xbf16>
    %cst_234 = arith.constant dense<0.000000e+00> : vector<7x8xf32>
    %875 = tpu.matmul %873, %874, %cst_234 {dimension_numbers = #tpu.dot_dimension_numbers<[1], [0], [0], [1], [0, 0, 1, 1], [], []>} : vector<7x8xbf16>, vector<8x8xbf16>, vector<7x8xf32> -> vector<7x8xf32>
    %876 = tpu.concatenate %812, %833, %854, %875 in 1 : vector<7x8xf32>, vector<7x8xf32>, vector<7x8xf32>, vector<7x8xf32> -> vector<7x32xf32>
    %c640 = arith.constant 640 : index
    %c0_235 = arith.constant 0 : index
    %877 = vector.load %arg1[%c640, %c0_235] : memref<800x128xbf16, #tpu.memory_space<vmem>>, vector<32x32xbf16>
    %878 = arith.truncf %876 : vector<7x32xf32> to vector<7x32xbf16>
    %cst_236 = arith.constant dense<0.000000e+00> : vector<7x32xf32>
    %879 = tpu.matmul %878, %877, %cst_236 {dimension_numbers = #tpu.dot_dimension_numbers<[1], [0], [0], [1], [0, 0, 1, 1], [], []>} : vector<7x32xbf16>, vector<32x32xbf16>, vector<7x32xf32> -> vector<7x32xf32>
    %c35 = arith.constant 35 : index
    %c0_237 = arith.constant 0 : index
    %880 = vector.load %arg2[%c35, %c0_237] : memref<48x128xf32, #tpu.memory_space<vmem>>, vector<1x32xf32>
    %881 = vector.broadcast %880 : vector<1x32xf32> to vector<7x32xf32>
    %882 = arith.addf %879, %881 : vector<7x32xf32>
    %883 = arith.addf %754, %882 : vector<7x32xf32>
    %c36 = arith.constant 36 : index
    %c0_238 = arith.constant 0 : index
    %884 = vector.load %arg2[%c36, %c0_238] : memref<48x128xf32, #tpu.memory_space<vmem>>, vector<1x32xf32>
    %c37 = arith.constant 37 : index
    %c0_239 = arith.constant 0 : index
    %885 = vector.load %arg2[%c37, %c0_239] : memref<48x128xf32, #tpu.memory_space<vmem>>, vector<1x32xf32>
    %cst_240 = arith.constant dense<0.000000e+00> : vector<7xf32>
    %886 = vector.multi_reduction <add>, %883, %cst_240 [1] : vector<7x32xf32> to vector<7xf32>
    %887 = vector.shape_cast %886 : vector<7xf32> to vector<7x1xf32>
    %cst_241 = arith.constant 3.200000e+01 : f32
    %888 = vector.broadcast %cst_241 : f32 to vector<7x1xf32>
    %889 = arith.divf %887, %888 : vector<7x1xf32>
    %890 = vector.broadcast %889 : vector<7x1xf32> to vector<7x32xf32>
    %891 = arith.subf %883, %890 : vector<7x32xf32>
    %892 = arith.mulf %891, %891 : vector<7x32xf32>
    %cst_242 = arith.constant dense<0.000000e+00> : vector<7xf32>
    %893 = vector.multi_reduction <add>, %892, %cst_242 [1] : vector<7x32xf32> to vector<7xf32>
    %894 = vector.shape_cast %893 : vector<7xf32> to vector<7x1xf32>
    %cst_243 = arith.constant 3.200000e+01 : f32
    %895 = vector.broadcast %cst_243 : f32 to vector<7x1xf32>
    %896 = arith.divf %894, %895 : vector<7x1xf32>
    %cst_244 = arith.constant 9.99999997E-7 : f32
    %897 = vector.broadcast %cst_244 : f32 to vector<7x1xf32>
    %898 = arith.addf %896, %897 : vector<7x1xf32>
    %899 = math.rsqrt %898 : vector<7x1xf32>
    %900 = vector.broadcast %899 : vector<7x1xf32> to vector<7x32xf32>
    %901 = arith.mulf %891, %900 : vector<7x32xf32>
    %902 = vector.broadcast %884 : vector<1x32xf32> to vector<7x32xf32>
    %903 = arith.mulf %901, %902 : vector<7x32xf32>
    %904 = vector.broadcast %885 : vector<1x32xf32> to vector<7x32xf32>
    %905 = arith.addf %903, %904 : vector<7x32xf32>
    %c672 = arith.constant 672 : index
    %c0_245 = arith.constant 0 : index
    %906 = vector.load %arg1[%c672, %c0_245] : memref<800x128xbf16, #tpu.memory_space<vmem>>, vector<32x64xbf16>
    %907 = arith.truncf %905 : vector<7x32xf32> to vector<7x32xbf16>
    %cst_246 = arith.constant dense<0.000000e+00> : vector<7x64xf32>
    %908 = tpu.matmul %907, %906, %cst_246 {dimension_numbers = #tpu.dot_dimension_numbers<[1], [0], [0], [1], [0, 0, 1, 1], [], []>} : vector<7x32xbf16>, vector<32x64xbf16>, vector<7x64xf32> -> vector<7x64xf32>
    %c38 = arith.constant 38 : index
    %c0_247 = arith.constant 0 : index
    %909 = vector.load %arg2[%c38, %c0_247] : memref<48x128xf32, #tpu.memory_space<vmem>>, vector<1x64xf32>
    %910 = vector.broadcast %909 : vector<1x64xf32> to vector<7x64xf32>
    %911 = arith.addf %908, %910 : vector<7x64xf32>
    %cst_248 = arith.constant 0.000000e+00 : f32
    %912 = vector.broadcast %cst_248 : f32 to vector<7x64xf32>
    %913 = arith.maximumf %911, %912 : vector<7x64xf32>
    %c704 = arith.constant 704 : index
    %c0_249 = arith.constant 0 : index
    %914 = vector.load %arg1[%c704, %c0_249] : memref<800x128xbf16, #tpu.memory_space<vmem>>, vector<64x32xbf16>
    %915 = arith.truncf %913 : vector<7x64xf32> to vector<7x64xbf16>
    %cst_250 = arith.constant dense<0.000000e+00> : vector<7x32xf32>
    %916 = tpu.matmul %915, %914, %cst_250 {dimension_numbers = #tpu.dot_dimension_numbers<[1], [0], [0], [1], [0, 0, 1, 1], [], []>} : vector<7x64xbf16>, vector<64x32xbf16>, vector<7x32xf32> -> vector<7x32xf32>
    %c39 = arith.constant 39 : index
    %c0_251 = arith.constant 0 : index
    %917 = vector.load %arg2[%c39, %c0_251] : memref<48x128xf32, #tpu.memory_space<vmem>>, vector<1x32xf32>
    %918 = vector.broadcast %917 : vector<1x32xf32> to vector<7x32xf32>
    %919 = arith.addf %916, %918 : vector<7x32xf32>
    %920 = arith.addf %919, %883 : vector<7x32xf32>
    %c42 = arith.constant 42 : index
    %c0_252 = arith.constant 0 : index
    %921 = vector.load %arg2[%c42, %c0_252] : memref<48x128xf32, #tpu.memory_space<vmem>>, vector<1x32xf32>
    %c43 = arith.constant 43 : index
    %c0_253 = arith.constant 0 : index
    %922 = vector.load %arg2[%c43, %c0_253] : memref<48x128xf32, #tpu.memory_space<vmem>>, vector<1x32xf32>
    %cst_254 = arith.constant dense<0.000000e+00> : vector<7xf32>
    %923 = vector.multi_reduction <add>, %920, %cst_254 [1] : vector<7x32xf32> to vector<7xf32>
    %924 = vector.shape_cast %923 : vector<7xf32> to vector<7x1xf32>
    %cst_255 = arith.constant 3.200000e+01 : f32
    %925 = vector.broadcast %cst_255 : f32 to vector<7x1xf32>
    %926 = arith.divf %924, %925 : vector<7x1xf32>
    %927 = vector.broadcast %926 : vector<7x1xf32> to vector<7x32xf32>
    %928 = arith.subf %920, %927 : vector<7x32xf32>
    %929 = arith.mulf %928, %928 : vector<7x32xf32>
    %cst_256 = arith.constant dense<0.000000e+00> : vector<7xf32>
    %930 = vector.multi_reduction <add>, %929, %cst_256 [1] : vector<7x32xf32> to vector<7xf32>
    %931 = vector.shape_cast %930 : vector<7xf32> to vector<7x1xf32>
    %cst_257 = arith.constant 3.200000e+01 : f32
    %932 = vector.broadcast %cst_257 : f32 to vector<7x1xf32>
    %933 = arith.divf %931, %932 : vector<7x1xf32>
    %cst_258 = arith.constant 9.99999997E-7 : f32
    %934 = vector.broadcast %cst_258 : f32 to vector<7x1xf32>
    %935 = arith.addf %933, %934 : vector<7x1xf32>
    %936 = math.rsqrt %935 : vector<7x1xf32>
    %937 = vector.broadcast %936 : vector<7x1xf32> to vector<7x32xf32>
    %938 = arith.mulf %928, %937 : vector<7x32xf32>
    %939 = vector.broadcast %921 : vector<1x32xf32> to vector<7x32xf32>
    %940 = arith.mulf %938, %939 : vector<7x32xf32>
    %941 = vector.broadcast %922 : vector<1x32xf32> to vector<7x32xf32>
    %942 = arith.addf %940, %941 : vector<7x32xf32>
    %c768 = arith.constant 768 : index
    %c0_259 = arith.constant 0 : index
    %943 = vector.load %arg1[%c768, %c0_259] : memref<800x128xbf16, #tpu.memory_space<vmem>>, vector<32x128xbf16>
    %944 = arith.truncf %942 : vector<7x32xf32> to vector<7x32xbf16>
    %cst_260 = arith.constant dense<0.000000e+00> : vector<7x128xf32>
    %945 = tpu.matmul %944, %943, %cst_260 {dimension_numbers = #tpu.dot_dimension_numbers<[1], [0], [0], [1], [0, 0, 1, 1], [], []>} : vector<7x32xbf16>, vector<32x128xbf16>, vector<7x128xf32> -> vector<7x128xf32>
    %c0_261 = arith.constant 0 : index
    %c0_262 = arith.constant 0 : index
    %c0_263 = arith.constant 0 : index
    %946 = vector.load %arg7[%c0_261, %c0_262, %c0_263] : memref<1x7x128xf32, #tpu.memory_space<vmem>>, vector<1x7x128xf32>
    %947 = vector.shape_cast %946 : vector<1x7x128xf32> to vector<7x128xf32>
    %948 = vector.shape_cast %945 : vector<7x128xf32> to vector<1x7x128xf32>
    tpu.vector_store %arg7[%c0_261, %c0_262, %c0_263], %948 {strides = array<i32>} : memref<1x7x128xf32, #tpu.memory_space<vmem>>, vector<1x7x128xf32>,
    %cst_264 = arith.constant 0.000000e+00 : f32
    %949 = vector.broadcast %cst_264 : f32 to vector<7x88xf32>
    %950 = tpu.concatenate %942, %809, %949 in 1 : vector<7x32xf32>, vector<7x8xf32>, vector<7x88xf32> -> vector<7x128xf32>
    %c0_265 = arith.constant 0 : index
    %c0_266 = arith.constant 0 : index
    %c0_267 = arith.constant 0 : index
    %951 = vector.load %arg8[%c0_265, %c0_266, %c0_267] : memref<1x7x128xf32, #tpu.memory_space<vmem>>, vector<1x7x128xf32>
    %952 = vector.shape_cast %951 : vector<1x7x128xf32> to vector<7x128xf32>
    %953 = vector.shape_cast %950 : vector<7x128xf32> to vector<1x7x128xf32>
    tpu.vector_store %arg8[%c0_265, %c0_266, %c0_267], %953 {strides = array<i32>} : memref<1x7x128xf32, #tpu.memory_space<vmem>>, vector<1x7x128xf32>,
    return
  }
  func.func @transform_0(%arg0: i32) -> (i32, i32) {
    %c0_i32 = arith.constant 0 : i32
    %c0_i32_0 = arith.constant 0 : i32
    %c0_i32_1 = arith.constant 0 : i32
    return %c0_i32, %c0_i32_0 : i32, i32
  }
  func.func @transform_1(%arg0: i32) -> (i32, i32) {
    %c0_i32 = arith.constant 0 : i32
    %c0_i32_0 = arith.constant 0 : i32
    %c0_i32_1 = arith.constant 0 : i32
    return %c0_i32, %c0_i32_0 : i32, i32
  }
  func.func @transform_2(%arg0: i32) -> (i32, i32, i32) {
    %c0_i32 = arith.constant 0 : i32
    %c0_i32_0 = arith.constant 0 : i32
    %c0_i32_1 = arith.constant 0 : i32
    return %arg0, %c0_i32, %c0_i32_0 : i32, i32, i32
  }
  func.func @transform_3(%arg0: i32) -> (i32, i32, i32) {
    %c0_i32 = arith.constant 0 : i32
    %c0_i32_0 = arith.constant 0 : i32
    %c0_i32_1 = arith.constant 0 : i32
    return %arg0, %c0_i32, %c0_i32_0 : i32, i32, i32
  }
  func.func @transform_4(%arg0: i32) -> (i32, i32, i32) {
    %c0_i32 = arith.constant 0 : i32
    %c0_i32_0 = arith.constant 0 : i32
    %c0_i32_1 = arith.constant 0 : i32
    return %arg0, %c0_i32, %c0_i32_0 : i32, i32, i32
  }
  func.func @transform_5(%arg0: i32) -> (i32, i32, i32) {
    %c0_i32 = arith.constant 0 : i32
    %c0_i32_0 = arith.constant 0 : i32
    %c0_i32_1 = arith.constant 0 : i32
    return %arg0, %c0_i32, %c0_i32_0 : i32, i32, i32
  }
  func.func @transform_6(%arg0: i32) -> (i32, i32, i32) {
    %c0_i32 = arith.constant 0 : i32
    %c0_i32_0 = arith.constant 0 : i32
    %c0_i32_1 = arith.constant 0 : i32
    return %arg0, %c0_i32, %c0_i32_0 : i32, i32, i32
  }
  func.func @transform_7(%arg0: i32) -> (i32, i32, i32) {
    %c0_i32 = arith.constant 0 : i32
    %c0_i32_0 = arith.constant 0 : i32
    %c0_i32_1 = arith.constant 0 : i32
    return %arg0, %c0_i32, %c0_i32_0 : i32, i32, i32
  }
}

</mosaic_0001>

<bundles_post_ra>
// kernel: transformer_forward.1
= control target key start
LH: loop header
LB: loop body
LE: loop exit
PB: predicated region body
PF: predicated region fallthrough
CT: control target
= control target key end

     0   :  { %s6160_s24 = smov 0   ;;  %s7177_s0 = inlined_call_operand.vmem [shape: bf16[800,128], index: 0, kind: input, shape index: {}]   ;;  %s7178_s1 = inlined_call_operand.vmem [shape: f32[48,128], index: 1, kind: input, shape index: {}]   ;;  %s7179_s2 = inlined_call_operand.vmem [shape: f32[2,8,32], index: 2, kind: input, shape index: {}]   ;;  %s7180_s3 = inlined_call_operand.vmem [shape: f32[2,7,32], index: 3, kind: input, shape index: {}]   ;;  %s7181_s4 = inlined_call_operand.vmem [shape: f32[2,1,8], index: 4, kind: input, shape index: {}]   ;;  %s7182_s5 = inlined_call_operand.vmem [shape: f32[2,7,7], index: 5, kind: input, shape index: {}]   ;;  %s7183_s6 = inlined_call_operand.vmem [shape: f32[2,7,128], index: 6, kind: output, shape index: {0}]   ;;  %s7184_s7 = inlined_call_operand.vmem [shape: f32[2,7,128], index: 7, kind: output, shape index: {1}]  }
   0x1 LB: > { %s5056_s25 = sadd.s32 4294967295, %s6100_s24   ;;  %p5060_p0 = scmp.ge.s32.totalorder %s6100_s24, 1  ;;  %s6100_s24 = sphi %s6160_s24, %s18_s24  }
   0x2   : > { %p265_p1 = scmp.lt.s32.totalorder %s6100_s24, 3 }
   0x4   : > { %p266_p2 = pnand %p5060_p0, %p265_p1 }
   0x5   : > { %p310_p3 = scmp.lt.s32.totalorder (!%p266_p2), %s5056_s25, 1  ;;  %vm338_vm0 = vcmask (!%p266_p2), 261120   ;;  %v5921_v7 = vld [vmem:[%s7177_s0] sm:$0xff] (!%p266_p2)   ;;  %v6102_v8 = vmov (!%p266_p2), 0.0   ;;  %vm6103_vm1 = vmmov (!%p266_p2), 0   ;;  %v5922_v9 = vld [vmem:[%s7177_s0 + $0x8] sm:$0xff] (!%p266_p2)  }
   0x6   : > { %269 = sbr.rel (%p266_p2) target bundleno = 13460 (0x3494), region = 44  ;;  %5407 = vmatprep.subr.bf16.mxu0 (!%p266_p2), %v6102_v8  ;;  %5411 = vmatprep.mubr.msk.bf16.mxu0 (!%p266_p2), %vm6103_vm1, %v6102_v8  ;;  %v5066_v14 = vld [vmem:[%s7178_s1] ss:$0 sm:$0xff] (!%p266_p2)  ;;  %v5067_v16 = vld [vmem:[%s7178_s1 + $0x1] ss:$0 sm:$0xff] (!%p266_p2)  ;;  %s6104_s17 = smov (!%p266_p2), 120  }
   0x7   : > { %5408 = vmatpush3.bf16.msra.mxu0 (!%p266_p2), %v5921_v7  ;;  %5415 = vmatprep.subr.bf16.mxu1 (!%p266_p2), %v6102_v8  ;;  %v5068_v20 = vld [vmem:[%s7178_s1 + $0x2] ss:$0 sm:$0xff] (!%p266_p2)  ;;  %s6105_s18 = smov (!%p266_p2), 96   ;;  %s6106_s19 = smov (!%p266_p2), 88   ;;  %vm438_vm2 = vcmask (!%p266_p2), 64512   ;;  %vm502_vm3 = vcmask (!%p266_p2), 1043456  }
   0x8   : > { %5409 = vmatprep.subr.bf16.mxu0 (!%p266_p2), %v6102_v8  ;;  %5417 = vmatprep.mubr.msk.bf16.mxu1 (!%p266_p2), %vm6103_vm1, %v6102_v8  ;;  %s6107_s20 = smov (!%p266_p2), 80   ;;  %s6108_s21 = smov (!%p266_p2), 112   ;;  %vm889_vm4 = vcmask (!%p266_p2), 130048   ;;  %vm891_vm5 = vcmask (!%p266_p2), 195584   ;;  %vm1088_vm6 = vcmask (!%p266_p2), 523264   ;;  %vm1946_vm7 = vcmask (!%p266_p2), 260096  }
   0x9   : > { %s6109_s22 = smov (!%p266_p2), 72   ;;  %s6110_s23 = smov (!%p266_p2), 104   ;;  %vm2085_vm8 = vcmask (!%p266_p2), 55296   ;;  %vm2104_vm9 = vcmask (!%p266_p2), 1042432   ;;  %vm2100_vm10 = vcmask (!%p266_p2), 56320   ;;  %vm2753_vm11 = vcmask (!%p266_p2), 63488  }
   0xa   : > { %s7195_s30 = smov (!%p266_p2), 56   ;;  %s7193_s8 = smov (!%p266_p2), 48   ;;  %vm4936_vm12 = vcmask (!%p266_p2), 326656  }
   0xb   : > { %5410 = vmatpush3.bf16.msra.mxu0 (!%p266_p2), %v5922_v9  ;;  %s7191_s9 = smov (!%p266_p2), 40   ;;  %s7189_s10 = smov (!%p266_p2), 8  }
   0xc   : > { %5421 = vmatprep.subr.bf16.mxu0 (!%p266_p2), %v6102_v8  ;;  %s7187_s15 = smov (!%p266_p2), 16   ;;  %s7185_s16 = smov (!%p266_p2), 24  }
   0xd   : > { %s7204_s25 = smov (!%p310_p3, %s5056_s25), 1  ;;  %s7196_s13 = smov 16  }
   0xe   : > { %s6171_s26 = sshll.u32 %s7204_s25, 3  ;;  %s7197_s14 = smov 24  }
   0xf   : > { %s313_s29 = scalar_lea.vmem %s7179_s2, %s6171_s26  ;;  %s317_s27 = scalar_lea.vmem %s7180_s3, %s6171_s26 }
  0x10   : > { %v6177_v0 = vld [vmem:[%s313_s29] sm:$0xff]  ;;  %s6250_s29 = scalar_lea.vmem %s7181_s4, %s7204_s25  ;;  %s7194_s25 = smov 64  }
  0x11   : > { %v339_v1 = vsel %vm338_vm0, %v6177_v0, 0.0  ;;  %v6253_v38 = vld [vmem:[%s6250_s29] ss:$0 sm:$0xff]  ;;  %s6602_s28 = scalar_lea.vmem %s7182_s5, %s6171_s26  ;;  %s7198_s11 = smov 40  }
  0x12   : > { %340 = vadd.xlane.f32.xlu0 %v339_v1  ;;  %s7199_s12 = smov 8  }
  0x9f   : > { %v341_v2 = vpop.xlane.xlu0 %340 }
  0xa0   : > { %v343_v3 = vmul.f32 0.03125, %v341_v2 }
  0xa2   : > { %v344_v4 = vsub.f32 %v6177_v0, %v343_v3 }
  0xa4   : > { %v345_v5 = vmul.f32 %v344_v4, %v344_v4 }
  0xa6   : > { %v346_v6 = vsel %vm338_vm0, %v345_v5, 0.0 }
  0xa7   : > { %347 = vadd.xlane.f32.xlu0 %v346_v6 }
 0x134   : > { %v348_v10 = vpop.xlane.xlu0 %347 }
 0x135   : > { %v349_v11 = vmul.f32 0.03125, %v348_v10 }
 0x137   : > { %v350_v12 = vadd.f32 1e-06, %v349_v11 }
 0x139   : > { %5971 = vrsqrt.f32 %v350_v12 }
 0x143   : > { %v5972_v13 = vpop.eup %5971 }
 0x144   : > { %v352_v15 = vmul.f32 %v5972_v13, %v344_v4 }
 0x146   : > { %v357_v17 = vmul.f32 %v5066_v14, %v352_v15 }
 0x148   : > { %v362_v18 = vadd.f32 %v5067_v16, %v357_v17 }
 0x14a   : > { %v367_v19 = vpack.c.bf16 %v362_v18, %v362_v18 }
 0x14c   : > { %5412 = vmatmul.mubr.msk.bf16.vlgmr.msra.gmra.mrb[0].mxu0 %vm338_vm0, %v367_v19 }
 0x14d   : > { %5423 = vmatprep.mubr.msk.bf16.mxu0 %vm6103_vm1, %v6102_v8 }
 0x21f   : > { %v422_v21 = vpop.f32.mrb[0].mxu0 }
 0x220   : > { %v423_v22 = vadd.f32 %v5068_v20, %v422_v21  ;;  %v5413_v23 = vpop.f32.mrb[1].mxu0 }
 0x221   : > { %v425_v24 = vpop.f32.mrb[2].mxu0 }
 0x222   : > { %v6209_v25 = vpack.c.bf16 %v423_v22, %v423_v22  ;;  %v5414_v26 = vpop.f32.mrb[3].mxu0 }
 0x224   : > { %546 = vrot.lane.b32.xlu0 %v6209_v25, %s6104_s17  ;;  %436 = vrot.lane.b32.xlu1 %v6209_v25, %s6105_s18 }
 0x228   : > { %548 = vrot.lane.b32.xlu1 %v6209_v25, %s6106_s19 }
 0x22c   : > { %658 = vrot.lane.b32.xlu1 %v6209_v25, %s6107_s20 }
 0x230   : > { %656 = vrot.lane.b32.xlu1 %v6209_v25, %s6108_s21 }
 0x234   : > { %768 = vrot.lane.b32.xlu1 %v6209_v25, %s6109_s22 }
 0x238   : > { %766 = vrot.lane.b32.xlu1 %v6209_v25, %s6110_s23 }
 0x296   : > { %v437_v27 = vpop.permute.xlu1 %436  ;;  %v547_v32 = vpop.permute.xlu0 %546 }
 0x297   : > { %v443_v28 = vsel %vm438_vm2, %v437_v27, 0 }
 0x298   : > { %5416 = vmatpush3.bf16.xpose.msra.mxu1 %v443_v28 }
 0x299   : > { %5427 = vmatprep.subr.bf16.mxu1 %v6102_v8 }
 0x29a   : > { %v549_v29 = vpop.permute.xlu1 %548 }
 0x29b   : > { %v554_v30 = vsel %vm438_vm2, %v549_v29, 0 }
 0x29e   : > { %v659_v31 = vpop.permute.xlu1 %658 }
 0x29f   : > { %5418 = vmatmul.mubr.msk.bf16.vlgmr.msra.gmra.mrb[0].mxu1 %vm438_vm2, %v6209_v25  ;;  %v664_v34 = vsel %vm438_vm2, %v659_v31, 0 }
 0x2a0   : > { %5428 = vmatpush3.bf16.xpose.msra.mxu1 %v554_v30  ;;  %5429 = vmatprep.mubr.msk.bf16.mxu1 %vm6103_vm1, %v6102_v8 }
 0x2a1   : > { %5439 = vmatprep.subr.bf16.mxu1 %v6102_v8 }
 0x2a2   : > { %v657_v33 = vpop.permute.xlu1 %656 }
 0x2a6   : > { %v769_v35 = vpop.permute.xlu1 %768 }
 0x2a7   : > { %5430 = vmatmul.mubr.msk.bf16.vlgmr.msra.gmra.mrb[4].mxu1 %vm438_vm2, %v547_v32  ;;  %v774_v36 = vsel %vm438_vm2, %v769_v35, 0 }
 0x2a8   : > { %5440 = vmatpush3.bf16.xpose.msra.mxu1 %v664_v34  ;;  %5441 = vmatprep.mubr.msk.bf16.mxu1 %vm6103_vm1, %v6102_v8 }
 0x2a9   : > { %5451 = vmatprep.subr.bf16.mxu1 %v6102_v8 }
 0x2aa   : > { %v767_v37 = vpop.permute.xlu1 %766 }
 0x2af   : > { %5442 = vmatmul.mubr.msk.bf16.vlgmr.msra.gmra.mrb[8].mxu1 %vm438_vm2, %v657_v33 }
 0x2b0   : > { %5452 = vmatpush3.bf16.xpose.msra.mxu1 %v774_v36  ;;  %5453 = vmatprep.mubr.msk.bf16.mxu1 %vm6103_vm1, %v6102_v8 }
 0x2b1   : > { %5463 = vmatprep.subr.bf16.mxu1 %v6102_v8 }
 0x2b7   : > { %5454 = vmatmul.mubr.msk.bf16.vlgmr.msra.gmra.mrb[12].mxu1 %vm438_vm2, %v767_v37 }
 0x2b8   : > { %5467 = vmatprep.mubr.msk.bf16.mxu1 %vm6103_vm1, %v6102_v8 }
 0x372   : > { %v479_v39 = vpop.f32.mrb[0].mxu1 }
 0x373   : > { %v480_v40 = vadd.f32 %v6253_v38, %v479_v39  ;;  %v5419_v41 = vpop.f32.mrb[1].mxu1 }
 0x374   : > { %v482_v42 = vpop.f32.mrb[2].mxu1 }
 0x375   : > { %v5420_v43 = vpop.f32.mrb[3].mxu1  ;;  %v485_v44 = vsel %vm438_vm2, %v480_v40, -inf }
 0x376   : > { %486 = vmax.xlane.f32.xlu1 %v485_v44 }
 0x37a   : > { %v590_v45 = vpop.f32.mrb[4].mxu1 }
 0x37b   : > { %v591_v46 = vadd.f32 %v6253_v38, %v590_v45  ;;  %v5431_v47 = vpop.f32.mrb[5].mxu1 }
 0x37c   : > { %v593_v48 = vpop.f32.mrb[6].mxu1 }
 0x37d   : > { %v5432_v49 = vpop.f32.mrb[7].mxu1  ;;  %v596_v50 = vsel %vm438_vm2, %v591_v46, -inf }
 0x37e   : > { %597 = vmax.xlane.f32.xlu0 %v596_v50 }
 0x382   : > { %v700_v51 = vpop.f32.mrb[8].mxu1 }
 0x383   : > { %v701_v52 = vadd.f32 %v6253_v38, %v700_v51  ;;  %v5443_v53 = vpop.f32.mrb[9].mxu1 }
 0x384   : > { %v703_v54 = vpop.f32.mrb[10].mxu1 }
 0x385   : > { %v5444_v55 = vpop.f32.mrb[11].mxu1  ;;  %v706_v56 = vsel %vm438_vm2, %v701_v52, -inf  ;;  %v5923_v54 = vld [vmem:[%s7177_s0 + $0x10] sm:$0xff]  }
 0x386   : > { %707 = vmax.xlane.f32.xlu1 %v706_v56  ;;  %5464 = vmatpush3.bf16.msra.mxu1 %v5923_v54  ;;  %v5924_v55 = vld [vmem:[%s7177_s0 + $0x18] sm:$0xff]  }
 0x387   : > { %5465 = vmatprep.subr.bf16.mxu1 %v6102_v8 }
 0x38a   : > { %v810_v57 = vpop.f32.mrb[12].mxu1  ;;  %5466 = vmatpush3.bf16.msra.mxu1 %v5924_v55 }
 0x38b   : > { %v811_v58 = vadd.f32 %v6253_v38, %v810_v57  ;;  %v5455_v59 = vpop.f32.mrb[13].mxu1  ;;  %5479 = vmatprep.subr.bf16.mxu1 %v6102_v8 }
 0x38c   : > { %v813_v60 = vpop.f32.mrb[14].mxu1 }
 0x38d   : > { %v5456_v61 = vpop.f32.mrb[15].mxu1  ;;  %v816_v62 = vsel %vm438_vm2, %v811_v58, -inf }
 0x38e   : > { %817 = vmax.xlane.f32.xlu0 %v816_v62 }
 0x403   : > { %v487_v63 = vpop.xlane.xlu1 %486 }
 0x404   : > { %v488_v1 = vsub.f32 %v480_v40, %v487_v63 }
 0x406   : > { %v489_v2 = vmul.f32 1.442695, %v488_v1 }
 0x408   : > { %5973 = vpow2.f32 %v489_v2 }
 0x40b   : > { %v598_v3 = vpop.xlane.xlu0 %597 }
 0x40c   : > { %v599_v4 = vsub.f32 %v591_v46, %v598_v3 }
 0x40e   : > { %v600_v5 = vmul.f32 1.442695, %v599_v4 }
 0x410   : > { %5975 = vpow2.f32 %v600_v5 }
 0x412   : > { %v5974_v6 = vpop.eup %5973 }
 0x413   : > { %v491_v7 = vsel %vm438_vm2, %v5974_v6, 0.0  ;;  %v708_v16 = vpop.xlane.xlu1 %707 }
 0x414   : > { %492 = vadd.xlane.f32.xlu1 %v491_v7  ;;  %v709_v17 = vsub.f32 %v701_v52, %v708_v16 }
 0x416   : > { %v710_v18 = vmul.f32 1.442695, %v709_v17 }
 0x41a   : > { %v5976_v9 = vpop.eup %5975 }
 0x41b   : > { %v818_v10 = vpop.xlane.xlu0 %817  ;;  %v602_v11 = vsel %vm438_vm2, %v5976_v9, 0.0 }
 0x41c   : > { %v819_v12 = vsub.f32 %v811_v58, %v818_v10  ;;  %603 = vadd.xlane.f32.xlu0 %v602_v11 }
 0x41e   : > { %v820_v13 = vmul.f32 1.442695, %v819_v12 }
 0x420   : > { %5977 = vpow2.f32 %v820_v13 }
 0x421   : > { %5979 = vpow2.f32 %v710_v18 }
 0x425   : > { %497 = vrot.lane.b32.xlu1 %v6209_v25, %s7194_s25 }
 0x42a   : > { %v5978_v14 = vpop.eup %5977 }
 0x42b   : > { %v822_v15 = vsel %vm438_vm2, %v5978_v14, 0.0  ;;  %v5980_v19 = vpop.eup %5979 }
 0x42c   : > { %823 = vadd.xlane.f32.xlu0 %v822_v15  ;;  %v712_v20 = vsel %vm438_vm2, %v5980_v19, 0.0 }
 0x442   : > { %608 = vrot.lane.b32.xlu0 %v6209_v25, %s7195_s30 }
 0x449   : > { %713 = vadd.xlane.f32.xlu1 %v712_v20 }
 0x45a   : > { %718 = vrot.lane.b32.xlu1 %v6209_v25, %s7193_s8 }
 0x45e   : > { %828 = vrot.lane.b32.xlu1 %v6209_v25, %s7191_s9 }
 0x4a1   : > { %v493_v21 = vpop.xlane.xlu1 %492 }
 0x4a2   : > { %5981 = vrcp.f32 %v493_v21 }
 0x4a5   : > { %v498_v22 = vpop.permute.xlu1 %497 }
 0x4a6   : > { %v504_v23 = vsel %vm502_vm3, %v498_v22, 0  ;;  %v5925_v22 = vld [vmem:[%s7177_s0 + $0x20] sm:$0xff]  }
 0x4a7   : > { %5422 = vmatpush3.bf16.msra.mxu0 %v504_v23  ;;  %v5927_v23 = vld [vmem:[%s7177_s0 + $0x30] sm:$0xff]  }
 0x4a8   : > { %5433 = vmatprep.subr.bf16.mxu0 %v6102_v8 }
 0x4a9   : > { %v604_v26 = vpop.xlane.xlu0 %603 }
 0x4aa   : > { %5983 = vrcp.f32 %v604_v26 }
 0x4ac   : > { %v5982_v24 = vpop.eup %5981 }
 0x4ad   : > { %v495_v27 = vmul.f32 %v5982_v24, %v5974_v6  ;;  %v5928_v24 = vld [vmem:[%s7177_s0 + $0x38] sm:$0xff]  }
 0x4af   : > { %v496_v28 = vpack.c.bf16 %v495_v27, %v495_v27 }
 0x4b1   : > { %5424 = vmatmul.mubr.msk.bf16.vlgmr.msra.gmra.mrb[4].mxu0 %vm438_vm2, %v496_v28 }
 0x4b2   : > { %5435 = vmatprep.mubr.msk.bf16.mxu0 %vm6103_vm1, %v6102_v8 }
 0x4b4   : > { %v5984_v25 = vpop.eup %5983 }
 0x4b5   : > { %v606_v30 = vmul.f32 %v5984_v25, %v5976_v9  ;;  %v5081_v9 = vld [vmem:[%s7178_s1 + $0x3] ss:$0 sm:$0xff] }
 0x4b7   : > { %v607_v33 = vpack.c.bf16 %v606_v30, %v606_v30 }
 0x4b9   : > { %v824_v29 = vpop.xlane.xlu0 %823 }
 0x4bd   : > { %v609_v31 = vpop.permute.xlu0 %608 }
 0x4be   : > { %v614_v32 = vsel %vm502_vm3, %v609_v31, 0  ;;  %v5086_v31 = vld [vmem:[%s7178_s1 + $0x5] ss:$0 sm:$0xff] }
 0x4bf   : > { %5434 = vmatpush3.bf16.msra.mxu0 %v614_v32 }
 0x4c0   : > { %5445 = vmatprep.subr.bf16.mxu0 %v6102_v8 }
 0x4c2   : > { %5436 = vmatmul.mubr.msk.bf16.vlgmr.msra.gmra.mrb[8].mxu0 %vm438_vm2, %v607_v33 }
 0x4c3   : > { %5447 = vmatprep.mubr.msk.bf16.mxu0 %vm6103_vm1, %v6102_v8 }
 0x4d6   : > { %v714_v34 = vpop.xlane.xlu1 %713 }
 0x4d7   : > { %5985 = vrcp.f32 %v714_v34 }
 0x4d8   : > { %5987 = vrcp.f32 %v824_v29  ;;  %v5085_v29 = vld [vmem:[%s7178_s1 + $0x4] ss:$0 sm:$0xff] }
 0x4da   : > { %v719_v35 = vpop.permute.xlu1 %718 }
 0x4db   : > { %v724_v36 = vsel %vm502_vm3, %v719_v35, 0  ;;  %v5929_v35 = vld [vmem:[%s7177_s0 + $0x40] sm:$0xff]  }
 0x4dc   : > { %5446 = vmatpush3.bf16.msra.mxu0 %v724_v36  ;;  %v5930_v36 = vld [vmem:[%s7177_s0 + $0x48] sm:$0xff]  }
 0x4dd   : > { %5457 = vmatprep.subr.bf16.mxu0 %v6102_v8 }
 0x4de   : > { %v829_v40 = vpop.permute.xlu1 %828 }
 0x4df   : > { %v834_v43 = vsel %vm502_vm3, %v829_v40, 0 }
 0x4e1   : > { %v5986_v37 = vpop.eup %5985 }
 0x4e2   : > { %v716_v39 = vmul.f32 %v5986_v37, %v5980_v19  ;;  %v5988_v42 = vpop.eup %5987  ;;  %v5087_v37 = vld [vmem:[%s7178_s1 + $0x6] ss:$0 sm:$0xff] }
 0x4e3   : > { %v826_v44 = vmul.f32 %v5988_v42, %v5978_v14 }
 0x4e4   : > { %v717_v41 = vpack.c.bf16 %v716_v39, %v716_v39 }
 0x4e5   : > { %v827_v45 = vpack.c.bf16 %v826_v44, %v826_v44 }
 0x4e6   : > { %5448 = vmatmul.mubr.msk.bf16.vlgmr.msra.gmra.mrb[12].mxu0 %vm438_vm2, %v717_v41 }
 0x4e7   : > { %5458 = vmatpush3.bf16.msra.mxu0 %v834_v43  ;;  %5459 = vmatprep.mubr.msk.bf16.mxu0 %vm6103_vm1, %v6102_v8 }
 0x4e8   : > { %5471 = vmatprep.subr.bf16.mxu0 %v6102_v8 }
 0x4ee   : > { %5460 = vmatmul.mubr.msk.bf16.vlgmr.msra.gmra.mrb[16].mxu0 %vm438_vm2, %v827_v45 }
 0x4ef   : > { %5475 = vmatprep.mubr.msk.bf16.mxu0 %vm6103_vm1, %v6102_v8  ;;  %5472 = vmatpush3.bf16.msra.mxu0 %v5925_v22 }
 0x4f0   : > { %5473 = vmatprep.subr.bf16.mxu0 %v6102_v8 }
 0x584   : > { %v540_v46 = vpop.f32.mrb[4].mxu0 }
 0x585   : > { %v5425_v47 = vpop.f32.mrb[5].mxu0 }
 0x586   : > { %v543_v48 = vpop.f32.mrb[6].mxu0 }
 0x587   : > { %v5426_v49 = vpop.f32.mrb[7].mxu0 }
 0x595   : > { %v650_v50 = vpop.f32.mrb[8].mxu0 }
 0x596   : > { %877 = vrot.lane.b32.xlu0 %v650_v50, %s7189_s10  ;;  %v5437_v51 = vpop.f32.mrb[9].mxu0 }
 0x597   : > { %v653_v52 = vpop.f32.mrb[10].mxu0 }
 0x598   : > { %v5438_v53 = vpop.f32.mrb[11].mxu0 }
 0x5b9   : > { %v760_v56 = vpop.f32.mrb[12].mxu0 }
 0x5ba   : > { %881 = vrot.lane.b32.xlu1 %v760_v56, %s7187_s15  ;;  %v5449_v57 = vpop.f32.mrb[13].mxu0  ;;  %s332_s15 = scalar_lea.vmem %s7184_s7, %s6171_s26 }
 0x5bb   : > { %v763_v58 = vpop.f32.mrb[14].mxu0 }
 0x5bc   : > { %v5450_v59 = vpop.f32.mrb[15].mxu0 }
 0x5bd   : > { %v5931_v59 = vld [vmem:[%s7177_s0 + $0x50] sm:$0xff]  }
 0x5c1   : > { %v870_v60 = vpop.f32.mrb[16].mxu0 }
 0x5c2   : > { %885 = vrot.lane.b32.xlu0 %v870_v60, %s7185_s16  ;;  %v5461_v61 = vpop.f32.mrb[17].mxu0  ;;  %v5932_v60 = vld [vmem:[%s7177_s0 + $0x58] sm:$0xff]   ;;  %s7201_s16 = smov 64  }
 0x5c3   : > { %v873_v62 = vpop.f32.mrb[18].mxu0 }
 0x5c4   : > { %v5462_v63 = vpop.f32.mrb[19].mxu0 }
 0x608   : > { %v878_v1 = vpop.permute.xlu0 %877 }
 0x609   : > { %v888_v3 = vsel %vm438_vm2, %v540_v46, %v878_v1  ;;  %v5091_v46 = vld [vmem:[%s7178_s1 + $0x7] ss:$0 sm:$0xff] }
 0x62c   : > { %v882_v2 = vpop.permute.xlu1 %881 }
 0x62d   : > { %v890_v4 = vsel %vm889_vm4, %v888_v3, %v882_v2  ;;  %v5097_v2 = vld [vmem:[%s7178_s1 + $0x8] ss:$0 sm:$0xff] }
 0x634   : > { %v886_v5 = vpop.permute.xlu0 %885 }
 0x635   : > { %v892_v6 = vsel %vm891_vm5, %v890_v4, %v886_v5  ;;  %v5098_v4 = vld [vmem:[%s7178_s1 + $0x9] ss:$0 sm:$0xff] }
 0x636   : > { %v897_v7 = vpack.c.bf16 %v892_v6, %v892_v6 }
 0x638   : > { %5468 = vmatmul.mubr.msk.bf16.vlgmr.msra.gmra.mrb[16].mxu1 %vm338_vm0, %v897_v7 }
 0x639   : > { %5487 = vmatprep.mubr.msk.bf16.mxu1 %vm6103_vm1, %v6102_v8  ;;  %5480 = vmatpush3.bf16.msra.mxu1 %v5927_v23 }
 0x63a   : > { %5481 = vmatprep.subr.bf16.mxu1 %v6102_v8 }
 0x63d   : > { %5482 = vmatpush3.bf16.msra.mxu1 %v5928_v24 }
 0x63e   : > { %5483 = vmatprep.subr.bf16.mxu1 %v6102_v8 }
 0x641   : > { %5484 = vmatpush3.bf16.msra.mxu1 %v5929_v35 }
 0x642   : > { %5485 = vmatprep.subr.bf16.mxu1 %v6102_v8 }
 0x645   : > { %5486 = vmatpush3.bf16.msra.mxu1 %v5930_v36 }
 0x646   : > { %5505 = vmatprep.subr.bf16.mxu1 %v6102_v8 }
 0x70b   : > { %v952_v10 = vpop.f32.mrb[16].mxu1 }
 0x70c   : > { %v953_v11 = vadd.f32 %v5081_v9, %v952_v10  ;;  %v5469_v12 = vpop.f32.mrb[17].mxu1  ;;  %v5099_v9 = vld [vmem:[%s7178_s1 + $0xa] ss:$0 sm:$0xff] }
 0x70d   : > { %v955_v13 = vpop.f32.mrb[18].mxu1 }
 0x70e   : > { %v958_v14 = vadd.f32 %v953_v11, %v6177_v0  ;;  %v5470_v15 = vpop.f32.mrb[19].mxu1  ;;  %v5926_v0 = vld [vmem:[%s7177_s0 + $0x28] sm:$0xff]  }
 0x70f   : > { %5474 = vmatpush3.bf16.msra.mxu0 %v5926_v0 }
 0x710   : > { %v961_v16 = vsel %vm338_vm0, %v958_v14, 0.0  ;;  %5491 = vmatprep.subr.bf16.mxu0 %v6102_v8 }
 0x711   : > { %962 = vadd.xlane.f32.xlu1 %v961_v16 }
 0x79e   : > { %v963_v17 = vpop.xlane.xlu1 %962 }
 0x79f   : > { %v964_v18 = vmul.f32 0.03125, %v963_v17 }
 0x7a1   : > { %v965_v19 = vsub.f32 %v958_v14, %v964_v18 }
 0x7a3   : > { %v966_v20 = vmul.f32 %v965_v19, %v965_v19 }
 0x7a5   : > { %v967_v21 = vsel %vm338_vm0, %v966_v20, 0.0 }
 0x7a6   : > { %968 = vadd.xlane.f32.xlu0 %v967_v21 }
 0x833   : > { %v969_v26 = vpop.xlane.xlu0 %968 }
 0x834   : > { %v970_v27 = vmul.f32 0.03125, %v969_v26 }
 0x836   : > { %v971_v28 = vadd.f32 1e-06, %v970_v27 }
 0x838   : > { %5989 = vrsqrt.f32 %v971_v28 }
 0x842   : > { %v5990_v25 = vpop.eup %5989 }
 0x843   : > { %v973_v30 = vmul.f32 %v5990_v25, %v965_v19 }
 0x845   : > { %v978_v32 = vmul.f32 %v5085_v29, %v973_v30 }
 0x847   : > { %v983_v33 = vadd.f32 %v5086_v31, %v978_v32 }
 0x849   : > { %v988_v34 = vpack.c.bf16 %v983_v33, %v983_v33 }
 0x84b   : > { %5476 = vmatmul.mubr.msk.bf16.vlgmr.msra.gmra.mrb[20].mxu0 %vm338_vm0, %v988_v34 }
 0x84c   : > { %5495 = vmatprep.mubr.msk.bf16.mxu0 %vm6103_vm1, %v6102_v8  ;;  %5492 = vmatpush3.bf16.msra.mxu0 %v5931_v59 }
 0x84d   : > { %5493 = vmatprep.subr.bf16.mxu0 %v6102_v8 }
 0x850   : > { %5494 = vmatpush3.bf16.msra.mxu0 %v5932_v60 }
 0x851   : > { %5499 = vmatprep.subr.bf16.mxu0 %v6102_v8 }
 0x91e   : > { %v1043_v39 = vpop.f32.mrb[20].mxu0 }
 0x91f   : > { %v1044_v40 = vadd.f32 %v5087_v37, %v1043_v39  ;;  %v5477_v41 = vpop.f32.mrb[21].mxu0 }
 0x920   : > { %v1046_v42 = vpop.f32.mrb[22].mxu0 }
 0x921   : > { %v1049_v43 = vmax.f32 %v1044_v40, 0.0  ;;  %v5478_v44 = vpop.f32.mrb[23].mxu0 }
 0x923   : > { %v1058_v45 = vpack.c.bf16 %v1049_v43, %v1049_v43 }
 0x925   : > { %5488 = vmatmul.mubr.msk.bf16.vlgmr.msra.gmra.mrb[20].mxu1 %vm1088_vm6, %v1058_v45 }
 0x926   : > { %5507 = vmatprep.mubr.msk.bf16.mxu1 %vm6103_vm1, %v6102_v8 }
 0x9f8   : > { %v1126_v47 = vpop.f32.mrb[20].mxu1 }
 0x9f9   : > { %v1127_v48 = vadd.f32 %v5091_v46, %v1126_v47  ;;  %v5489_v49 = vpop.f32.mrb[21].mxu1 }
 0x9fa   : > { %v1129_v50 = vpop.f32.mrb[22].mxu1 }
 0x9fb   : > { %v6360_v51 = vadd.f32 %v1127_v48, %v958_v14  ;;  %v5490_v52 = vpop.f32.mrb[23].mxu1 }
 0x9fd   : > { %v1135_v53 = vsel %vm338_vm0, %v6360_v51, 0.0 }
 0x9fe   : > { %1136 = vadd.xlane.f32.xlu0 %v1135_v53 }
 0xa8b   : > { %v1137_v54 = vpop.xlane.xlu0 %1136 }
 0xa8c   : > { %v1138_v55 = vmul.f32 0.03125, %v1137_v54 }
 0xa8e   : > { %v1139_v56 = vsub.f32 %v6360_v51, %v1138_v55 }
 0xa90   : > { %v1140_v57 = vmul.f32 %v1139_v56, %v1139_v56 }
 0xa92   : > { %v1141_v58 = vsel %vm338_vm0, %v1140_v57, 0.0 }
 0xa93   : > { %1142 = vadd.xlane.f32.xlu1 %v1141_v58 }
 0xb20   : > { %v1143_v61 = vpop.xlane.xlu1 %1142 }
 0xb21   : > { %v1144_v62 = vmul.f32 0.03125, %v1143_v61 }
 0xb23   : > { %v1145_v63 = vadd.f32 1e-06, %v1144_v62 }
 0xb25   : > { %5991 = vrsqrt.f32 %v1145_v63 }
 0xb2f   : > { %v5992_v1 = vpop.eup %5991 }
 0xb30   : > { %v1147_v3 = vmul.f32 %v5992_v1, %v1139_v56 }
 0xb32   : > { %v1152_v5 = vmul.f32 %v5097_v2, %v1147_v3 }
 0xb34   : > { %v1157_v6 = vadd.f32 %v5098_v4, %v1152_v5 }
 0xb36   : > { %v1162_v7 = vpack.c.bf16 %v1157_v6, %v1157_v6 }
 0xb38   : > { %5496 = vmatmul.mubr.msk.bf16.vlgmr.msra.gmra.mrb[24].mxu0 %vm338_vm0, %v1162_v7 }
 0xb39   : > { %5501 = vmatprep.mubr.msk.bf16.mxu0 %vm6103_vm1, %v6102_v8 }
 0xc0b   : > { %v1217_v10 = vpop.f32.mrb[24].mxu0 }
 0xc0c   : > { %v1218_v11 = vadd.f32 %v5099_v9, %v1217_v10  ;;  %v5497_v12 = vpop.f32.mrb[25].mxu0 }
 0xc0d   : > { %v1220_v13 = vpop.f32.mrb[26].mxu0 }
 0xc0e   : > { %v6386_v14 = vpack.c.bf16 %v1218_v11, %v1218_v11  ;;  %v5498_v15 = vpop.f32.mrb[27].mxu0 }
 0xc10   : > { %1335 = vrot.lane.b32.xlu1 %v6386_v14, %s6106_s19  ;;  %1225 = vrot.lane.b32.xlu0 %v6386_v14, %s6105_s18 }
 0xc14   : > { %1333 = vrot.lane.b32.xlu1 %v6386_v14, %s6104_s17  ;;  %1445 = vrot.lane.b32.xlu0 %v6386_v14, %s6107_s20 }
 0xc18   : > { %1443 = vrot.lane.b32.xlu1 %v6386_v14, %s6108_s21  ;;  %1555 = vrot.lane.b32.xlu0 %v6386_v14, %s6109_s22 }
 0xc1c   : > { %1553 = vrot.lane.b32.xlu1 %v6386_v14, %s6110_s23 }
 0xc82   : > { %v1226_v16 = vpop.permute.xlu0 %1225  ;;  %v1336_v18 = vpop.permute.xlu1 %1335 }
 0xc83   : > { %v1231_v17 = vsel %vm438_vm2, %v1226_v16, 0  ;;  %v1341_v19 = vsel %vm438_vm2, %v1336_v18, 0 }
 0xc84   : > { %5500 = vmatpush3.bf16.xpose.msra.mxu0 %v1231_v17 }
 0xc85   : > { %5511 = vmatprep.subr.bf16.mxu0 %v6102_v8 }
 0xc86   : > { %v1446_v20 = vpop.permute.xlu0 %1445  ;;  %v1334_v21 = vpop.permute.xlu1 %1333 }
 0xc87   : > { %v1451_v22 = vsel %vm438_vm2, %v1446_v20, 0 }
 0xc8a   : > { %v1556_v0 = vpop.permute.xlu0 %1555  ;;  %v1444_v23 = vpop.permute.xlu1 %1443 }
 0xc8b   : > { %5502 = vmatmul.mubr.msk.bf16.vlgmr.msra.gmra.mrb[28].mxu0 %vm438_vm2, %v6386_v14  ;;  %v1561_v24 = vsel %vm438_vm2, %v1556_v0, 0 }
 0xc8c   : > { %5512 = vmatpush3.bf16.xpose.msra.mxu0 %v1341_v19  ;;  %5513 = vmatprep.mubr.msk.bf16.mxu0 %vm6103_vm1, %v6102_v8 }
 0xc8d   : > { %5523 = vmatprep.subr.bf16.mxu0 %v6102_v8 }
 0xc8e   : > { %v1554_v26 = vpop.permute.xlu1 %1553 }
 0xc93   : > { %5514 = vmatmul.mubr.msk.bf16.vlgmr.msra.gmra.mrb[32].mxu0 %vm438_vm2, %v1334_v21 }
 0xc94   : > { %5524 = vmatpush3.bf16.xpose.msra.mxu0 %v1451_v22  ;;  %5525 = vmatprep.mubr.msk.bf16.mxu0 %vm6103_vm1, %v6102_v8 }
 0xc95   : > { %5535 = vmatprep.subr.bf16.mxu0 %v6102_v8 }
 0xc9b   : > { %5526 = vmatmul.mubr.msk.bf16.vlgmr.msra.gmra.mrb[36].mxu0 %vm438_vm2, %v1444_v23 }
 0xc9c   : > { %5536 = vmatpush3.bf16.xpose.msra.mxu0 %v1561_v24  ;;  %5537 = vmatprep.mubr.msk.bf16.mxu0 %vm6103_vm1, %v6102_v8 }
 0xc9d   : > { %5547 = vmatprep.subr.bf16.mxu0 %v6102_v8 }
 0xca3   : > { %5538 = vmatmul.mubr.msk.bf16.vlgmr.msra.gmra.mrb[40].mxu0 %vm438_vm2, %v1554_v26 }
 0xca4   : > { %5551 = vmatprep.mubr.msk.bf16.mxu0 %vm6103_vm1, %v6102_v8 }
 0xd5e   : > { %v1267_v27 = vpop.f32.mrb[28].mxu0 }
 0xd5f   : > { %v1268_v28 = vadd.f32 %v6253_v38, %v1267_v27  ;;  %v5503_v25 = vpop.f32.mrb[29].mxu0 }
 0xd60   : > { %v1270_v29 = vpop.f32.mrb[30].mxu0 }
 0xd61   : > { %v5504_v30 = vpop.f32.mrb[31].mxu0  ;;  %v1273_v31 = vsel %vm438_vm2, %v1268_v28, -inf }
 0xd62   : > { %1274 = vmax.xlane.f32.xlu0 %v1273_v31 }
 0xd66   : > { %v1377_v32 = vpop.f32.mrb[32].mxu0 }
 0xd67   : > { %v1378_v33 = vadd.f32 %v6253_v38, %v1377_v32  ;;  %v5515_v34 = vpop.f32.mrb[33].mxu0 }
 0xd68   : > { %v1380_v35 = vpop.f32.mrb[34].mxu0 }
 0xd69   : > { %v5516_v36 = vpop.f32.mrb[35].mxu0  ;;  %v1383_v37 = vsel %vm438_vm2, %v1378_v33, -inf }
 0xd6a   : > { %1384 = vmax.xlane.f32.xlu1 %v1383_v37 }
 0xd6e   : > { %v1487_v39 = vpop.f32.mrb[36].mxu0 }
 0xd6f   : > { %v1488_v40 = vadd.f32 %v6253_v38, %v1487_v39  ;;  %v5527_v41 = vpop.f32.mrb[37].mxu0 }
 0xd70   : > { %v1490_v42 = vpop.f32.mrb[38].mxu0  ;;  %v5933_v41 = vld [vmem:[%s7177_s0 + $0x60] sm:$0xff]  }
 0xd71   : > { %v5528_v43 = vpop.f32.mrb[39].mxu0  ;;  %v1493_v44 = vsel %vm438_vm2, %v1488_v40, -inf  ;;  %5548 = vmatpush3.bf16.msra.mxu0 %v5933_v41  ;;  %v5934_v42 = vld [vmem:[%s7177_s0 + $0x68] sm:$0xff]   ;;  %v5941_v41 = vld [vmem:[%s7177_s0 + $0x90] sm:$0xff]  }
 0xd72   : > { %1494 = vmax.xlane.f32.xlu0 %v1493_v44  ;;  %5549 = vmatprep.subr.bf16.mxu0 %v6102_v8 }
 0xd75   : > { %5550 = vmatpush3.bf16.msra.mxu0 %v5934_v42  ;;  %v5942_v42 = vld [vmem:[%s7177_s0 + $0x98] sm:$0xff]  }
 0xd76   : > { %v1597_v45 = vpop.f32.mrb[40].mxu0  ;;  %5563 = vmatprep.subr.bf16.mxu0 %v6102_v8 }
 0xd77   : > { %v1598_v46 = vadd.f32 %v6253_v38, %v1597_v45  ;;  %v5539_v47 = vpop.f32.mrb[41].mxu0 }
 0xd78   : > { %v1600_v48 = vpop.f32.mrb[42].mxu0 }
 0xd79   : > { %v5540_v49 = vpop.f32.mrb[43].mxu0  ;;  %v1603_v50 = vsel %vm438_vm2, %v1598_v46, -inf }
 0xd7a   : > { %1604 = vmax.xlane.f32.xlu0 %v1603_v50 }
 0xdef   : > { %v1275_v52 = vpop.xlane.xlu0 %1274 }
 0xdf0   : > { %v1276_v53 = vsub.f32 %v1268_v28, %v1275_v52  ;;  %v6478_v52 = vld [vmem:[%s317_s27] sm:$0x7f]  ;;  %s7202_s27 = smov 48  }
 0xdf2   : > { %v1277_v54 = vmul.f32 1.442695, %v1276_v53  ;;  %v1947_v53 = vsel %vm1946_vm7, %v6478_v52, 0.0 }
 0xdf4   : > { %5993 = vpow2.f32 %v1277_v54 }
 0xdf7   : > { %v1385_v55 = vpop.xlane.xlu1 %1384 }
 0xdf8   : > { %v1386_v56 = vsub.f32 %v1378_v33, %v1385_v55 }
 0xdfa   : > { %v1387_v57 = vmul.f32 1.442695, %v1386_v56 }
 0xdfc   : > { %5995 = vpow2.f32 %v1387_v57 }
 0xdfe   : > { %v5994_v58 = vpop.eup %5993 }
 0xdff   : > { %v1279_v59 = vsel %vm438_vm2, %v5994_v58, 0.0  ;;  %v1495_v60 = vpop.xlane.xlu0 %1494 }
 0xe00   : > { %1280 = vadd.xlane.f32.xlu1 %v1279_v59  ;;  %v1496_v4 = vsub.f32 %v1488_v40, %v1495_v60 }
 0xe02   : > { %v1497_v5 = vmul.f32 1.442695, %v1496_v4 }
 0xe06   : > { %v5996_v38 = vpop.eup %5995 }
 0xe07   : > { %v1605_v61 = vpop.xlane.xlu0 %1604  ;;  %v1389_v62 = vsel %vm438_vm2, %v5996_v38, 0.0 }
 0xe08   : > { %v1606_v63 = vsub.f32 %v1598_v46, %v1605_v61  ;;  %1390 = vadd.xlane.f32.xlu0 %v1389_v62  ;;  %v5111_v62 = vld [vmem:[%s7178_s1 + $0xb] ss:$0 sm:$0xff] }
 0xe0a   : > { %v1607_v1 = vmul.f32 1.442695, %v1606_v63 }
 0xe0c   : > { %5997 = vpow2.f32 %v1607_v1 }
 0xe0d   : > { %5999 = vpow2.f32 %v1497_v5 }
 0xe11   : > { %1285 = vrot.lane.b32.xlu1 %v6386_v14, %s7194_s25 }
 0xe16   : > { %v5998_v2 = vpop.eup %5997 }
 0xe17   : > { %v1609_v3 = vsel %vm438_vm2, %v5998_v2, 0.0  ;;  %v6000_v6 = vpop.eup %5999 }
 0xe18   : > { %1610 = vadd.xlane.f32.xlu0 %v1609_v3  ;;  %v1499_v7 = vsel %vm438_vm2, %v6000_v6, 0.0 }
 0xe2e   : > { %1395 = vrot.lane.b32.xlu0 %v6386_v14, %s7195_s30 }
 0xe35   : > { %1500 = vadd.xlane.f32.xlu1 %v1499_v7 }
 0xe46   : > { %1505 = vrot.lane.b32.xlu1 %v6386_v14, %s7193_s8 }
 0xe4a   : > { %1615 = vrot.lane.b32.xlu1 %v6386_v14, %s7191_s9 }
 0xe8d   : > { %v1281_v9 = vpop.xlane.xlu1 %1280 }
 0xe8e   : > { %6001 = vrcp.f32 %v1281_v9 }
 0xe91   : > { %v1286_v10 = vpop.permute.xlu1 %1285 }
 0xe92   : > { %v1291_v11 = vsel %vm502_vm3, %v1286_v10, 0 }
 0xe93   : > { %5506 = vmatpush3.bf16.msra.mxu1 %v1291_v11 }
 0xe94   : > { %5517 = vmatprep.subr.bf16.mxu1 %v6102_v8 }
 0xe95   : > { %v1391_v13 = vpop.xlane.xlu0 %1390 }
 0xe96   : > { %6003 = vrcp.f32 %v1391_v13 }
 0xe98   : > { %v6002_v12 = vpop.eup %6001 }
 0xe99   : > { %v1283_v15 = vmul.f32 %v6002_v12, %v5994_v58 }
 0xe9b   : > { %v1284_v16 = vpack.c.bf16 %v1283_v15, %v1283_v15 }
 0xe9d   : > { %5508 = vmatmul.mubr.msk.bf16.vlgmr.msra.gmra.mrb[24].mxu1 %vm438_vm2, %v1284_v16 }
 0xe9e   : > { %5519 = vmatprep.mubr.msk.bf16.mxu1 %vm6103_vm1, %v6102_v8 }
 0xea0   : > { %v6004_v17 = vpop.eup %6003 }
 0xea1   : > { %v1393_v18 = vmul.f32 %v6004_v17, %v5996_v38  ;;  %v5936_v17 = vld [vmem:[%s7177_s0 + $0x78] sm:$0xff]  }
 0xea3   : > { %v1394_v21 = vpack.c.bf16 %v1393_v18, %v1393_v18  ;;  %v5940_v18 = vld [vmem:[%s7177_s0 + $0x88] sm:$0xff]  }
 0xea5   : > { %v1611_v14 = vpop.xlane.xlu0 %1610 }
 0xea9   : > { %v1396_v19 = vpop.permute.xlu0 %1395 }
 0xeaa   : > { %v1401_v20 = vsel %vm502_vm3, %v1396_v19, 0 }
 0xeab   : > { %5518 = vmatpush3.bf16.msra.mxu1 %v1401_v20 }
 0xeac   : > { %5529 = vmatprep.subr.bf16.mxu1 %v6102_v8 }
 0xeae   : > { %5520 = vmatmul.mubr.msk.bf16.vlgmr.msra.gmra.mrb[28].mxu1 %vm438_vm2, %v1394_v21 }
 0xeaf   : > { %5531 = vmatprep.mubr.msk.bf16.mxu1 %vm6103_vm1, %v6102_v8 }
 0xec2   : > { %v1501_v22 = vpop.xlane.xlu1 %1500 }
 0xec3   : > { %6005 = vrcp.f32 %v1501_v22 }
 0xec4   : > { %6007 = vrcp.f32 %v1611_v14  ;;  %v5939_v14 = vld [vmem:[%s7177_s0 + $0x80] sm:$0xff]  }
 0xec6   : > { %v1506_v0 = vpop.permute.xlu1 %1505 }
 0xec7   : > { %v1511_v23 = vsel %vm502_vm3, %v1506_v0, 0 }
 0xec8   : > { %5530 = vmatpush3.bf16.msra.mxu1 %v1511_v23 }
 0xec9   : > { %5541 = vmatprep.subr.bf16.mxu1 %v6102_v8 }
 0xeca   : > { %v1616_v27 = vpop.permute.xlu1 %1615 }
 0xecb   : > { %v1621_v29 = vsel %vm502_vm3, %v1616_v27, 0  ;;  %v5115_v27 = vld [vmem:[%s7178_s1 + $0xc] ss:$0 sm:$0xff] }
 0xecd   : > { %v6006_v24 = vpop.eup %6005 }
 0xece   : > { %v1503_v26 = vmul.f32 %v6006_v24, %v6000_v6  ;;  %v6008_v25 = vpop.eup %6007 }
 0xecf   : > { %v1613_v30 = vmul.f32 %v6008_v25, %v5998_v2  ;;  %v5116_v25 = vld [vmem:[%s7178_s1 + $0xd] ss:$0 sm:$0xff] }
 0xed0   : > { %v1504_v28 = vpack.c.bf16 %v1503_v26, %v1503_v26 }
 0xed1   : > { %v1614_v31 = vpack.c.bf16 %v1613_v30, %v1613_v30 }
 0xed2   : > { %5532 = vmatmul.mubr.msk.bf16.vlgmr.msra.gmra.mrb[32].mxu1 %vm438_vm2, %v1504_v28 }
 0xed3   : > { %5542 = vmatpush3.bf16.msra.mxu1 %v1621_v29  ;;  %5543 = vmatprep.mubr.msk.bf16.mxu1 %vm6103_vm1, %v6102_v8 }
 0xed4   : > { %5555 = vmatprep.subr.bf16.mxu1 %v6102_v8 }
 0xeda   : > { %5544 = vmatmul.mubr.msk.bf16.vlgmr.msra.gmra.mrb[36].mxu1 %vm438_vm2, %v1614_v31  ;;  %v5129_v31 = vld [vmem:[%s7178_s1 + $0x10] ss:$0 sm:$0xff] }
 0xedb   : > { %5559 = vmatprep.mubr.msk.bf16.mxu1 %vm6103_vm1, %v6102_v8 }
 0xf70   : > { %v1327_v32 = vpop.f32.mrb[24].mxu1 }
 0xf71   : > { %v5509_v33 = vpop.f32.mrb[25].mxu1 }
 0xf72   : > { %v1330_v34 = vpop.f32.mrb[26].mxu1  ;;  %v5937_v33 = vld [vmem:[%s7177_s0 + $0xa0] sm:$0xff]  }
 0xf73   : > { %v5510_v35 = vpop.f32.mrb[27].mxu1 }
 0xf81   : > { %v1437_v36 = vpop.f32.mrb[28].mxu1 }
 0xf82   : > { %1664 = vrot.lane.b32.xlu0 %v1437_v36, %s7189_s10  ;;  %v5521_v37 = vpop.f32.mrb[29].mxu1  ;;  %v5130_v36 = vld [vmem:[%s7178_s1 + $0x11] ss:$0 sm:$0xff]  ;;  %s328_s10 = scalar_lea.vmem %s7183_s6, %s6171_s26 }
 0xf83   : > { %v1440_v39 = vpop.f32.mrb[30].mxu1  ;;  %v5938_v37 = vld [vmem:[%s7177_s0 + $0xa8] sm:$0xff]  }
 0xf84   : > { %v5522_v40 = vpop.f32.mrb[31].mxu1 }
 0xfa5   : > { %v1547_v43 = vpop.f32.mrb[32].mxu1 }
 0xfa6   : > { %1668 = vrot.lane.b32.xlu1 %v1547_v43, %s7196_s13  ;;  %v5533_v44 = vpop.f32.mrb[33].mxu1  ;;  %v5117_v43 = vld [vmem:[%s7178_s1 + $0xe] ss:$0 sm:$0xff] }
 0xfa7   : > { %v1550_v45 = vpop.f32.mrb[34].mxu1 }
 0xfa8   : > { %v5534_v46 = vpop.f32.mrb[35].mxu1 }
 0xfad   : > { %v1657_v47 = vpop.f32.mrb[36].mxu1 }
 0xfae   : > { %1672 = vrot.lane.b32.xlu0 %v1657_v47, %s7197_s14  ;;  %v5545_v48 = vpop.f32.mrb[37].mxu1 }
 0xfaf   : > { %v1660_v49 = vpop.f32.mrb[38].mxu1 }
 0xfb0   : > { %v5546_v50 = vpop.f32.mrb[39].mxu1 }
 0xfcd   : > { %1948 = vadd.xlane.f32.xlu0 %v1947_v53  ;;  %v5131_v53 = vld [vmem:[%s7178_s1 + $0x14] ss:$0 sm:$0xff] }
 0xff4   : > { %v1665_v54 = vpop.permute.xlu0 %1664 }
 0xff5   : > { %v1675_v56 = vsel %vm438_vm2, %v1327_v32, %v1665_v54 }
0x1018   : > { %v1669_v55 = vpop.permute.xlu1 %1668 }
0x1019   : > { %v1676_v57 = vsel %vm889_vm4, %v1675_v56, %v1669_v55 }
0x1020   : > { %v1673_v58 = vpop.permute.xlu0 %1672 }
0x1021   : > { %v1677_v59 = vsel %vm891_vm5, %v1676_v57, %v1673_v58 }
0x1022   : > { %v1682_v60 = vpack.c.bf16 %v1677_v59, %v1677_v59 }
0x1024   : > { %5552 = vmatmul.mubr.msk.bf16.vlgmr.msra.gmra.mrb[44].mxu0 %vm338_vm0, %v1682_v60 }
0x1025   : > { %5571 = vmatprep.mubr.msk.bf16.mxu0 %vm6103_vm1, %v6102_v8  ;;  %5564 = vmatpush3.bf16.msra.mxu0 %v5939_v14 }
0x1026   : > { %5565 = vmatprep.subr.bf16.mxu0 %v6102_v8 }
0x1029   : > { %5566 = vmatpush3.bf16.msra.mxu0 %v5940_v18 }
0x102a   : > { %5567 = vmatprep.subr.bf16.mxu0 %v6102_v8 }
0x102d   : > { %5568 = vmatpush3.bf16.msra.mxu0 %v5941_v41 }
0x102e   : > { %5569 = vmatprep.subr.bf16.mxu0 %v6102_v8 }
0x1031   : > { %5570 = vmatpush3.bf16.msra.mxu0 %v5942_v42 }
0x1032   : > { %5589 = vmatprep.subr.bf16.mxu0 %v6102_v8 }
0x105a   : > { %v1949_v38 = vpop.xlane.xlu0 %1948 }
0x105b   : > { %v1950_v61 = vmul.f32 0.03125, %v1949_v38 }
0x105d   : > { %v1951_v63 = vsub.f32 %v6478_v52, %v1950_v61 }
0x105f   : > { %v1952_v7 = vmul.f32 %v1951_v63, %v1951_v63 }
0x1061   : > { %v1953_v10 = vsel %vm1946_vm7, %v1952_v7, 0.0 }
0x10f7   : > { %v1737_v1 = vpop.f32.mrb[44].mxu0 }
0x10f8   : > { %v1738_v2 = vadd.f32 %v5111_v62, %v1737_v1  ;;  %v5553_v3 = vpop.f32.mrb[45].mxu0 }
0x10f9   : > { %v1740_v4 = vpop.f32.mrb[46].mxu0 }
0x10fa   : > { %v6493_v5 = vadd.f32 %v1738_v2, %v6360_v51  ;;  %v5554_v6 = vpop.f32.mrb[47].mxu0  ;;  %v5935_v51 = vld [vmem:[%s7177_s0 + $0x70] sm:$0xff]  }
0x10fb   : > { %5556 = vmatpush3.bf16.msra.mxu1 %v5935_v51 }
0x10fc   : > { %v1746_v9 = vsel %vm338_vm0, %v6493_v5, 0.0  ;;  %5557 = vmatprep.subr.bf16.mxu1 %v6102_v8 }
0x10fd   : > { %1747 = vadd.xlane.f32.xlu1 %v1746_v9 }
0x10ff   : > { %5558 = vmatpush3.bf16.msra.mxu1 %v5936_v17 }
0x1100   : > { %5575 = vmatprep.subr.bf16.mxu1 %v6102_v8 }
0x1101   : > { %1954 = vadd.xlane.f32.xlu1 %v1953_v10 }
0x118a   : > { %v1748_v11 = vpop.xlane.xlu1 %1747 }
0x118b   : > { %v1749_v12 = vmul.f32 0.03125, %v1748_v11 }
0x118d   : > { %v1750_v13 = vsub.f32 %v6493_v5, %v1749_v12 }
0x118e   : > { %v1955_v19 = vpop.xlane.xlu1 %1954 }
0x118f   : > { %v1751_v15 = vmul.f32 %v1750_v13, %v1750_v13  ;;  %v1956_v20 = vmul.f32 0.03125, %v1955_v19 }
0x1191   : > { %v1752_v16 = vsel %vm338_vm0, %v1751_v15, 0.0  ;;  %v1957_v21 = vadd.f32 1e-06, %v1956_v20 }
0x1192   : > { %1753 = vadd.xlane.f32.xlu0 %v1752_v16 }
0x1193   : > { %6009 = vrsqrt.f32 %v1957_v21 }
0x119d   : > { %v6010_v24 = vpop.eup %6009 }
0x119e   : > { %v1959_v29 = vmul.f32 %v6010_v24, %v1951_v63 }
0x11a0   : > { %v1964_v35 = vmul.f32 %v5129_v31, %v1959_v29 }
0x11a2   : > { %v1969_v39 = vadd.f32 %v5130_v36, %v1964_v35 }
0x11a4   : > { %v1974_v40 = vpack.c.bf16 %v1969_v39, %v1969_v39 }
0x121f   : > { %v1754_v22 = vpop.xlane.xlu0 %1753 }
0x1220   : > { %v1755_v0 = vmul.f32 0.03125, %v1754_v22 }
0x1222   : > { %v1756_v23 = vadd.f32 1e-06, %v1755_v0 }
0x1224   : > { %6011 = vrsqrt.f32 %v1756_v23 }
0x122e   : > { %v6012_v26 = vpop.eup %6011 }
0x122f   : > { %v1758_v28 = vmul.f32 %v6012_v26, %v1750_v13  ;;  %v1942_v13 = vld [vmem:[%s6602_s28] sm:$0x7f] }
0x1231   : > { %v1763_v30 = vmul.f32 %v5115_v27, %v1758_v28 }
0x1233   : > { %v1768_v32 = vadd.f32 %v5116_v25, %v1763_v30 }
0x1235   : > { %v1773_v34 = vpack.c.bf16 %v1768_v32, %v1768_v32 }
0x1237   : > { %5560 = vmatmul.mubr.msk.bf16.vlgmr.msra.gmra.mrb[40].mxu1 %vm338_vm0, %v1773_v34 }
0x1238   : > { %5576 = vmatpush3.bf16.msra.mxu1 %v5937_v33  ;;  %5579 = vmatprep.mubr.msk.bf16.mxu1 %vm6103_vm1, %v6102_v8 }
0x1239   : > { %5577 = vmatprep.subr.bf16.mxu1 %v6102_v8 }
0x123c   : > { %5578 = vmatpush3.bf16.msra.mxu1 %v5938_v37 }
0x123d   : > { %5583 = vmatprep.subr.bf16.mxu1 %v6102_v8 }
0x123f   : > { %5580 = vmatmul.mubr.msk.bf16.vlgmr.msra.gmra.mrb[44].mxu1 %vm338_vm0, %v1974_v40 }
0x1240   : > { %5585 = vmatprep.mubr.msk.bf16.mxu1 %vm6103_vm1, %v6102_v8 }
0x130a   : > { %v1828_v44 = vpop.f32.mrb[40].mxu1 }
0x130b   : > { %v1829_v45 = vadd.f32 %v5117_v43, %v1828_v44  ;;  %v5561_v46 = vpop.f32.mrb[41].mxu1 }
0x130c   : > { %v1831_v47 = vpop.f32.mrb[42].mxu1 }
0x130d   : > { %v1834_v48 = vmax.f32 %v1829_v45, 0.0  ;;  %v5562_v49 = vpop.f32.mrb[43].mxu1 }
0x130f   : > { %v1843_v50 = vpack.c.bf16 %v1834_v48, %v1834_v48 }
0x1311   : > { %5572 = vmatmul.mubr.msk.bf16.vlgmr.msra.gmra.mrb[48].mxu0 %vm1088_vm6, %v1843_v50 }
0x1312   : > { %v2029_v54 = vpop.f32.mrb[44].mxu1  ;;  %5591 = vmatprep.mubr.msk.bf16.mxu0 %vm6103_vm1, %v6102_v8 }
0x1313   : > { %v2030_v55 = vadd.f32 %v5131_v53, %v2029_v54  ;;  %v5581_v56 = vpop.f32.mrb[45].mxu1 }
0x1314   : > { %v2032_v57 = vpop.f32.mrb[46].mxu1 }
0x1315   : > { %v6559_v58 = vpack.c.bf16 %v2030_v55, %v2030_v55  ;;  %v5582_v59 = vpop.f32.mrb[47].mxu1 }
0x1317   : > { %2152 = vrot.lane.b32.xlu1 %v6559_v58, %s6106_s19  ;;  %2037 = vrot.lane.b32.xlu0 %v6559_v58, %s6105_s18 }
0x131b   : > { %2150 = vrot.lane.b32.xlu1 %v6559_v58, %s6104_s17  ;;  %2262 = vrot.lane.b32.xlu0 %v6559_v58, %s6107_s20 }
0x131f   : > { %2260 = vrot.lane.b32.xlu1 %v6559_v58, %s6108_s21  ;;  %2372 = vrot.lane.b32.xlu0 %v6559_v58, %s6109_s22 }
0x1323   : > { %2370 = vrot.lane.b32.xlu1 %v6559_v58, %s6110_s23 }
0x1389   : > { %v2038_v60 = vpop.permute.xlu0 %2037  ;;  %v2153_v61 = vpop.permute.xlu1 %2152 }
0x138a   : > { %v2043_v38 = vsel %vm438_vm2, %v2038_v60, 0  ;;  %v2158_v62 = vsel %vm438_vm2, %v2153_v61, 0  ;;  %v6118_v61 = vmov 65535  }
0x138b   : > { %5584 = vmatpush3.bf16.xpose.msra.mxu1 %v2043_v38 }
0x138c   : > { %5595 = vmatprep.subr.bf16.mxu1 %v6102_v8 }
0x138d   : > { %v2263_v63 = vpop.permute.xlu0 %2262  ;;  %v2151_v1 = vpop.permute.xlu1 %2150 }
0x138e   : > { %v2268_v2 = vsel %vm438_vm2, %v2263_v63, 0 }
0x1391   : > { %v2373_v3 = vpop.permute.xlu0 %2372  ;;  %v2261_v4 = vpop.permute.xlu1 %2260 }
0x1392   : > { %5586 = vmatmul.mubr.msk.bf16.vlgmr.msra.gmra.mrb[48].mxu1 %vm438_vm2, %v6559_v58  ;;  %v2378_v6 = vsel %vm438_vm2, %v2373_v3, 0 }
0x1393   : > { %5596 = vmatpush3.bf16.xpose.msra.mxu1 %v2158_v62  ;;  %5597 = vmatprep.mubr.msk.bf16.mxu1 %vm6103_vm1, %v6102_v8  ;;  %v2105_v62 = vsel %vm2104_vm9, 4294967295, %v6118_v61 }
0x1394   : > { %5607 = vmatprep.subr.bf16.mxu1 %v6102_v8 }
0x1395   : > { %v2371_v7 = vpop.permute.xlu1 %2370 }
0x139a   : > { %5598 = vmatmul.mubr.msk.bf16.vlgmr.msra.gmra.mrb[52].mxu1 %vm438_vm2, %v2151_v1 }
0x139b   : > { %5608 = vmatpush3.bf16.xpose.msra.mxu1 %v2268_v2  ;;  %5609 = vmatprep.mubr.msk.bf16.mxu1 %vm6103_vm1, %v6102_v8  ;;  %v6622_v2 = vsel %vm502_vm3, %v2105_v62, 0 }
0x139c   : > { %5619 = vmatprep.subr.bf16.mxu1 %v6102_v8 }
0x13a2   : > { %5610 = vmatmul.mubr.msk.bf16.vlgmr.msra.gmra.mrb[56].mxu1 %vm438_vm2, %v2261_v4 }
0x13a3   : > { %5620 = vmatpush3.bf16.xpose.msra.mxu1 %v2378_v6  ;;  %5621 = vmatprep.mubr.msk.bf16.mxu1 %vm6103_vm1, %v6102_v8 }
0x13a4   : > { %5631 = vmatprep.subr.bf16.mxu1 %v6102_v8 }
0x13aa   : > { %5622 = vmatmul.mubr.msk.bf16.vlgmr.msra.gmra.mrb[60].mxu1 %vm438_vm2, %v2371_v7 }
0x13ab   : > { %5635 = vmatprep.mubr.msk.bf16.mxu1 %vm6103_vm1, %v6102_v8 }
0x13e4   : > { %v6596_v9 = vpop.f32.mrb[48].mxu0 }
0x13e5   : > { %v5573_v10 = vpop.f32.mrb[49].mxu0 }
0x13e6   : > { %v1913_v11 = vpop.f32.mrb[50].mxu0 }
0x13e7   : > { %v5574_v12 = vpop.f32.mrb[51].mxu0 }
0x1465   : > { %v2079_v15 = vpop.f32.mrb[48].mxu1 }
0x1466   : > { %v2080_v16 = vadd.f32 %v2079_v15, %v1942_v13  ;;  %v5587_v51 = vpop.f32.mrb[49].mxu1 }
0x1467   : > { %v2082_v17 = vpop.f32.mrb[50].mxu1 }
0x1468   : > { %v5588_v14 = vpop.f32.mrb[51].mxu1  ;;  %v2086_v18 = vsel %vm2085_vm8, %v2080_v16, -inf }
0x1469   : > { %2087 = vmax.xlane.f32.xlu0 %v2086_v18 }
0x146d   : > { %v2194_v19 = vpop.f32.mrb[52].mxu1 }
0x146e   : > { %v2195_v20 = vadd.f32 %v2194_v19, %v1942_v13  ;;  %v5599_v21 = vpop.f32.mrb[53].mxu1 }
0x146f   : > { %v2197_v22 = vpop.f32.mrb[54].mxu1 }
0x1470   : > { %v5600_v0 = vpop.f32.mrb[55].mxu1  ;;  %v2200_v23 = vsel %vm2085_vm8, %v2195_v20, -inf }
0x1471   : > { %2201 = vmax.xlane.f32.xlu1 %v2200_v23 }
0x1475   : > { %v2304_v24 = vpop.f32.mrb[56].mxu1 }
0x1476   : > { %v2305_v26 = vadd.f32 %v2304_v24, %v1942_v13  ;;  %v5611_v27 = vpop.f32.mrb[57].mxu1 }
0x1477   : > { %v2307_v28 = vpop.f32.mrb[58].mxu1 }
0x1478   : > { %v5612_v25 = vpop.f32.mrb[59].mxu1  ;;  %v2310_v29 = vsel %vm2085_vm8, %v2305_v26, -inf }
0x1479   : > { %2311 = vmax.xlane.f32.xlu0 %v2310_v29 }
0x147d   : > { %v2414_v30 = vpop.f32.mrb[60].mxu1 }
0x147e   : > { %v2415_v31 = vadd.f32 %v2414_v30, %v1942_v13  ;;  %v5623_v32 = vpop.f32.mrb[61].mxu1 }
0x147f   : > { %v2417_v33 = vpop.f32.mrb[62].mxu1  ;;  %v5944_v32 = vld [vmem:[%s7177_s0 + $0xb8] sm:$0xff]  }
0x1480   : > { %v5624_v34 = vpop.f32.mrb[63].mxu1  ;;  %v2420_v35 = vsel %vm2085_vm8, %v2415_v31, -inf }
0x1481   : > { %2421 = vmax.xlane.f32.xlu0 %v2420_v35 }
0x14f6   : > { %v2088_v36 = vpop.xlane.xlu0 %2087 }
0x14f7   : > { %v2089_v37 = vsub.f32 %v2080_v16, %v2088_v36 }
0x14f9   : > { %v2090_v39 = vmul.f32 1.442695, %v2089_v37 }
0x14fb   : > { %6013 = vpow2.f32 %v2090_v39 }
0x14fe   : > { %v2202_v40 = vpop.xlane.xlu1 %2201 }
0x14ff   : > { %v2203_v41 = vsub.f32 %v2195_v20, %v2202_v40 }
0x1501   : > { %v2204_v42 = vmul.f32 1.442695, %v2203_v41 }
0x1503   : > { %6015 = vpow2.f32 %v2204_v42  ;;  %v5121_v42 = vld [vmem:[%s7178_s1 + $0xf] ss:$0 sm:$0xff] }
0x1505   : > { %v6014_v43 = vpop.eup %6013 }
0x1506   : > { %v2092_v44 = vsel %vm2085_vm8, %v6014_v43, 0.0  ;;  %v2312_v47 = vpop.xlane.xlu0 %2311 }
0x1507   : > { %2093 = vadd.xlane.f32.xlu1 %v2092_v44  ;;  %v2313_v48 = vsub.f32 %v2305_v26, %v2312_v47 }
0x1509   : > { %v2314_v50 = vmul.f32 1.442695, %v2313_v48 }
0x150b   : > { %6017 = vpow2.f32 %v2314_v50 }
0x150d   : > { %v6016_v45 = vpop.eup %6015 }
0x150e   : > { %v2206_v46 = vsel %vm2085_vm8, %v6016_v45, 0.0  ;;  %v2422_v49 = vpop.xlane.xlu0 %2421 }
0x150f   : > { %2207 = vadd.xlane.f32.xlu0 %v2206_v46  ;;  %v2423_v53 = vsub.f32 %v2415_v31, %v2422_v49  ;;  %v5943_v31 = vld [vmem:[%s7177_s0 + $0xb0] sm:$0xff]  }
0x1510   : > { %5632 = vmatpush3.bf16.msra.mxu1 %v5943_v31 }
0x1511   : > { %v2424_v54 = vmul.f32 1.442695, %v2423_v53  ;;  %5633 = vmatprep.subr.bf16.mxu1 %v6102_v8 }
0x1513   : > { %6019 = vpow2.f32 %v2424_v54 }
0x1514   : > { %5634 = vmatpush3.bf16.msra.mxu1 %v5944_v32 }
0x1515   : > { %v6018_v55 = vpop.eup %6017  ;;  %5647 = vmatprep.subr.bf16.mxu1 %v6102_v8 }
0x1516   : > { %v2316_v56 = vsel %vm2085_vm8, %v6018_v55, 0.0 }
0x1518   : > { %2212 = vrot.lane.b32.xlu1 %v6559_v58, %s7195_s30 }
0x151d   : > { %v6020_v57 = vpop.eup %6019 }
0x151e   : > { %v2426_v59 = vsel %vm2085_vm8, %v6020_v57, 0.0 }
0x1525   : > { %2098 = vrot.lane.b32.xlu0 %v6559_v58, %s7194_s25 }
0x1529   : > { %2322 = vrot.lane.b32.xlu0 %v6559_v58, %s7193_s8 }
0x153c   : > { %2317 = vadd.xlane.f32.xlu1 %v2316_v56 }
0x1540   : > { %2427 = vadd.xlane.f32.xlu1 %v2426_v59 }
0x1551   : > { %2432 = vrot.lane.b32.xlu1 %v6559_v58, %s7198_s11 }
0x1594   : > { %v2094_v60 = vpop.xlane.xlu1 %2093 }
0x1595   : > { %6021 = vrcp.f32 %v2094_v60 }
0x1598   : > { %v2213_v6 = vpop.permute.xlu1 %2212 }
0x1599   : > { %v2218_v58 = vand.u32 %v2213_v6, %v6622_v2 }
0x159c   : > { %v2208_v38 = vpop.xlane.xlu0 %2207 }
0x159d   : > { %6023 = vrcp.f32 %v2208_v38 }
0x159f   : > { %v6022_v63 = vpop.eup %6021 }
0x15a0   : > { %v2096_v1 = vmul.f32 %v6022_v63, %v6014_v43  ;;  %v2099_v3 = vpop.permute.xlu0 %2098  ;;  %v1911_v43 = vadd.f32 %v5121_v42, %v6596_v9 }
0x15a1   : > { %v2108_v4 = vand.u32 %v6622_v2, %v2099_v3 }
0x15a2   : > { %v2097_v7 = vpack.c.bf16 %v2096_v1, %v2096_v1  ;;  %v1916_v44 = vadd.f32 %v1911_v43, %v6493_v5 }
0x15a3   : > { %5590 = vmatpush3.bf16.msra.mxu0 %v2108_v4  ;;  %v5945_v4 = vld [vmem:[%s7177_s0 + $0xc0] sm:$0xff]  }
0x15a4   : > { %5601 = vmatprep.subr.bf16.mxu0 %v6102_v8  ;;  %v2323_v12 = vpop.permute.xlu0 %2322 }
0x15a5   : > { %v2328_v15 = vand.u32 %v2323_v12, %v6622_v2 }
0x15a6   : > { %5592 = vmatmul.mubr.msk.bf16.vlgmr.msra.gmra.mrb[52].mxu0 %vm2100_vm10, %v2097_v7 }
0x15a7   : > { %v6024_v10 = vpop.eup %6023  ;;  %5602 = vmatpush3.bf16.msra.mxu0 %v2218_v58  ;;  %5603 = vmatprep.mubr.msk.bf16.mxu0 %vm6103_vm1, %v6102_v8 }
0x15a8   : > { %v2210_v11 = vmul.f32 %v6024_v10, %v6016_v45  ;;  %5613 = vmatprep.subr.bf16.mxu0 %v6102_v8  ;;  %v1919_v45 = vsel %vm338_vm0, %v1916_v44, 0.0 }
0x15aa   : > { %v2211_v13 = vpack.c.bf16 %v2210_v11, %v2210_v11 }
0x15ae   : > { %5604 = vmatmul.mubr.msk.bf16.vlgmr.msra.gmra.mrb[56].mxu0 %vm2100_vm10, %v2211_v13 }
0x15af   : > { %5614 = vmatpush3.bf16.msra.mxu0 %v2328_v15  ;;  %5615 = vmatprep.mubr.msk.bf16.mxu0 %vm6103_vm1, %v6102_v8  ;;  %v5149_v15 = vld [vmem:[%s7178_s1 + $0x16] ss:$0 sm:$0xff] }
0x15b0   : > { %5625 = vmatprep.subr.bf16.mxu0 %v6102_v8 }
0x15c9   : > { %v2318_v16 = vpop.xlane.xlu1 %2317 }
0x15ca   : > { %6025 = vrcp.f32 %v2318_v16 }
0x15cd   : > { %v2428_v51 = vpop.xlane.xlu1 %2427 }
0x15ce   : > { %6027 = vrcp.f32 %v2428_v51 }
0x15d1   : > { %v2433_v18 = vpop.permute.xlu1 %2432 }
0x15d2   : > { %v2438_v21 = vand.u32 %v2433_v18, %v6622_v2  ;;  %v5127_v18 = vld [vmem:[%s7178_s1 + $0x28] ss:$0 sm:$0xff] }
0x15d4   : > { %v6026_v17 = vpop.eup %6025 }
0x15d5   : > { %v2320_v14 = vmul.f32 %v6026_v17, %v6018_v55  ;;  %v5143_v55 = vld [vmem:[%s7178_s1 + $0x15] ss:$0 sm:$0xff] }
0x15d7   : > { %v2321_v19 = vpack.c.bf16 %v2320_v14, %v2320_v14 }
0x15d8   : > { %v6028_v20 = vpop.eup %6027 }
0x15d9   : > { %5616 = vmatmul.mubr.msk.bf16.vlgmr.msra.gmra.mrb[60].mxu0 %vm2100_vm10, %v2321_v19  ;;  %v2430_v22 = vmul.f32 %v6028_v20, %v6020_v57  ;;  %v5128_v20 = vld [vmem:[%s7178_s1 + $0x29] ss:$0 sm:$0xff] }
0x15da   : > { %5626 = vmatpush3.bf16.msra.mxu0 %v2438_v21  ;;  %5627 = vmatprep.mubr.msk.bf16.mxu0 %vm6103_vm1, %v6102_v8 }
0x15db   : > { %5639 = vmatprep.subr.bf16.mxu0 %v6102_v8  ;;  %v2431_v0 = vpack.c.bf16 %v2430_v22, %v2430_v22 }
0x15e1   : > { %5628 = vmatmul.mubr.msk.bf16.vlgmr.msra.gmra.mrb[64].mxu0 %vm2100_vm10, %v2431_v0 }
0x15e2   : > { %5643 = vmatprep.mubr.msk.bf16.mxu0 %vm6103_vm1, %v6102_v8  ;;  %5640 = vmatpush3.bf16.msra.mxu0 %v5945_v4 }
0x15e3   : > { %5641 = vmatprep.subr.bf16.mxu0 %v6102_v8 }
0x1679   : > { %v2144_v23 = vpop.f32.mrb[52].mxu0 }
0x167a   : > { %v5593_v24 = vpop.f32.mrb[53].mxu0 }
0x167b   : > { %v2147_v26 = vpop.f32.mrb[54].mxu0 }
0x167c   : > { %v5594_v27 = vpop.f32.mrb[55].mxu0 }
0x1681   : > { %v2254_v28 = vpop.f32.mrb[56].mxu0 }
0x1682   : > { %2481 = vrot.lane.b32.xlu0 %v2254_v28, %s7199_s12  ;;  %v5605_v25 = vpop.f32.mrb[57].mxu0  ;;  %v5147_v28 = vld [vmem:[%s7178_s1 + $0x12] ss:$0 sm:$0xff] }
0x1683   : > { %v2257_v29 = vpop.f32.mrb[58].mxu0 }
0x1684   : > { %v5606_v30 = vpop.f32.mrb[59].mxu0  ;;  %v5148_v29 = vld [vmem:[%s7178_s1 + $0x13] ss:$0 sm:$0xff] }
0x16ac   : > { %v2364_v33 = vpop.f32.mrb[60].mxu0 }
0x16ad   : > { %2485 = vrot.lane.b32.xlu1 %v2364_v33, %s7196_s13  ;;  %v5617_v34 = vpop.f32.mrb[61].mxu0 }
0x16ae   : > { %v2367_v35 = vpop.f32.mrb[62].mxu0 }
0x16af   : > { %v5618_v36 = vpop.f32.mrb[63].mxu0 }
0x16b4   : > { %v2474_v37 = vpop.f32.mrb[64].mxu0 }
0x16b5   : > { %2489 = vrot.lane.b32.xlu0 %v2474_v37, %s7197_s14  ;;  %v5629_v39 = vpop.f32.mrb[65].mxu0 }
0x16b6   : > { %v2477_v40 = vpop.f32.mrb[66].mxu0 }
0x16b7   : > { %v5630_v41 = vpop.f32.mrb[67].mxu0 }
0x16d1   : > { %1920 = vadd.xlane.f32.xlu1 %v1919_v45 }
0x16f4   : > { %v2482_v46 = vpop.permute.xlu0 %2481 }
0x16f5   : > { %v2492_v48 = vsel %vm438_vm2, %v2144_v23, %v2482_v46 }
0x171f   : > { %v2486_v47 = vpop.permute.xlu1 %2485 }
0x1720   : > { %v2493_v49 = vsel %vm889_vm4, %v2492_v48, %v2486_v47 }
0x1727   : > { %v2490_v50 = vpop.permute.xlu0 %2489 }
0x1728   : > { %v2494_v53 = vsel %vm891_vm5, %v2493_v49, %v2490_v50 }
0x1729   : > { %v2499_v54 = vpack.c.bf16 %v2494_v53, %v2494_v53 }
0x172b   : > { %5636 = vmatmul.mubr.msk.bf16.vlgmr.msra.gmra.mrb[64].mxu1 %vm338_vm0, %v2499_v54 }
0x172c   : > { %5651 = vmatprep.mubr.msk.bf16.mxu1 %vm6103_vm1, %v6102_v8 }
0x175e   : > { %v1921_v9 = vpop.xlane.xlu1 %1920 }
0x175f   : > { %v1922_v5 = vmul.f32 0.03125, %v1921_v9 }
0x1761   : > { %v1923_v57 = vsub.f32 %v1916_v44, %v1922_v5 }
0x1763   : > { %v1924_v1 = vmul.f32 %v1923_v57, %v1923_v57 }
0x1765   : > { %v1925_v3 = vsel %vm338_vm0, %v1924_v1, 0.0 }
0x17fe   : > { %v2554_v56 = vpop.f32.mrb[64].mxu1 }
0x17ff   : > { %v2555_v59 = vadd.f32 %v5143_v55, %v2554_v56  ;;  %v5637_v60 = vpop.f32.mrb[65].mxu1 }
0x1800   : > { %v2557_v38 = vpop.f32.mrb[66].mxu1 }
0x1801   : > { %v6671_v61 = vadd.f32 %v2555_v59, %v6478_v52  ;;  %v5638_v62 = vpop.f32.mrb[67].mxu1  ;;  %v5946_v52 = vld [vmem:[%s7177_s0 + $0xc8] sm:$0xff]   ;;  %v6748_v59 = vld [vmem:[%s6250_s29] ss:$0 sm:$0xff] }
0x1802   : > { %5642 = vmatpush3.bf16.msra.mxu0 %v5946_v52 }
0x1803   : > { %v2563_v63 = vsel %vm1946_vm7, %v6671_v61, 0.0  ;;  %5655 = vmatprep.subr.bf16.mxu0 %v6102_v8 }
0x1804   : > { %2564 = vadd.xlane.f32.xlu0 %v2563_v63 }
0x1808   : > { %1926 = vadd.xlane.f32.xlu0 %v1925_v3 }
0x181e   : > { %2652 = vrot.lane.b32.xlu0 %v5945_v4, %s6105_s18 }
0x1891   : > { %v2565_v6 = vpop.xlane.xlu0 %2564 }
0x1892   : > { %v2566_v7 = vmul.f32 0.03125, %v2565_v6 }
0x1894   : > { %v2567_v58 = vsub.f32 %v6671_v61, %v2566_v7 }
0x1895   : > { %v1927_v12 = vpop.xlane.xlu0 %1926 }
0x1896   : > { %v2568_v10 = vmul.f32 %v2567_v58, %v2567_v58  ;;  %v1928_v16 = vmul.f32 0.03125, %v1927_v12 }
0x1898   : > { %v2569_v11 = vsel %vm1946_vm7, %v2568_v10, 0.0  ;;  %v1929_v51 = vadd.f32 1e-06, %v1928_v16 }
0x1899   : > { %2570 = vadd.xlane.f32.xlu1 %v2569_v11  ;;  %v2653_v13 = vpop.permute.xlu0 %2652 }
0x189a   : > { %5648 = vmatpush3.bf16.msra.mxu1 %v2653_v13  ;;  %6029 = vrsqrt.f32 %v1929_v51 }
0x189b   : > { %5649 = vmatprep.subr.bf16.mxu1 %v6102_v8 }
0x18a4   : > { %v6030_v17 = vpop.eup %6029 }
0x18a5   : > { %v1931_v14 = vmul.f32 %v6030_v17, %v1923_v57 }
0x18a7   : > { %v1936_v19 = vmul.f32 %v5127_v18, %v1931_v14 }
0x18a9   : > { %v1941_v0 = vadd.f32 %v5128_v20, %v1936_v19 }
0x18aa   : > { %2654 = vrot.lane.b32.xlu1 %v5946_v52, %s6105_s18 }
0x18ab   : > { %v6699_v26 = vpack.c.bf16 %v1941_v0, %v1941_v0 }
0x18ae   : > { %2659 = vrot.lane.b32.xlu1 %v5149_v15, %s6105_s18 }
0x1926   : > { %v2571_v21 = vpop.xlane.xlu1 %2570 }
0x1927   : > { %v2572_v22 = vmul.f32 0.03125, %v2571_v21 }
0x1929   : > { %v2573_v23 = vadd.f32 1e-06, %v2572_v22 }
0x192a   : > { %v2655_v24 = vpop.permute.xlu1 %2654 }
0x192b   : > { %6031 = vrsqrt.f32 %v2573_v23  ;;  %5650 = vmatpush3.bf16.msra.mxu1 %v2655_v24 }
0x192c   : > { %5661 = vmatprep.subr.bf16.mxu1 %v6102_v8 }
0x192e   : > { %5652 = vmatmul.mubr.msk.bf16.vlgmr.msra.gmra.mrb[68].mxu1 %vm338_vm0, %v6699_v26  ;;  %v2660_v33 = vpop.permute.xlu1 %2659 }
0x192f   : > { %5663 = vmatprep.mubr.msk.bf16.mxu1 %vm6103_vm1, %v6102_v8 }
0x1935   : > { %v6032_v27 = vpop.eup %6031 }
0x1936   : > { %v2575_v25 = vmul.f32 %v6032_v27, %v2567_v58 }
0x1938   : > { %v2580_v30 = vmul.f32 %v5147_v28, %v2575_v25 }
0x193a   : > { %v2585_v31 = vadd.f32 %v5148_v29, %v2580_v30 }
0x193c   : > { %v2591_v32 = vpack.c.bf16 %v2585_v31, %v2585_v31 }
0x193e   : > { %5644 = vmatmul.mubr.msk.bf16.vlgmr.msra.gmra.mrb[68].mxu0 %vm338_vm0, %v2591_v32 }
0x193f   : > { %5657 = vmatprep.mubr.msk.bf16.mxu0 %vm6103_vm1, %v6102_v8 }
0x1a01   : > { %v2699_v34 = vpop.f32.mrb[68].mxu1 }
0x1a02   : > { %v2700_v35 = vadd.f32 %v2699_v34, %v2660_v33  ;;  %v5653_v36 = vpop.f32.mrb[69].mxu1 }
0x1a03   : > { %v2702_v37 = vpop.f32.mrb[70].mxu1 }
0x1a04   : > { %v6715_v39 = vpack.c.bf16 %v2700_v35, %v2700_v35  ;;  %v5654_v40 = vpop.f32.mrb[71].mxu1 }
0x1a06   : > { %2818 = vrot.lane.b32.xlu0 %v6715_v39, %s6104_s17  ;;  %v2711_v41 = vsel %vm438_vm2, %v6715_v39, 0 }
0x1a07   : > { %5656 = vmatpush3.bf16.xpose.msra.mxu0 %v2711_v41 }
0x1a08   : > { %5667 = vmatprep.subr.bf16.mxu0 %v6102_v8 }
0x1a0a   : > { %2928 = vrot.lane.b32.xlu0 %v6715_v39, %s6108_s21 }
0x1a0e   : > { %3038 = vrot.lane.b32.xlu0 %v6715_v39, %s6110_s23 }
0x1a11   : > { %v2645_v42 = vpop.f32.mrb[68].mxu0 }
0x1a12   : > { %v2646_v43 = vadd.f32 %v5149_v15, %v2645_v42  ;;  %v5645_v44 = vpop.f32.mrb[69].mxu0 }
0x1a13   : > { %v2648_v45 = vpop.f32.mrb[70].mxu0 }
0x1a14   : > { %v2705_v46 = vpack.c.bf16 %v2646_v43, %v2646_v43  ;;  %v5646_v47 = vpop.f32.mrb[71].mxu0 }
0x1a16   : > { %2816 = vrot.lane.b32.xlu1 %v2705_v46, %s6104_s17  ;;  %5658 = vmatmul.mubr.msk.bf16.vlgmr.msra.gmra.mrb[72].mxu0 %vm438_vm2, %v2705_v46 }
0x1a17   : > { %5669 = vmatprep.mubr.msk.bf16.mxu0 %vm6103_vm1, %v6102_v8 }
0x1a1a   : > { %2926 = vrot.lane.b32.xlu1 %v2705_v46, %s6108_s21 }
0x1a1e   : > { %3036 = vrot.lane.b32.xlu1 %v2705_v46, %s6110_s23 }
0x1a78   : > { %v2819_v48 = vpop.permute.xlu0 %2818 }
0x1a79   : > { %v2824_v49 = vsel %vm438_vm2, %v2819_v48, 0 }
0x1a7a   : > { %5668 = vmatpush3.bf16.xpose.msra.mxu0 %v2824_v49 }
0x1a7b   : > { %5679 = vmatprep.subr.bf16.mxu0 %v6102_v8 }
0x1a7c   : > { %v2929_v50 = vpop.permute.xlu0 %2928 }
0x1a7d   : > { %v2934_v54 = vsel %vm438_vm2, %v2929_v50, 0 }
0x1a80   : > { %v3039_v9 = vpop.permute.xlu0 %3038 }
0x1a81   : > { %v3044_v55 = vsel %vm438_vm2, %v3039_v9, 0 }
0x1a88   : > { %v2817_v53 = vpop.permute.xlu1 %2816 }
0x1a89   : > { %5670 = vmatmul.mubr.msk.bf16.vlgmr.msra.gmra.mrb[76].mxu0 %vm438_vm2, %v2817_v53 }
0x1a8a   : > { %5680 = vmatpush3.bf16.xpose.msra.mxu0 %v2934_v54  ;;  %5681 = vmatprep.mubr.msk.bf16.mxu0 %vm6103_vm1, %v6102_v8 }
0x1a8b   : > { %5691 = vmatprep.subr.bf16.mxu0 %v6102_v8 }
0x1a8c   : > { %v2927_v5 = vpop.permute.xlu1 %2926 }
0x1a90   : > { %v3037_v56 = vpop.permute.xlu1 %3036 }
0x1a91   : > { %5682 = vmatmul.mubr.msk.bf16.vlgmr.msra.gmra.mrb[80].mxu0 %vm438_vm2, %v2927_v5 }
0x1a92   : > { %5692 = vmatpush3.bf16.xpose.msra.mxu0 %v3044_v55  ;;  %5693 = vmatprep.mubr.msk.bf16.mxu0 %vm6103_vm1, %v6102_v8 }
0x1a93   : > { %5703 = vmatprep.subr.bf16.mxu0 %v6102_v8 }
0x1a99   : > { %5694 = vmatmul.mubr.msk.bf16.vlgmr.msra.gmra.mrb[84].mxu0 %vm438_vm2, %v3037_v56 }
0x1a9a   : > { %5707 = vmatprep.mubr.msk.bf16.mxu0 %vm6103_vm1, %v6102_v8 }
0x1ae9   : > { %v2747_v57 = vpop.f32.mrb[72].mxu0 }
0x1aea   : > { %v2748_v60 = vadd.f32 %v6748_v59, %v2747_v57  ;;  %v5659_v38 = vpop.f32.mrb[73].mxu0 }
0x1aeb   : > { %v2750_v62 = vpop.f32.mrb[74].mxu0 }
0x1aec   : > { %v5660_v63 = vpop.f32.mrb[75].mxu0  ;;  %v2754_v1 = vsel %vm2753_vm11, %v2748_v60, -inf }
0x1aed   : > { %2755 = vmax.xlane.f32.xlu0 %v2754_v1 }
0x1b5c   : > { %v2860_v3 = vpop.f32.mrb[76].mxu0 }
0x1b5d   : > { %v2861_v4 = vadd.f32 %v6748_v59, %v2860_v3  ;;  %v5671_v52 = vpop.f32.mrb[77].mxu0 }
0x1b5e   : > { %v2863_v6 = vpop.f32.mrb[78].mxu0 }
0x1b5f   : > { %v5672_v7 = vpop.f32.mrb[79].mxu0  ;;  %v2866_v58 = vsel %vm2753_vm11, %v2861_v4, -inf }
0x1b60   : > { %2867 = vmax.xlane.f32.xlu1 %v2866_v58 }
0x1b64   : > { %v2970_v10 = vpop.f32.mrb[80].mxu0 }
0x1b65   : > { %v2971_v11 = vadd.f32 %v6748_v59, %v2970_v10  ;;  %v5683_v12 = vpop.f32.mrb[81].mxu0 }
0x1b66   : > { %v2973_v13 = vpop.f32.mrb[82].mxu0 }
0x1b67   : > { %v5684_v15 = vpop.f32.mrb[83].mxu0  ;;  %v2976_v16 = vsel %vm2753_vm11, %v2971_v11, -inf }
0x1b68   : > { %2977 = vmax.xlane.f32.xlu0 %v2976_v16 }
0x1b6c   : > { %v3080_v51 = vpop.f32.mrb[84].mxu0 }
0x1b6d   : > { %v3081_v17 = vadd.f32 %v6748_v59, %v3080_v51  ;;  %v5695_v14 = vpop.f32.mrb[85].mxu0  ;;  %v5948_v51 = vld [vmem:[%s7177_s0 + $0xd8] sm:$0xff]  }
0x1b6e   : > { %v3083_v18 = vpop.f32.mrb[86].mxu0 }
0x1b6f   : > { %v5696_v19 = vpop.f32.mrb[87].mxu0  ;;  %v3086_v20 = vsel %vm2753_vm11, %v3081_v17, -inf }
0x1b70   : > { %3087 = vmax.xlane.f32.xlu0 %v3086_v20 }
0x1b7a   : > { %v2756_v21 = vpop.xlane.xlu0 %2755 }
0x1b7b   : > { %v2757_v22 = vsub.f32 %v2748_v60, %v2756_v21 }
0x1b7d   : > { %v2758_v0 = vmul.f32 1.442695, %v2757_v22 }
0x1b7f   : > { %6033 = vpow2.f32 %v2758_v0 }
0x1b89   : > { %v6034_v23 = vpop.eup %6033 }
0x1b8a   : > { %v2760_v24 = vsel %vm2753_vm11, %v6034_v23, 0.0 }
0x1b8b   : > { %2761 = vadd.xlane.f32.xlu1 %v2760_v24 }
0x1b9c   : > { %2767 = vrot.lane.b32.xlu1 %v6715_v39, %s6105_s18 }
0x1bed   : > { %v2868_v27 = vpop.xlane.xlu1 %2867 }
0x1bee   : > { %v2869_v28 = vsub.f32 %v2861_v4, %v2868_v27 }
0x1bf0   : > { %v2870_v25 = vmul.f32 1.442695, %v2869_v28 }
0x1bf2   : > { %6035 = vpow2.f32 %v2870_v25 }
0x1bf5   : > { %v2978_v29 = vpop.xlane.xlu0 %2977 }
0x1bf6   : > { %v2979_v30 = vsub.f32 %v2971_v11, %v2978_v29  ;;  %v5947_v11 = vld [vmem:[%s7177_s0 + $0xd0] sm:$0xff]  }
0x1bf7   : > { %5704 = vmatpush3.bf16.msra.mxu0 %v5947_v11 }
0x1bf8   : > { %v2980_v31 = vmul.f32 1.442695, %v2979_v30  ;;  %5705 = vmatprep.subr.bf16.mxu0 %v6102_v8 }
0x1bfa   : > { %6037 = vpow2.f32 %v2980_v31  ;;  %v5162_v31 = vld [vmem:[%s7178_s1 + $0x17] ss:$0 sm:$0xff] }
0x1bfb   : > { %5706 = vmatpush3.bf16.msra.mxu0 %v5948_v51 }
0x1bfc   : > { %v6036_v32 = vpop.eup %6035  ;;  %5719 = vmatprep.subr.bf16.mxu0 %v6102_v8 }
0x1bfd   : > { %v3088_v33 = vpop.xlane.xlu0 %3087  ;;  %v2872_v34 = vsel %vm2753_vm11, %v6036_v32, 0.0 }
0x1bfe   : > { %v3089_v35 = vsub.f32 %v3081_v17, %v3088_v33  ;;  %2873 = vadd.xlane.f32.xlu0 %v2872_v34 }
0x1c00   : > { %v3090_v36 = vmul.f32 1.442695, %v3089_v35 }
0x1c02   : > { %6039 = vpow2.f32 %v3090_v36 }
0x1c04   : > { %v6038_v37 = vpop.eup %6037 }
0x1c05   : > { %v2982_v40 = vsel %vm2753_vm11, %v6038_v37, 0.0 }
0x1c06   : > { %2983 = vadd.xlane.f32.xlu1 %v2982_v40 }
0x1c0c   : > { %v6040_v41 = vpop.eup %6039 }
0x1c0d   : > { %v3092_v42 = vsel %vm2753_vm11, %v6040_v41, 0.0 }
0x1c0e   : > { %3093 = vadd.xlane.f32.xlu0 %v3092_v42 }
0x1c17   : > { %2988 = vrot.lane.b32.xlu1 %v6715_v39, %s6107_s20 }
0x1c18   : > { %v2762_v43 = vpop.xlane.xlu1 %2761 }
0x1c19   : > { %6041 = vrcp.f32 %v2762_v43 }
0x1c1b   : > { %3098 = vrot.lane.b32.xlu1 %v6715_v39, %s6109_s22 }
0x1c1c   : > { %v2768_v44 = vpop.permute.xlu1 %2767 }
0x1c1d   : > { %v2773_v45 = vsel %vm502_vm3, %v2768_v44, 0 }
0x1c1e   : > { %5662 = vmatpush3.bf16.msra.mxu1 %v2773_v45 }
0x1c1f   : > { %5673 = vmatprep.subr.bf16.mxu1 %v6102_v8 }
0x1c23   : > { %v6042_v46 = vpop.eup %6041 }
0x1c24   : > { %v2764_v47 = vmul.f32 %v6042_v46, %v6034_v23  ;;  %2878 = vrot.lane.b32.xlu0 %v6715_v39, %s6106_s19  ;;  %v5949_v46 = vld [vmem:[%s7177_s0 + $0xe0] sm:$0xff]  }
0x1c26   : > { %v2765_v48 = vpack.c.bf16 %v2764_v47, %v2764_v47  ;;  %v5951_v47 = vld [vmem:[%s7177_s0 + $0xf0] sm:$0xff]  }
0x1c28   : > { %5664 = vmatmul.mubr.msk.bf16.vlgmr.msra.gmra.mrb[72].mxu1 %vm438_vm2, %v2765_v48  ;;  %v5952_v48 = vld [vmem:[%s7177_s0 + $0xf8] sm:$0xff]  }
0x1c29   : > { %5675 = vmatprep.mubr.msk.bf16.mxu1 %vm6103_vm1, %v6102_v8 }
0x1c8b   : > { %v2874_v49 = vpop.xlane.xlu0 %2873 }
0x1c8c   : > { %6043 = vrcp.f32 %v2874_v49 }
0x1c93   : > { %v2984_v50 = vpop.xlane.xlu1 %2983 }
0x1c94   : > { %6045 = vrcp.f32 %v2984_v50 }
0x1c96   : > { %v6044_v53 = vpop.eup %6043 }
0x1c97   : > { %v2876_v9 = vmul.f32 %v6044_v53, %v6036_v32  ;;  %v2989_v56 = vpop.permute.xlu1 %2988 }
0x1c98   : > { %v2994_v60 = vsel %vm502_vm3, %v2989_v56, 0 }
0x1c99   : > { %v2877_v39 = vpack.c.bf16 %v2876_v9, %v2876_v9  ;;  %v5166_v9 = vld [vmem:[%s7178_s1 + $0x18] ss:$0 sm:$0xff] }
0x1c9b   : > { %v3094_v54 = vpop.xlane.xlu0 %3093  ;;  %v3099_v62 = vpop.permute.xlu1 %3098 }
0x1c9c   : > { %6047 = vrcp.f32 %v3094_v54  ;;  %v3104_v3 = vsel %vm502_vm3, %v3099_v62, 0  ;;  %v5168_v62 = vld [vmem:[%s7178_s1 + $0x1a] ss:$0 sm:$0xff] }
0x1c9e   : > { %v6046_v57 = vpop.eup %6045 }
0x1c9f   : > { %v2879_v5 = vpop.permute.xlu0 %2878  ;;  %v2986_v38 = vmul.f32 %v6046_v57, %v6038_v37 }
0x1ca0   : > { %v2884_v55 = vsel %vm502_vm3, %v2879_v5, 0 }
0x1ca1   : > { %5674 = vmatpush3.bf16.msra.mxu1 %v2884_v55  ;;  %v2987_v63 = vpack.c.bf16 %v2986_v38, %v2986_v38  ;;  %v5167_v55 = vld [vmem:[%s7178_s1 + $0x19] ss:$0 sm:$0xff]  ;;  %v5954_v38 = vld [vmem:[%s7177_s0 + $0x108] sm:$0xff]  }
0x1ca2   : > { %5685 = vmatprep.subr.bf16.mxu1 %v6102_v8 }
0x1ca4   : > { %5676 = vmatmul.mubr.msk.bf16.vlgmr.msra.gmra.mrb[76].mxu1 %vm438_vm2, %v2877_v39 }
0x1ca5   : > { %5686 = vmatpush3.bf16.msra.mxu1 %v2994_v60  ;;  %5687 = vmatprep.mubr.msk.bf16.mxu1 %vm6103_vm1, %v6102_v8  ;;  %v5953_v60 = vld [vmem:[%s7177_s0 + $0x100] sm:$0xff]  }
0x1ca6   : > { %5697 = vmatprep.subr.bf16.mxu1 %v6102_v8  ;;  %v6048_v1 = vpop.eup %6047 }
0x1ca7   : > { %v3096_v4 = vmul.f32 %v6048_v1, %v6040_v41 }
0x1ca9   : > { %v3097_v52 = vpack.c.bf16 %v3096_v4, %v3096_v4 }
0x1cac   : > { %5688 = vmatmul.mubr.msk.bf16.vlgmr.msra.gmra.mrb[80].mxu1 %vm438_vm2, %v2987_v63 }
0x1cad   : > { %5698 = vmatpush3.bf16.msra.mxu1 %v3104_v3  ;;  %5699 = vmatprep.mubr.msk.bf16.mxu1 %vm6103_vm1, %v6102_v8 }
0x1cae   : > { %5711 = vmatprep.subr.bf16.mxu1 %v6102_v8 }
0x1cb4   : > { %5700 = vmatmul.mubr.msk.bf16.vlgmr.msra.gmra.mrb[84].mxu1 %vm438_vm2, %v3097_v52 }
0x1cb5   : > { %5715 = vmatprep.mubr.msk.bf16.mxu1 %vm6103_vm1, %v6102_v8  ;;  %5712 = vmatpush3.bf16.msra.mxu1 %v5949_v46 }
0x1cb6   : > { %5713 = vmatprep.subr.bf16.mxu1 %v6102_v8 }
0x1cfb   : > { %v2809_v6 = vpop.f32.mrb[72].mxu1 }
0x1cfc   : > { %v5665_v7 = vpop.f32.mrb[73].mxu1 }
0x1cfd   : > { %v2812_v58 = vpop.f32.mrb[74].mxu1 }
0x1cfe   : > { %v5666_v10 = vpop.f32.mrb[75].mxu1  ;;  %v5172_v58 = vld [vmem:[%s7178_s1 + $0x1b] ss:$0 sm:$0xff] }
0x1d77   : > { %v2920_v12 = vpop.f32.mrb[76].mxu1 }
0x1d78   : > { %3147 = vrot.lane.b32.xlu0 %v2920_v12, %s7199_s12  ;;  %v5677_v13 = vpop.f32.mrb[77].mxu1 }
0x1d79   : > { %v2923_v15 = vpop.f32.mrb[78].mxu1 }
0x1d7a   : > { %v5678_v16 = vpop.f32.mrb[79].mxu1 }
0x1d7f   : > { %v3030_v17 = vpop.f32.mrb[80].mxu1 }
0x1d80   : > { %3151 = vrot.lane.b32.xlu1 %v3030_v17, %s7196_s13  ;;  %v5689_v14 = vpop.f32.mrb[81].mxu1 }
0x1d81   : > { %v3033_v18 = vpop.f32.mrb[82].mxu1 }
0x1d82   : > { %v5690_v19 = vpop.f32.mrb[83].mxu1 }
0x1d87   : > { %v3140_v20 = vpop.f32.mrb[84].mxu1 }
0x1d88   : > { %3155 = vrot.lane.b32.xlu0 %v3140_v20, %s7197_s14  ;;  %v5701_v21 = vpop.f32.mrb[85].mxu1 }
0x1d89   : > { %v3143_v22 = vpop.f32.mrb[86].mxu1  ;;  %v5955_v21 = vld [vmem:[%s7177_s0 + $0x110] sm:$0xff]  }
0x1d8a   : > { %v5702_v0 = vpop.f32.mrb[87].mxu1  ;;  %v5956_v22 = vld [vmem:[%s7177_s0 + $0x118] sm:$0xff]  }
0x1dea   : > { %v3148_v23 = vpop.permute.xlu0 %3147 }
0x1deb   : > { %v3158_v27 = vsel %vm438_vm2, %v2809_v6, %v3148_v23 }
0x1df2   : > { %v3152_v24 = vpop.permute.xlu1 %3151 }
0x1df3   : > { %v3159_v28 = vsel %vm889_vm4, %v3158_v27, %v3152_v24 }
0x1dfa   : > { %v3156_v25 = vpop.permute.xlu0 %3155 }
0x1dfb   : > { %v3160_v29 = vsel %vm891_vm5, %v3159_v28, %v3156_v25  ;;  %v5178_v28 = vld [vmem:[%s7178_s1 + $0x1c] ss:$0 sm:$0xff] }
0x1dfc   : > { %v3165_v30 = vpack.c.bf16 %v3160_v29, %v3160_v29  ;;  %v5179_v29 = vld [vmem:[%s7178_s1 + $0x1d] ss:$0 sm:$0xff] }
0x1dfe   : > { %5708 = vmatmul.mubr.msk.bf16.vlgmr.msra.gmra.mrb[88].mxu0 %vm338_vm0, %v3165_v30 }
0x1dff   : > { %5727 = vmatprep.mubr.msk.bf16.mxu0 %vm6103_vm1, %v6102_v8  ;;  %5720 = vmatpush3.bf16.msra.mxu0 %v5951_v47 }
0x1e00   : > { %5721 = vmatprep.subr.bf16.mxu0 %v6102_v8 }
0x1e03   : > { %5722 = vmatpush3.bf16.msra.mxu0 %v5952_v48 }
0x1e04   : > { %5723 = vmatprep.subr.bf16.mxu0 %v6102_v8 }
0x1e07   : > { %5724 = vmatpush3.bf16.msra.mxu0 %v5953_v60 }
0x1e08   : > { %5725 = vmatprep.subr.bf16.mxu0 %v6102_v8 }
0x1e0b   : > { %5726 = vmatpush3.bf16.msra.mxu0 %v5954_v38 }
0x1e0c   : > { %5745 = vmatprep.subr.bf16.mxu0 %v6102_v8 }
0x1ed1   : > { %v3220_v32 = vpop.f32.mrb[88].mxu0 }
0x1ed2   : > { %v3221_v33 = vadd.f32 %v5162_v31, %v3220_v32  ;;  %v5709_v34 = vpop.f32.mrb[89].mxu0 }
0x1ed3   : > { %v3223_v35 = vpop.f32.mrb[90].mxu0 }
0x1ed4   : > { %v3226_v36 = vadd.f32 %v3221_v33, %v6671_v61  ;;  %v5710_v37 = vpop.f32.mrb[91].mxu0  ;;  %v5950_v61 = vld [vmem:[%s7177_s0 + $0xe8] sm:$0xff]   ;;  %v5180_v33 = vld [vmem:[%s7178_s1 + $0x20] ss:$0 sm:$0xff] }
0x1ed5   : > { %5714 = vmatpush3.bf16.msra.mxu1 %v5950_v61 }
0x1ed6   : > { %v3229_v40 = vsel %vm1946_vm7, %v3226_v36, 0.0  ;;  %5731 = vmatprep.subr.bf16.mxu1 %v6102_v8 }
0x1ed7   : > { %3230 = vadd.xlane.f32.xlu1 %v3229_v40 }
0x1f64   : > { %v3231_v41 = vpop.xlane.xlu1 %3230 }
0x1f65   : > { %v3232_v42 = vmul.f32 0.03125, %v3231_v41 }
0x1f67   : > { %v3233_v43 = vsub.f32 %v3226_v36, %v3232_v42 }
0x1f69   : > { %v3234_v44 = vmul.f32 %v3233_v43, %v3233_v43 }
0x1f6b   : > { %v3235_v45 = vsel %vm1946_vm7, %v3234_v44, 0.0 }
0x1f6c   : > { %3236 = vadd.xlane.f32.xlu0 %v3235_v45 }
0x1ff9   : > { %v3237_v49 = vpop.xlane.xlu0 %3236 }
0x1ffa   : > { %v3238_v50 = vmul.f32 0.03125, %v3237_v49 }
0x1ffc   : > { %v3239_v53 = vadd.f32 1e-06, %v3238_v50 }
0x1ffe   : > { %6049 = vrsqrt.f32 %v3239_v53 }
0x2008   : > { %v6050_v54 = vpop.eup %6049 }
0x2009   : > { %v3241_v5 = vmul.f32 %v6050_v54, %v3233_v43 }
0x200b   : > { %v3246_v56 = vmul.f32 %v5166_v9, %v3241_v5  ;;  %v6092_v9 = vld [vmem:[%s6602_s28] sm:$0x7f]  ;;  %s7200_s28 = smov 56  }
0x200d   : > { %v3251_v39 = vadd.f32 %v5167_v55, %v3246_v56 }
0x200f   : > { %v3256_v57 = vpack.c.bf16 %v3251_v39, %v3251_v39 }
0x2011   : > { %5716 = vmatmul.mubr.msk.bf16.vlgmr.msra.gmra.mrb[88].mxu1 %vm338_vm0, %v3256_v57 }
0x2012   : > { %5735 = vmatprep.mubr.msk.bf16.mxu1 %vm6103_vm1, %v6102_v8  ;;  %5732 = vmatpush3.bf16.msra.mxu1 %v5955_v21 }
0x2013   : > { %5733 = vmatprep.subr.bf16.mxu1 %v6102_v8 }
0x2016   : > { %5734 = vmatpush3.bf16.msra.mxu1 %v5956_v22 }
0x2017   : > { %5739 = vmatprep.subr.bf16.mxu1 %v6102_v8 }
0x20e4   : > { %v3311_v63 = vpop.f32.mrb[88].mxu1 }
0x20e5   : > { %v3312_v1 = vadd.f32 %v5168_v62, %v3311_v63  ;;  %v5717_v3 = vpop.f32.mrb[89].mxu1 }
0x20e6   : > { %v3314_v4 = vpop.f32.mrb[90].mxu1 }
0x20e7   : > { %v3317_v52 = vmax.f32 %v3312_v1, 0.0  ;;  %v5718_v6 = vpop.f32.mrb[91].mxu1 }
0x20e9   : > { %v3326_v7 = vpack.c.bf16 %v3317_v52, %v3317_v52 }
0x20eb   : > { %5728 = vmatmul.mubr.msk.bf16.vlgmr.msra.gmra.mrb[92].mxu0 %vm1088_vm6, %v3326_v7 }
0x20ec   : > { %5747 = vmatprep.mubr.msk.bf16.mxu0 %vm6103_vm1, %v6102_v8 }
0x21be   : > { %v3393_v10 = vpop.f32.mrb[92].mxu0 }
0x21bf   : > { %v3394_v11 = vadd.f32 %v5172_v58, %v3393_v10  ;;  %v5729_v12 = vpop.f32.mrb[93].mxu0 }
0x21c0   : > { %v3396_v13 = vpop.f32.mrb[94].mxu0 }
0x21c1   : > { %v6855_v15 = vadd.f32 %v3394_v11, %v3226_v36  ;;  %v5730_v16 = vpop.f32.mrb[95].mxu0 }
0x21c3   : > { %v3402_v51 = vsel %vm1946_vm7, %v6855_v15, 0.0 }
0x21c4   : > { %3403 = vadd.xlane.f32.xlu0 %v3402_v51 }
0x2251   : > { %v3404_v17 = vpop.xlane.xlu0 %3403 }
0x2252   : > { %v3405_v14 = vmul.f32 0.03125, %v3404_v17 }
0x2254   : > { %v3406_v18 = vsub.f32 %v6855_v15, %v3405_v14 }
0x2256   : > { %v3407_v19 = vmul.f32 %v3406_v18, %v3406_v18 }
0x2258   : > { %v3408_v20 = vsel %vm1946_vm7, %v3407_v19, 0.0 }
0x2259   : > { %3409 = vadd.xlane.f32.xlu1 %v3408_v20 }
0x22e6   : > { %v3410_v0 = vpop.xlane.xlu1 %3409 }
0x22e7   : > { %v3411_v23 = vmul.f32 0.03125, %v3410_v0 }
0x22e9   : > { %v3412_v24 = vadd.f32 1e-06, %v3411_v23 }
0x22eb   : > { %6051 = vrsqrt.f32 %v3412_v24 }
0x22f5   : > { %v6052_v27 = vpop.eup %6051 }
0x22f6   : > { %v3414_v25 = vmul.f32 %v6052_v27, %v3406_v18 }
0x22f8   : > { %v3419_v30 = vmul.f32 %v5178_v28, %v3414_v25 }
0x22fa   : > { %v3424_v31 = vadd.f32 %v5179_v29, %v3419_v30 }
0x22fc   : > { %v3429_v32 = vpack.c.bf16 %v3424_v31, %v3424_v31 }
0x22fe   : > { %5736 = vmatmul.mubr.msk.bf16.vlgmr.msra.gmra.mrb[92].mxu1 %vm338_vm0, %v3429_v32 }
0x22ff   : > { %5741 = vmatprep.mubr.msk.bf16.mxu1 %vm6103_vm1, %v6102_v8 }
0x23d1   : > { %v3484_v34 = vpop.f32.mrb[92].mxu1 }
0x23d2   : > { %v3485_v35 = vadd.f32 %v5180_v33, %v3484_v34  ;;  %v5737_v36 = vpop.f32.mrb[93].mxu1 }
0x23d3   : > { %v3487_v37 = vpop.f32.mrb[94].mxu1 }
0x23d4   : > { %v6881_v40 = vpack.c.bf16 %v3485_v35, %v3485_v35  ;;  %v5738_v41 = vpop.f32.mrb[95].mxu1 }
0x23d6   : > { %3602 = vrot.lane.b32.xlu1 %v6881_v40, %s6106_s19  ;;  %3492 = vrot.lane.b32.xlu0 %v6881_v40, %s6105_s18 }
0x23da   : > { %3600 = vrot.lane.b32.xlu1 %v6881_v40, %s6104_s17  ;;  %3712 = vrot.lane.b32.xlu0 %v6881_v40, %s6107_s20 }
0x23de   : > { %3710 = vrot.lane.b32.xlu1 %v6881_v40, %s6108_s21  ;;  %3822 = vrot.lane.b32.xlu0 %v6881_v40, %s6109_s22 }
0x23e2   : > { %3820 = vrot.lane.b32.xlu1 %v6881_v40, %s6110_s23 }
0x2448   : > { %v3493_v42 = vpop.permute.xlu0 %3492  ;;  %v3603_v44 = vpop.permute.xlu1 %3602 }
0x2449   : > { %v3498_v43 = vsel %vm438_vm2, %v3493_v42, 0  ;;  %v3608_v45 = vsel %vm438_vm2, %v3603_v44, 0 }
0x244a   : > { %5740 = vmatpush3.bf16.xpose.msra.mxu1 %v3498_v43 }
0x244b   : > { %5751 = vmatprep.subr.bf16.mxu1 %v6102_v8 }
0x244c   : > { %v3713_v46 = vpop.permute.xlu0 %3712  ;;  %v3601_v61 = vpop.permute.xlu1 %3600 }
0x244d   : > { %v3718_v47 = vsel %vm438_vm2, %v3713_v46, 0 }
0x2450   : > { %v3823_v48 = vpop.permute.xlu0 %3822  ;;  %v3711_v49 = vpop.permute.xlu1 %3710 }
0x2451   : > { %5742 = vmatmul.mubr.msk.bf16.vlgmr.msra.gmra.mrb[96].mxu1 %vm438_vm2, %v6881_v40  ;;  %v3828_v50 = vsel %vm438_vm2, %v3823_v48, 0 }
0x2452   : > { %5752 = vmatpush3.bf16.xpose.msra.mxu1 %v3608_v45  ;;  %5753 = vmatprep.mubr.msk.bf16.mxu1 %vm6103_vm1, %v6102_v8 }
0x2453   : > { %5763 = vmatprep.subr.bf16.mxu1 %v6102_v8 }
0x2454   : > { %v3821_v53 = vpop.permute.xlu1 %3820 }
0x2459   : > { %5754 = vmatmul.mubr.msk.bf16.vlgmr.msra.gmra.mrb[100].mxu1 %vm438_vm2, %v3601_v61 }
0x245a   : > { %5764 = vmatpush3.bf16.xpose.msra.mxu1 %v3718_v47  ;;  %5765 = vmatprep.mubr.msk.bf16.mxu1 %vm6103_vm1, %v6102_v8 }
0x245b   : > { %5775 = vmatprep.subr.bf16.mxu1 %v6102_v8 }
0x2461   : > { %5766 = vmatmul.mubr.msk.bf16.vlgmr.msra.gmra.mrb[104].mxu1 %vm438_vm2, %v3711_v49 }
0x2462   : > { %5776 = vmatpush3.bf16.xpose.msra.mxu1 %v3828_v50  ;;  %5777 = vmatprep.mubr.msk.bf16.mxu1 %vm6103_vm1, %v6102_v8 }
0x2463   : > { %5787 = vmatprep.subr.bf16.mxu1 %v6102_v8 }
0x2469   : > { %5778 = vmatmul.mubr.msk.bf16.vlgmr.msra.gmra.mrb[108].mxu1 %vm438_vm2, %v3821_v53 }
0x246a   : > { %5791 = vmatprep.mubr.msk.bf16.mxu1 %vm6103_vm1, %v6102_v8 }
0x2524   : > { %v3534_v54 = vpop.f32.mrb[96].mxu1 }
0x2525   : > { %v3535_v5 = vadd.f32 %v6092_v9, %v3534_v54  ;;  %v5743_v55 = vpop.f32.mrb[97].mxu1 }
0x2526   : > { %v3537_v56 = vpop.f32.mrb[98].mxu1 }
0x2527   : > { %v5744_v39 = vpop.f32.mrb[99].mxu1  ;;  %v3540_v57 = vsel %vm2085_vm8, %v3535_v5, -inf }
0x2528   : > { %3541 = vmax.xlane.f32.xlu0 %v3540_v57 }
0x252c   : > { %v3644_v60 = vpop.f32.mrb[100].mxu1 }
0x252d   : > { %v3645_v38 = vadd.f32 %v6092_v9, %v3644_v60  ;;  %v5755_v62 = vpop.f32.mrb[101].mxu1 }
0x252e   : > { %v3647_v63 = vpop.f32.mrb[102].mxu1 }
0x252f   : > { %v5756_v1 = vpop.f32.mrb[103].mxu1  ;;  %v3650_v3 = vsel %vm2085_vm8, %v3645_v38, -inf }
0x2530   : > { %3651 = vmax.xlane.f32.xlu1 %v3650_v3 }
0x2534   : > { %v3754_v4 = vpop.f32.mrb[104].mxu1 }
0x2535   : > { %v3755_v52 = vadd.f32 %v6092_v9, %v3754_v4  ;;  %v5767_v6 = vpop.f32.mrb[105].mxu1 }
0x2536   : > { %v3757_v7 = vpop.f32.mrb[106].mxu1 }
0x2537   : > { %v5768_v58 = vpop.f32.mrb[107].mxu1  ;;  %v3760_v10 = vsel %vm2085_vm8, %v3755_v52, -inf }
0x2538   : > { %3761 = vmax.xlane.f32.xlu0 %v3760_v10  ;;  %v5957_v58 = vld [vmem:[%s7177_s0 + $0x120] sm:$0xff]   ;;  %v5958_v10 = vld [vmem:[%s7177_s0 + $0x128] sm:$0xff]  }
0x2539   : > { %5788 = vmatpush3.bf16.msra.mxu1 %v5957_v58 }
0x253a   : > { %5789 = vmatprep.subr.bf16.mxu1 %v6102_v8 }
0x253c   : > { %v3864_v11 = vpop.f32.mrb[108].mxu1 }
0x253d   : > { %v3865_v12 = vadd.f32 %v6092_v9, %v3864_v11  ;;  %v5779_v13 = vpop.f32.mrb[109].mxu1  ;;  %5790 = vmatpush3.bf16.msra.mxu1 %v5958_v10 }
0x253e   : > { %v3867_v16 = vpop.f32.mrb[110].mxu1  ;;  %5803 = vmatprep.subr.bf16.mxu1 %v6102_v8 }
0x253f   : > { %v5780_v51 = vpop.f32.mrb[111].mxu1  ;;  %v3870_v17 = vsel %vm2085_vm8, %v3865_v12, -inf }
0x2540   : > { %3871 = vmax.xlane.f32.xlu0 %v3870_v17 }
0x25b5   : > { %v3542_v14 = vpop.xlane.xlu0 %3541 }
0x25b6   : > { %v3543_v18 = vsub.f32 %v3535_v5, %v3542_v14 }
0x25b8   : > { %v3544_v19 = vmul.f32 1.442695, %v3543_v18 }
0x25ba   : > { %6053 = vpow2.f32 %v3544_v19 }
0x25bd   : > { %v3652_v20 = vpop.xlane.xlu1 %3651 }
0x25be   : > { %v3653_v21 = vsub.f32 %v3645_v38, %v3652_v20 }
0x25c0   : > { %v3654_v22 = vmul.f32 1.442695, %v3653_v21 }
0x25c2   : > { %6055 = vpow2.f32 %v3654_v22 }
0x25c4   : > { %v6054_v0 = vpop.eup %6053 }
0x25c5   : > { %v3546_v23 = vsel %vm2085_vm8, %v6054_v0, 0.0  ;;  %v3762_v28 = vpop.xlane.xlu0 %3761 }
0x25c6   : > { %3547 = vadd.xlane.f32.xlu1 %v3546_v23  ;;  %v3763_v25 = vsub.f32 %v3755_v52, %v3762_v28 }
0x25c8   : > { %v3764_v30 = vmul.f32 1.442695, %v3763_v25 }
0x25ca   : > { %6057 = vpow2.f32 %v3764_v30 }
0x25cc   : > { %v6056_v24 = vpop.eup %6055 }
0x25cd   : > { %v3656_v27 = vsel %vm2085_vm8, %v6056_v24, 0.0  ;;  %v3872_v29 = vpop.xlane.xlu0 %3871 }
0x25ce   : > { %3657 = vadd.xlane.f32.xlu0 %v3656_v27  ;;  %v3873_v31 = vsub.f32 %v3865_v12, %v3872_v29  ;;  %v5192_v27 = vld [vmem:[%s7178_s1 + $0x21] ss:$0 sm:$0xff] }
0x25d0   : > { %v3874_v32 = vmul.f32 1.442695, %v3873_v31 }
0x25d2   : > { %6059 = vpow2.f32 %v3874_v32 }
0x25d4   : > { %v6058_v33 = vpop.eup %6057 }
0x25d5   : > { %v3766_v34 = vsel %vm2085_vm8, %v6058_v33, 0.0 }
0x25d7   : > { %3662 = vrot.lane.b32.xlu1 %v6881_v40, %s7200_s28 }
0x25dc   : > { %v6060_v35 = vpop.eup %6059 }
0x25dd   : > { %v3876_v36 = vsel %vm2085_vm8, %v6060_v35, 0.0 }
0x25e4   : > { %3552 = vrot.lane.b32.xlu0 %v6881_v40, %s7201_s16 }
0x25e8   : > { %3772 = vrot.lane.b32.xlu0 %v6881_v40, %s7202_s27 }
0x25fb   : > { %3767 = vadd.xlane.f32.xlu1 %v3766_v34  ;;  %v5959_v34 = vld [vmem:[%s7177_s0 + $0x130] sm:$0xff]  }
0x25ff   : > { %3877 = vadd.xlane.f32.xlu1 %v3876_v36 }
0x2610   : > { %3882 = vrot.lane.b32.xlu1 %v6881_v40, %s7198_s11 }
0x2653   : > { %v3548_v37 = vpop.xlane.xlu1 %3547 }
0x2654   : > { %6061 = vrcp.f32 %v3548_v37 }
0x2657   : > { %v3663_v46 = vpop.permute.xlu1 %3662 }
0x2658   : > { %v3668_v47 = vand.u32 %v3663_v46, %v6622_v2 }
0x265b   : > { %v3658_v41 = vpop.xlane.xlu0 %3657 }
0x265c   : > { %6063 = vrcp.f32 %v3658_v41 }
0x265e   : > { %v6062_v42 = vpop.eup %6061 }
0x265f   : > { %v3550_v43 = vmul.f32 %v6062_v42, %v6054_v0  ;;  %v3553_v44 = vpop.permute.xlu0 %3552 }
0x2660   : > { %v3558_v45 = vand.u32 %v3553_v44, %v6622_v2 }
0x2661   : > { %v3551_v61 = vpack.c.bf16 %v3550_v43, %v3550_v43  ;;  %v5198_v43 = vld [vmem:[%s7178_s1 + $0x22] ss:$0 sm:$0xff] }
0x2662   : > { %5746 = vmatpush3.bf16.msra.mxu0 %v3558_v45 }
0x2663   : > { %5757 = vmatprep.subr.bf16.mxu0 %v6102_v8  ;;  %v3773_v49 = vpop.permute.xlu0 %3772 }
0x2664   : > { %v3778_v53 = vand.u32 %v3773_v49, %v6622_v2 }
0x2665   : > { %5748 = vmatmul.mubr.msk.bf16.vlgmr.msra.gmra.mrb[96].mxu0 %vm2100_vm10, %v3551_v61 }
0x2666   : > { %v6064_v48 = vpop.eup %6063  ;;  %5758 = vmatpush3.bf16.msra.mxu0 %v3668_v47  ;;  %5759 = vmatprep.mubr.msk.bf16.mxu0 %vm6103_vm1, %v6102_v8 }
0x2667   : > { %v3660_v40 = vmul.f32 %v6064_v48, %v6056_v24  ;;  %5769 = vmatprep.subr.bf16.mxu0 %v6102_v8 }
0x2669   : > { %v3661_v50 = vpack.c.bf16 %v3660_v40, %v3660_v40  ;;  %v5196_v40 = vld [vmem:[%s7178_s1 + $0x1e] ss:$0 sm:$0xff] }
0x266d   : > { %5760 = vmatmul.mubr.msk.bf16.vlgmr.msra.gmra.mrb[100].mxu0 %vm2100_vm10, %v3661_v50  ;;  %v5197_v50 = vld [vmem:[%s7178_s1 + $0x1f] ss:$0 sm:$0xff] }
0x266e   : > { %5770 = vmatpush3.bf16.msra.mxu0 %v3778_v53  ;;  %5771 = vmatprep.mubr.msk.bf16.mxu0 %vm6103_vm1, %v6102_v8 }
0x266f   : > { %5781 = vmatprep.subr.bf16.mxu0 %v6102_v8 }
0x2688   : > { %v3768_v54 = vpop.xlane.xlu1 %3767 }
0x2689   : > { %6065 = vrcp.f32 %v3768_v54 }
0x268c   : > { %v3878_v9 = vpop.xlane.xlu1 %3877 }
0x268d   : > { %6067 = vrcp.f32 %v3878_v9 }
0x2690   : > { %v3883_v56 = vpop.permute.xlu1 %3882 }
0x2691   : > { %v3888_v60 = vand.u32 %v3883_v56, %v6622_v2 }
0x2693   : > { %v6066_v5 = vpop.eup %6065 }
0x2694   : > { %v3770_v55 = vmul.f32 %v6066_v5, %v6058_v33 }
0x2696   : > { %v3771_v39 = vpack.c.bf16 %v3770_v55, %v3770_v55 }
0x2697   : > { %v6068_v57 = vpop.eup %6067 }
0x2698   : > { %5772 = vmatmul.mubr.msk.bf16.vlgmr.msra.gmra.mrb[104].mxu0 %vm2100_vm10, %v3771_v39  ;;  %v3880_v38 = vmul.f32 %v6068_v57, %v6060_v35  ;;  %v5960_v35 = vld [vmem:[%s7177_s0 + $0x138] sm:$0xff]  }
0x2699   : > { %5782 = vmatpush3.bf16.msra.mxu0 %v3888_v60  ;;  %5783 = vmatprep.mubr.msk.bf16.mxu0 %vm6103_vm1, %v6102_v8 }
0x269a   : > { %5795 = vmatprep.subr.bf16.mxu0 %v6102_v8  ;;  %v3881_v62 = vpack.c.bf16 %v3880_v38, %v3880_v38 }
0x26a0   : > { %5784 = vmatmul.mubr.msk.bf16.vlgmr.msra.gmra.mrb[108].mxu0 %vm2100_vm10, %v3881_v62 }
0x26a1   : > { %5799 = vmatprep.mubr.msk.bf16.mxu0 %vm6103_vm1, %v6102_v8  ;;  %5796 = vmatpush3.bf16.msra.mxu0 %v5959_v34 }
0x26a2   : > { %5797 = vmatprep.subr.bf16.mxu0 %v6102_v8 }
0x26a5   : > { %5798 = vmatpush3.bf16.msra.mxu0 %v5960_v35 }
0x26a6   : > { %5811 = vmatprep.subr.bf16.mxu0 %v6102_v8 }
0x2738   : > { %v3594_v63 = vpop.f32.mrb[96].mxu0 }
0x2739   : > { %v5749_v1 = vpop.f32.mrb[97].mxu0 }
0x273a   : > { %v3597_v3 = vpop.f32.mrb[98].mxu0 }
0x273b   : > { %v5750_v4 = vpop.f32.mrb[99].mxu0 }
0x2740   : > { %v3704_v2 = vpop.f32.mrb[100].mxu0 }
0x2741   : > { %3931 = vrot.lane.b32.xlu0 %v3704_v2, %s7199_s12  ;;  %v5761_v52 = vpop.f32.mrb[101].mxu0 }
0x2742   : > { %v3707_v6 = vpop.f32.mrb[102].mxu0 }
0x2743   : > { %v5762_v7 = vpop.f32.mrb[103].mxu0 }
0x276b   : > { %v3814_v11 = vpop.f32.mrb[104].mxu0 }
0x276c   : > { %3935 = vrot.lane.b32.xlu1 %v3814_v11, %s7196_s13  ;;  %v5773_v12 = vpop.f32.mrb[105].mxu0 }
0x276d   : > { %v3817_v13 = vpop.f32.mrb[106].mxu0 }
0x276e   : > { %v5774_v16 = vpop.f32.mrb[107].mxu0 }
0x2773   : > { %v3924_v51 = vpop.f32.mrb[108].mxu0 }
0x2774   : > { %3939 = vrot.lane.b32.xlu0 %v3924_v51, %s7197_s14  ;;  %v5785_v17 = vpop.f32.mrb[109].mxu0 }
0x2775   : > { %v3927_v14 = vpop.f32.mrb[110].mxu0 }
0x2776   : > { %v5786_v18 = vpop.f32.mrb[111].mxu0 }
0x27b3   : > { %v3932_v19 = vpop.permute.xlu0 %3931 }
0x27b4   : > { %v3942_v21 = vsel %vm438_vm2, %v3594_v63, %v3932_v19 }
0x27de   : > { %v3936_v20 = vpop.permute.xlu1 %3935 }
0x27df   : > { %v3943_v22 = vsel %vm889_vm4, %v3942_v21, %v3936_v20 }
0x27e6   : > { %v3940_v0 = vpop.permute.xlu0 %3939 }
0x27e7   : > { %v3944_v23 = vsel %vm891_vm5, %v3943_v22, %v3940_v0 }
0x27e8   : > { %v3949_v24 = vpack.c.bf16 %v3944_v23, %v3944_v23 }
0x27ea   : > { %5792 = vmatmul.mubr.msk.bf16.vlgmr.msra.gmra.mrb[112].mxu1 %vm338_vm0, %v3949_v24 }
0x27eb   : > { %5807 = vmatprep.mubr.msk.bf16.mxu1 %vm6103_vm1, %v6102_v8 }
0x28bd   : > { %v4004_v28 = vpop.f32.mrb[112].mxu1 }
0x28be   : > { %v4005_v25 = vadd.f32 %v5192_v27, %v4004_v28  ;;  %v5793_v29 = vpop.f32.mrb[113].mxu1 }
0x28bf   : > { %v4007_v30 = vpop.f32.mrb[114].mxu1 }
0x28c0   : > { %v6976_v31 = vadd.f32 %v4005_v25, %v6855_v15  ;;  %v5794_v32 = vpop.f32.mrb[115].mxu1  ;;  %v6093_v25 = vld [vmem:[%s6250_s29] ss:$0 sm:$0xff] }
0x28c2   : > { %v4013_v33 = vsel %vm1946_vm7, %v6976_v31, 0.0 }
0x28c3   : > { %4014 = vadd.xlane.f32.xlu1 %v4013_v33 }
0x28d4   : > { %4103 = vrot.lane.b32.xlu1 %v5960_v35, %s6105_s18 }
0x28d8   : > { %4108 = vrot.lane.b32.xlu1 %v5198_v43, %s6105_s18 }
0x2950   : > { %v4015_v15 = vpop.xlane.xlu1 %4014 }
0x2951   : > { %v4016_v36 = vmul.f32 0.03125, %v4015_v15 }
0x2953   : > { %v4017_v37 = vsub.f32 %v6976_v31, %v4016_v36 }
0x2954   : > { %v4104_v47 = vpop.permute.xlu1 %4103 }
0x2955   : > { %v4018_v41 = vmul.f32 %v4017_v37, %v4017_v37 }
0x2957   : > { %v4019_v42 = vsel %vm1946_vm7, %v4018_v41, 0.0 }
0x2958   : > { %4020 = vadd.xlane.f32.xlu0 %v4019_v42 }
0x296e   : > { %4101 = vrot.lane.b32.xlu0 %v5959_v34, %s6105_s18 }
0x29e5   : > { %v4021_v44 = vpop.xlane.xlu0 %4020 }
0x29e6   : > { %v4022_v45 = vmul.f32 0.03125, %v4021_v44 }
0x29e8   : > { %v4023_v46 = vadd.f32 1e-06, %v4022_v45 }
0x29e9   : > { %v4102_v61 = vpop.permute.xlu0 %4101 }
0x29ea   : > { %6069 = vrsqrt.f32 %v4023_v46  ;;  %5804 = vmatpush3.bf16.msra.mxu1 %v4102_v61 }
0x29eb   : > { %5805 = vmatprep.subr.bf16.mxu1 %v6102_v8 }
0x29ee   : > { %5806 = vmatpush3.bf16.msra.mxu1 %v4104_v47 }
0x29ef   : > { %5817 = vmatprep.subr.bf16.mxu1 %v6102_v8 }
0x29f1   : > { %5808 = vmatmul.mubr.msk.bf16.vlgmr.msra.gmra.mrb[116].mxu1 %vm338_vm0, %v6699_v26  ;;  %v4109_v26 = vpop.permute.xlu1 %4108 }
0x29f2   : > { %5819 = vmatprep.mubr.msk.bf16.mxu1 %vm6103_vm1, %v6102_v8 }
0x29f4   : > { %v6070_v48 = vpop.eup %6069 }
0x29f5   : > { %v4025_v49 = vmul.f32 %v6070_v48, %v4017_v37 }
0x29f7   : > { %v4030_v53 = vmul.f32 %v5196_v40, %v4025_v49 }
0x29f9   : > { %v4035_v54 = vadd.f32 %v5197_v50, %v4030_v53 }
0x29fb   : > { %v4041_v9 = vpack.c.bf16 %v4035_v54, %v4035_v54 }
0x29fd   : > { %5800 = vmatmul.mubr.msk.bf16.vlgmr.msra.gmra.mrb[112].mxu0 %vm338_vm0, %v4041_v9 }
0x29fe   : > { %5813 = vmatprep.mubr.msk.bf16.mxu0 %vm6103_vm1, %v6102_v8 }
0x2ac4   : > { %v4145_v5 = vpop.f32.mrb[116].mxu1 }
0x2ac5   : > { %v4146_v55 = vadd.f32 %v4145_v5, %v4109_v26  ;;  %v5809_v56 = vpop.f32.mrb[117].mxu1 }
0x2ac6   : > { %v4148_v39 = vpop.f32.mrb[118].mxu1 }
0x2ac7   : > { %v7011_v57 = vpack.c.bf16 %v4146_v55, %v4146_v55  ;;  %v5810_v60 = vpop.f32.mrb[119].mxu1 }
0x2ac9   : > { %4263 = vrot.lane.b32.xlu0 %v7011_v57, %s6104_s17  ;;  %v4157_v38 = vsel %vm438_vm2, %v7011_v57, 0 }
0x2aca   : > { %5812 = vmatpush3.bf16.xpose.msra.mxu0 %v4157_v38 }
0x2acb   : > { %5823 = vmatprep.subr.bf16.mxu0 %v6102_v8 }
0x2acd   : > { %4373 = vrot.lane.b32.xlu0 %v7011_v57, %s6108_s21 }
0x2ad0   : > { %v4095_v62 = vpop.f32.mrb[112].mxu0 }
0x2ad1   : > { %v4096_v63 = vadd.f32 %v5198_v43, %v4095_v62  ;;  %4483 = vrot.lane.b32.xlu0 %v7011_v57, %s6110_s23  ;;  %v5801_v1 = vpop.f32.mrb[113].mxu0 }
0x2ad2   : > { %v4098_v3 = vpop.f32.mrb[114].mxu0 }
0x2ad3   : > { %v4151_v4 = vpack.c.bf16 %v4096_v63, %v4096_v63  ;;  %v5802_v2 = vpop.f32.mrb[115].mxu0 }
0x2ad5   : > { %4261 = vrot.lane.b32.xlu1 %v4151_v4, %s6104_s17  ;;  %5814 = vmatmul.mubr.msk.bf16.vlgmr.msra.gmra.mrb[116].mxu0 %vm438_vm2, %v4151_v4 }
0x2ad6   : > { %5825 = vmatprep.mubr.msk.bf16.mxu0 %vm6103_vm1, %v6102_v8 }
0x2ad9   : > { %4371 = vrot.lane.b32.xlu1 %v4151_v4, %s6108_s21 }
0x2add   : > { %4481 = vrot.lane.b32.xlu1 %v4151_v4, %s6110_s23 }
0x2b3b   : > { %v4264_v52 = vpop.permute.xlu0 %4263 }
0x2b3c   : > { %v4269_v6 = vsel %vm438_vm2, %v4264_v52, 0 }
0x2b3d   : > { %5824 = vmatpush3.bf16.xpose.msra.mxu0 %v4269_v6 }
0x2b3e   : > { %5835 = vmatprep.subr.bf16.mxu0 %v6102_v8 }
0x2b3f   : > { %v4374_v7 = vpop.permute.xlu0 %4373 }
0x2b40   : > { %v4379_v10 = vsel %vm438_vm2, %v4374_v7, 0 }
0x2b43   : > { %v4484_v11 = vpop.permute.xlu0 %4483 }
0x2b44   : > { %v4489_v13 = vsel %vm438_vm2, %v4484_v11, 0 }
0x2b47   : > { %v4262_v58 = vpop.permute.xlu1 %4261 }
0x2b48   : > { %5826 = vmatmul.mubr.msk.bf16.vlgmr.msra.gmra.mrb[120].mxu0 %vm438_vm2, %v4262_v58 }
0x2b49   : > { %5836 = vmatpush3.bf16.xpose.msra.mxu0 %v4379_v10  ;;  %5837 = vmatprep.mubr.msk.bf16.mxu0 %vm6103_vm1, %v6102_v8 }
0x2b4a   : > { %5847 = vmatprep.subr.bf16.mxu0 %v6102_v8 }
0x2b4b   : > { %v4372_v12 = vpop.permute.xlu1 %4371 }
0x2b4f   : > { %v4482_v16 = vpop.permute.xlu1 %4481 }
0x2b50   : > { %5838 = vmatmul.mubr.msk.bf16.vlgmr.msra.gmra.mrb[124].mxu0 %vm438_vm2, %v4372_v12 }
0x2b51   : > { %5848 = vmatpush3.bf16.xpose.msra.mxu0 %v4489_v13  ;;  %5849 = vmatprep.mubr.msk.bf16.mxu0 %vm6103_vm1, %v6102_v8 }
0x2b52   : > { %5859 = vmatprep.subr.bf16.mxu0 %v6102_v8 }
0x2b58   : > { %5850 = vmatmul.mubr.msk.bf16.vlgmr.msra.gmra.mrb[128].mxu0 %vm438_vm2, %v4482_v16 }
0x2b59   : > { %5863 = vmatprep.mubr.msk.bf16.mxu0 %vm6103_vm1, %v6102_v8 }
0x2ba8   : > { %v4193_v51 = vpop.f32.mrb[116].mxu0 }
0x2ba9   : > { %v4194_v17 = vadd.f32 %v6748_v59, %v4193_v51  ;;  %v5815_v14 = vpop.f32.mrb[117].mxu0 }
0x2baa   : > { %v4196_v18 = vpop.f32.mrb[118].mxu0 }
0x2bab   : > { %v5816_v19 = vpop.f32.mrb[119].mxu0  ;;  %v4199_v20 = vsel %vm2753_vm11, %v4194_v17, -inf }
0x2bac   : > { %4200 = vmax.xlane.f32.xlu0 %v4199_v20 }
0x2c1b   : > { %v4305_v21 = vpop.f32.mrb[120].mxu0 }
0x2c1c   : > { %v4306_v22 = vadd.f32 %v6748_v59, %v4305_v21  ;;  %v5827_v0 = vpop.f32.mrb[121].mxu0 }
0x2c1d   : > { %v4308_v23 = vpop.f32.mrb[122].mxu0 }
0x2c1e   : > { %v5828_v24 = vpop.f32.mrb[123].mxu0  ;;  %v4311_v27 = vsel %vm2753_vm11, %v4306_v22, -inf }
0x2c1f   : > { %4312 = vmax.xlane.f32.xlu1 %v4311_v27  ;;  %v5961_v27 = vld [vmem:[%s7177_s0 + $0x140] sm:$0xff]  }
0x2c20   : > { %5860 = vmatpush3.bf16.msra.mxu0 %v5961_v27 }
0x2c21   : > { %5861 = vmatprep.subr.bf16.mxu0 %v6102_v8 }
0x2c23   : > { %v4415_v28 = vpop.f32.mrb[124].mxu0 }
0x2c24   : > { %v4416_v29 = vadd.f32 %v6093_v25, %v4415_v28  ;;  %v5839_v30 = vpop.f32.mrb[125].mxu0 }
0x2c25   : > { %v4418_v32 = vpop.f32.mrb[126].mxu0 }
0x2c26   : > { %v5840_v33 = vpop.f32.mrb[127].mxu0  ;;  %v4421_v34 = vsel %vm2753_vm11, %v4416_v29, -inf  ;;  %v5962_v32 = vld [vmem:[%s7177_s0 + $0x148] sm:$0xff]  }
0x2c27   : > { %4422 = vmax.xlane.f32.xlu0 %v4421_v34  ;;  %5862 = vmatpush3.bf16.msra.mxu0 %v5962_v32 }
0x2c28   : > { %5875 = vmatprep.subr.bf16.mxu0 %v6102_v8 }
0x2c2b   : > { %v4525_v35 = vpop.f32.mrb[128].mxu0 }
0x2c2c   : > { %v4526_v15 = vadd.f32 %v6093_v25, %v4525_v35  ;;  %v5851_v36 = vpop.f32.mrb[129].mxu0 }
0x2c2d   : > { %v4528_v37 = vpop.f32.mrb[130].mxu0 }
0x2c2e   : > { %v5852_v59 = vpop.f32.mrb[131].mxu0  ;;  %v4531_v41 = vsel %vm2753_vm11, %v4526_v15, -inf }
0x2c2f   : > { %4532 = vmax.xlane.f32.xlu0 %v4531_v41 }
0x2c39   : > { %v4201_v42 = vpop.xlane.xlu0 %4200 }
0x2c3a   : > { %v4202_v43 = vsub.f32 %v4194_v17, %v4201_v42 }
0x2c3c   : > { %v4203_v44 = vmul.f32 1.442695, %v4202_v43 }
0x2c3e   : > { %6071 = vpow2.f32 %v4203_v44 }
0x2c48   : > { %v6072_v45 = vpop.eup %6071 }
0x2c49   : > { %v4205_v46 = vsel %vm2753_vm11, %v6072_v45, 0.0 }
0x2c4a   : > { %4206 = vadd.xlane.f32.xlu1 %v4205_v46 }
0x2c5b   : > { %4212 = vrot.lane.b32.xlu1 %v7011_v57, %s6105_s18 }
0x2cac   : > { %v4313_v61 = vpop.xlane.xlu1 %4312 }
0x2cad   : > { %v4314_v47 = vsub.f32 %v4306_v22, %v4313_v61 }
0x2caf   : > { %v4315_v48 = vmul.f32 1.442695, %v4314_v47 }
0x2cb1   : > { %6073 = vpow2.f32 %v4315_v48  ;;  %v5211_v48 = vld [vmem:[%s7178_s1 + $0x23] ss:$0 sm:$0xff] }
0x2cb4   : > { %v4423_v40 = vpop.xlane.xlu0 %4422 }
0x2cb5   : > { %v4424_v49 = vsub.f32 %v4416_v29, %v4423_v40 }
0x2cb7   : > { %v4425_v50 = vmul.f32 1.442695, %v4424_v49 }
0x2cb9   : > { %6075 = vpow2.f32 %v4425_v50 }
0x2cbb   : > { %v6074_v53 = vpop.eup %6073 }
0x2cbc   : > { %v4533_v54 = vpop.xlane.xlu0 %4532  ;;  %v4317_v9 = vsel %vm2753_vm11, %v6074_v53, 0.0 }
0x2cbd   : > { %v4534_v26 = vsub.f32 %v4526_v15, %v4533_v54  ;;  %4318 = vadd.xlane.f32.xlu0 %v4317_v9 }
0x2cbf   : > { %v4535_v5 = vmul.f32 1.442695, %v4534_v26 }
0x2cc1   : > { %6077 = vpow2.f32 %v4535_v5 }
0x2cc3   : > { %v6076_v55 = vpop.eup %6075 }
0x2cc4   : > { %v4427_v56 = vsel %vm2753_vm11, %v6076_v55, 0.0 }
0x2cc5   : > { %4428 = vadd.xlane.f32.xlu1 %v4427_v56 }
0x2ccb   : > { %v6078_v39 = vpop.eup %6077 }
0x2ccc   : > { %v4537_v60 = vsel %vm2753_vm11, %v6078_v39, 0.0 }
0x2ccd   : > { %4538 = vadd.xlane.f32.xlu0 %v4537_v60 }
0x2cd6   : > { %4433 = vrot.lane.b32.xlu1 %v7011_v57, %s6107_s20 }
0x2cd7   : > { %v4207_v38 = vpop.xlane.xlu1 %4206 }
0x2cd8   : > { %6079 = vrcp.f32 %v4207_v38  ;;  %v5963_v38 = vld [vmem:[%s7177_s0 + $0x150] sm:$0xff]  }
0x2cda   : > { %4543 = vrot.lane.b32.xlu1 %v7011_v57, %s6109_s22  ;;  %s6119_s22 = smov 32  }
0x2cdb   : > { %v4213_v62 = vpop.permute.xlu1 %4212 }
0x2cdc   : > { %v4218_v63 = vsel %vm502_vm3, %v4213_v62, 0  ;;  %v5965_v62 = vld [vmem:[%s7177_s0 + $0x160] sm:$0xff]  }
0x2cdd   : > { %5818 = vmatpush3.bf16.msra.mxu1 %v4218_v63  ;;  %v5966_v63 = vld [vmem:[%s7177_s0 + $0x168] sm:$0xff]  }
0x2cde   : > { %5829 = vmatprep.subr.bf16.mxu1 %v6102_v8 }
0x2ce2   : > { %v6080_v1 = vpop.eup %6079 }
0x2ce3   : > { %v7062_v3 = vmul.f32 %v6080_v1, %v6072_v45  ;;  %4323 = vrot.lane.b32.xlu0 %v7011_v57, %s6106_s19 }
0x2ce5   : > { %v4210_v4 = vpack.c.bf16 %v7062_v3, %v7062_v3 }
0x2ce7   : > { %5820 = vmatmul.mubr.msk.bf16.vlgmr.msra.gmra.mrb[120].mxu1 %vm438_vm2, %v4210_v4 }
0x2ce8   : > { %5831 = vmatprep.mubr.msk.bf16.mxu1 %vm6103_vm1, %v6102_v8 }
0x2d4a   : > { %v4319_v2 = vpop.xlane.xlu0 %4318 }
0x2d4b   : > { %6081 = vrcp.f32 %v4319_v2 }
0x2d52   : > { %v4429_v52 = vpop.xlane.xlu1 %4428 }
0x2d53   : > { %6083 = vrcp.f32 %v4429_v52 }
0x2d55   : > { %v6082_v6 = vpop.eup %6081 }
0x2d56   : > { %v4321_v58 = vmul.f32 %v6082_v6, %v6074_v53  ;;  %v4434_v12 = vpop.permute.xlu1 %4433  ;;  %v5215_v6 = vld [vmem:[%s7178_s1 + $0x24] ss:$0 sm:$0xff] }
0x2d57   : > { %v4439_v16 = vsel %vm502_vm3, %v4434_v12, 0 }
0x2d58   : > { %v4322_v57 = vpack.c.bf16 %v4321_v58, %v4321_v58  ;;  %v5216_v58 = vld [vmem:[%s7178_s1 + $0x25] ss:$0 sm:$0xff] }
0x2d5a   : > { %v4539_v7 = vpop.xlane.xlu0 %4538  ;;  %v4544_v17 = vpop.permute.xlu1 %4543 }
0x2d5b   : > { %6085 = vrcp.f32 %v4539_v7  ;;  %v4549_v19 = vsel %vm502_vm3, %v4544_v17, 0 }
0x2d5d   : > { %v6084_v13 = vpop.eup %6083 }
0x2d5e   : > { %v4324_v10 = vpop.permute.xlu0 %4323  ;;  %v4431_v51 = vmul.f32 %v6084_v13, %v6076_v55  ;;  %v5968_v13 = vld [vmem:[%s7177_s0 + $0x178] sm:$0xff]  }
0x2d5f   : > { %v4329_v11 = vsel %vm502_vm3, %v4324_v10, 0 }
0x2d60   : > { %5830 = vmatpush3.bf16.msra.mxu1 %v4329_v11  ;;  %v4432_v14 = vpack.c.bf16 %v4431_v51, %v4431_v51 }
0x2d61   : > { %5841 = vmatprep.subr.bf16.mxu1 %v6102_v8 }
0x2d63   : > { %5832 = vmatmul.mubr.msk.bf16.vlgmr.msra.gmra.mrb[124].mxu1 %vm438_vm2, %v4322_v57  ;;  %v5967_v57 = vld [vmem:[%s7177_s0 + $0x170] sm:$0xff]  }
0x2d64   : > { %5842 = vmatpush3.bf16.msra.mxu1 %v4439_v16  ;;  %5843 = vmatprep.mubr.msk.bf16.mxu1 %vm6103_vm1, %v6102_v8  ;;  %v5217_v16 = vld [vmem:[%s7178_s1 + $0x26] ss:$0 sm:$0xff] }
0x2d65   : > { %5853 = vmatprep.subr.bf16.mxu1 %v6102_v8  ;;  %v6086_v18 = vpop.eup %6085 }
0x2d66   : > { %v4541_v20 = vmul.f32 %v6086_v18, %v6078_v39 }
0x2d68   : > { %v4542_v21 = vpack.c.bf16 %v4541_v20, %v4541_v20 }
0x2d6b   : > { %5844 = vmatmul.mubr.msk.bf16.vlgmr.msra.gmra.mrb[128].mxu1 %vm438_vm2, %v4432_v14 }
0x2d6c   : > { %5854 = vmatpush3.bf16.msra.mxu1 %v4549_v19  ;;  %5855 = vmatprep.mubr.msk.bf16.mxu1 %vm6103_vm1, %v6102_v8 }
0x2d6d   : > { %5867 = vmatprep.subr.bf16.mxu1 %v6102_v8 }
0x2d73   : > { %5856 = vmatmul.mubr.msk.bf16.vlgmr.msra.gmra.mrb[132].mxu1 %vm438_vm2, %v4542_v21 }
0x2d74   : > { %5871 = vmatprep.mubr.msk.bf16.mxu1 %vm6103_vm1, %v6102_v8  ;;  %5868 = vmatpush3.bf16.msra.mxu1 %v5963_v38 }
0x2d75   : > { %5869 = vmatprep.subr.bf16.mxu1 %v6102_v8 }
0x2dba   : > { %v4254_v22 = vpop.f32.mrb[120].mxu1 }
0x2dbb   : > { %v5821_v0 = vpop.f32.mrb[121].mxu1 }
0x2dbc   : > { %v4257_v23 = vpop.f32.mrb[122].mxu1 }
0x2dbd   : > { %v5822_v24 = vpop.f32.mrb[123].mxu1 }
0x2e36   : > { %v4365_v28 = vpop.f32.mrb[124].mxu1 }
0x2e37   : > { %4592 = vrot.lane.b32.xlu0 %v4365_v28, %s7199_s12  ;;  %v5833_v25 = vpop.f32.mrb[125].mxu1 }
0x2e38   : > { %v4368_v29 = vpop.f32.mrb[126].mxu1 }
0x2e39   : > { %v5834_v30 = vpop.f32.mrb[127].mxu1 }
0x2e3e   : > { %v4475_v33 = vpop.f32.mrb[128].mxu1 }
0x2e3f   : > { %4596 = vrot.lane.b32.xlu1 %v4475_v33, %s7196_s13  ;;  %v5845_v34 = vpop.f32.mrb[129].mxu1 }
0x2e40   : > { %v4478_v35 = vpop.f32.mrb[130].mxu1 }
0x2e41   : > { %v5846_v15 = vpop.f32.mrb[131].mxu1 }
0x2e42   : > { %v5969_v15 = vld [vmem:[%s7177_s0 + $0x180] sm:$0xff]  }
0x2e46   : > { %v4585_v36 = vpop.f32.mrb[132].mxu1 }
0x2e47   : > { %4600 = vrot.lane.b32.xlu0 %v4585_v36, %s7197_s14  ;;  %v5857_v37 = vpop.f32.mrb[133].mxu1  ;;  %v5970_v36 = vld [vmem:[%s7177_s0 + $0x188] sm:$0xff]  }
0x2e48   : > { %v4588_v59 = vpop.f32.mrb[134].mxu1 }
0x2e49   : > { %v5858_v41 = vpop.f32.mrb[135].mxu1 }
0x2ea9   : > { %v4593_v42 = vpop.permute.xlu0 %4592 }
0x2eaa   : > { %v4603_v44 = vsel %vm438_vm2, %v4254_v22, %v4593_v42  ;;  %v5221_v22 = vld [vmem:[%s7178_s1 + $0x27] ss:$0 sm:$0xff]  ;;  %v5227_v42 = vld [vmem:[%s7178_s1 + $0x2a] ss:$0 sm:$0xff] }
0x2eb1   : > { %v4597_v43 = vpop.permute.xlu1 %4596 }
0x2eb2   : > { %v4604_v45 = vsel %vm889_vm4, %v4603_v44, %v4597_v43  ;;  %v5228_v44 = vld [vmem:[%s7178_s1 + $0x2b] ss:$0 sm:$0xff] }
0x2eb9   : > { %v4601_v46 = vpop.permute.xlu0 %4600 }
0x2eba   : > { %v4605_v61 = vsel %vm891_vm5, %v4604_v45, %v4601_v46 }
0x2ebb   : > { %v4610_v47 = vpack.c.bf16 %v4605_v61, %v4605_v61 }
0x2ebd   : > { %5864 = vmatmul.mubr.msk.bf16.vlgmr.msra.gmra.mrb[132].mxu0 %vm338_vm0, %v4610_v47 }
0x2ebe   : > { %5883 = vmatprep.mubr.msk.bf16.mxu0 %vm6103_vm1, %v6102_v8  ;;  %5876 = vmatpush3.bf16.msra.mxu0 %v5965_v62 }
0x2ebf   : > { %5877 = vmatprep.subr.bf16.mxu0 %v6102_v8 }
0x2ec2   : > { %5878 = vmatpush3.bf16.msra.mxu0 %v5966_v63 }
0x2ec3   : > { %5879 = vmatprep.subr.bf16.mxu0 %v6102_v8 }
0x2ec6   : > { %5880 = vmatpush3.bf16.msra.mxu0 %v5967_v57 }
0x2ec7   : > { %5881 = vmatprep.subr.bf16.mxu0 %v6102_v8 }
0x2eca   : > { %5882 = vmatpush3.bf16.msra.mxu0 %v5968_v13 }
0x2f90   : > { %v4665_v40 = vpop.f32.mrb[132].mxu0 }
0x2f91   : > { %v4666_v49 = vadd.f32 %v5211_v48, %v4665_v40  ;;  %v5865_v50 = vpop.f32.mrb[133].mxu0 }
0x2f92   : > { %v4668_v53 = vpop.f32.mrb[134].mxu0 }
0x2f93   : > { %v4671_v54 = vadd.f32 %v4666_v49, %v6976_v31  ;;  %v5866_v9 = vpop.f32.mrb[135].mxu0  ;;  %v5964_v31 = vld [vmem:[%s7177_s0 + $0x158] sm:$0xff]  }
0x2f94   : > { %5870 = vmatpush3.bf16.msra.mxu1 %v5964_v31 }
0x2f95   : > { %v4674_v26 = vsel %vm1946_vm7, %v4671_v54, 0.0  ;;  %5887 = vmatprep.subr.bf16.mxu1 %v6102_v8 }
0x2f96   : > { %4675 = vadd.xlane.f32.xlu1 %v4674_v26 }
0x3023   : > { %v4676_v5 = vpop.xlane.xlu1 %4675 }
0x3024   : > { %v4677_v55 = vmul.f32 0.03125, %v4676_v5 }
0x3026   : > { %v4678_v56 = vsub.f32 %v4671_v54, %v4677_v55 }
0x3028   : > { %v4679_v39 = vmul.f32 %v4678_v56, %v4678_v56 }
0x302a   : > { %v4680_v60 = vsel %vm1946_vm7, %v4679_v39, 0.0 }
0x302b   : > { %4681 = vadd.xlane.f32.xlu0 %v4680_v60 }
0x30b8   : > { %v4682_v1 = vpop.xlane.xlu0 %4681 }
0x30b9   : > { %v4683_v4 = vmul.f32 0.03125, %v4682_v1 }
0x30bb   : > { %v4684_v2 = vadd.f32 1e-06, %v4683_v4 }
0x30bd   : > { %6087 = vrsqrt.f32 %v4684_v2 }
0x30c7   : > { %v6088_v52 = vpop.eup %6087 }
0x30c8   : > { %v4686_v7 = vmul.f32 %v6088_v52, %v4678_v56 }
0x30ca   : > { %v4691_v10 = vmul.f32 %v5215_v6, %v4686_v7 }
0x30cc   : > { %v4696_v11 = vadd.f32 %v5216_v58, %v4691_v10 }
0x30ce   : > { %v4701_v12 = vpack.c.bf16 %v4696_v11, %v4696_v11 }
0x30d0   : > { %5872 = vmatmul.mubr.msk.bf16.vlgmr.msra.gmra.mrb[136].mxu1 %vm338_vm0, %v4701_v12 }
0x30d1   : > { %5891 = vmatprep.mubr.msk.bf16.mxu1 %vm6103_vm1, %v6102_v8  ;;  %5888 = vmatpush3.bf16.msra.mxu1 %v5969_v15 }
0x30d2   : > { %5889 = vmatprep.subr.bf16.mxu1 %v6102_v8 }
0x30d5   : > { %5890 = vmatpush3.bf16.msra.mxu1 %v5970_v36 }
0x31a3   : > { %v4756_v51 = vpop.f32.mrb[136].mxu1 }
0x31a4   : > { %v4757_v17 = vadd.f32 %v5217_v16, %v4756_v51  ;;  %v5873_v14 = vpop.f32.mrb[137].mxu1 }
0x31a5   : > { %v4759_v18 = vpop.f32.mrb[138].mxu1 }
0x31a6   : > { %v4762_v19 = vmax.f32 %v4757_v17, 0.0  ;;  %v5874_v20 = vpop.f32.mrb[139].mxu1 }
0x31a8   : > { %v4771_v21 = vpack.c.bf16 %v4762_v19, %v4762_v19 }
0x31aa   : > { %5884 = vmatmul.mubr.msk.bf16.vlgmr.msra.gmra.mrb[136].mxu0 %vm1088_vm6, %v4771_v21 }
0x327d   : > { %v4838_v0 = vpop.f32.mrb[136].mxu0 }
0x327e   : > { %v4839_v23 = vadd.f32 %v5221_v22, %v4838_v0  ;;  %v5885_v24 = vpop.f32.mrb[137].mxu0 }
0x327f   : > { %v4841_v27 = vpop.f32.mrb[138].mxu0 }
0x3280   : > { %v4844_v28 = vadd.f32 %v4839_v23, %v4671_v54  ;;  %v5886_v25 = vpop.f32.mrb[139].mxu0 }
0x3282   : > { %v4847_v29 = vsel %vm1946_vm7, %v4844_v28, 0.0 }
0x3283   : > { %4848 = vadd.xlane.f32.xlu0 %v4847_v29 }
0x3299   : > { %4932 = vrot.lane.b32.xlu0 %v7062_v3, %s6119_s22 }
0x3310   : > { %v4849_v30 = vpop.xlane.xlu0 %4848 }
0x3311   : > { %v4850_v32 = vmul.f32 0.03125, %v4849_v30 }
0x3313   : > { %v4851_v33 = vsub.f32 %v4844_v28, %v4850_v32 }
0x3314   : > { %v4933_v8 = vpop.permute.xlu0 %4932 }
0x3315   : > { %v4852_v34 = vmul.f32 %v4851_v33, %v4851_v33 }
0x3317   : > { %v4853_v35 = vsel %vm1946_vm7, %v4852_v34, 0.0 }
0x3318   : > { %4854 = vadd.xlane.f32.xlu1 %v4853_v35 }
0x33a5   : > { %v4855_v3 = vpop.xlane.xlu1 %4854 }
0x33a6   : > { %v4856_v37 = vmul.f32 0.03125, %v4855_v3 }
0x33a8   : > { %v4857_v59 = vadd.f32 1e-06, %v4856_v37 }
0x33aa   : > { %6089 = vrsqrt.f32 %v4857_v59 }
0x33b4   : > { %v6090_v41 = vpop.eup %6089 }
0x33b5   : > { %v4859_v43 = vmul.f32 %v6090_v41, %v4851_v33 }
0x33b7   : > { %v4864_v45 = vmul.f32 %v5227_v42, %v4859_v43 }
0x33b9   : > { %v4869_v46 = vadd.f32 %v5228_v44, %v4864_v45 }
0x33bb   : > { %v4874_v61 = vpack.c.bf16 %v4869_v46, %v4869_v46  ;;  %v4935_v47 = vsel %vm338_vm0, %v4869_v46, %v4933_v8 }
0x33bc   : > { %v4937_v48 = vsel %vm4936_vm12, %v4935_v47, 0.0 }
0x33bd   : > { %5892 = vmatmul.mubr.msk.bf16.vlgmr.msra.gmra.mrb[140].mxu1 %vm338_vm0, %v4874_v61  ;;  %4938 = vst [vmem:[%s332_s15] sm:$0x7f] %v4937_v48 }
0x3490   : > { %v4924_v40 = vpop.f32.mrb[140].mxu1 }
0x3491   : > { %4930 = vst [vmem:[%s328_s10] sm:$0x7f] %v4924_v40  ;;  %v5893_v49 = vpop.f32.mrb[141].mxu1 }
0x3492   : > { %v4927_v50 = vpop.f32.mrb[142].mxu1 }
0x3493   : > { %v5894_v53 = vpop.f32.mrb[143].mxu1 }
0x3494 PF: > { %s18_s24 = sadd.s32 1, %s6100_s24  }
0x3495   : > { %p15_p4 = scmp.ge.s32.totalorder %s18_s24, 4  }
0x3497   :  { %17 = sbr.rel (!%p15_p4) target bundleno = 1 (0x1), region = 95 }

</bundles_post_ra>
